<compile_context>
chip_gen: v7x
topology: tpu7x:2x2x1
jax: 0.10.0
libtpu: 0.0.40
codegen_flags: <defaults>
</compile_context>

<pallas_src>
import jax
import jax.numpy as jnp
import numpy as np
from jax import lax
from jax.experimental import pallas as pl
from jax.experimental.pallas import tpu as pltpu


def _bottleneck_kernel(x_ref, w1_ref, b1_ref, w2_ref, b2_ref, w3_ref, b3_ref,
                       o_ref, pad_ref, col_ref):
    TB, H, W, Cin = x_ref.shape
    width = w1_ref.shape[1]
    Cout = w3_ref.shape[1]
    M = TB * H * W
    bf16 = jnp.bfloat16

    # --- conv1 (1x1x1, BN folded into w1) + bias + relu.  bf16 operands,
    #     f32 MXU accumulation, epilogue in f32, stored as bf16.
    h1 = jnp.dot(x_ref[...].reshape(M, Cin), w1_ref[...],
                 preferred_element_type=jnp.float32)
    h1 = jnp.maximum(h1 + b1_ref[...], 0.0).astype(bf16)          # (M, width)

    # --- zero only the 1-wide border of the bf16 pad scratch (interior is
    #     overwritten below); redone every step so a "parallel" grid sharded
    #     across TensorCores (each with its own scratch) stays correct.
    pad_ref[:, 0:1, :, :] = jnp.zeros((TB, 1, W + 2, width), bf16)
    pad_ref[:, H + 1:H + 2, :, :] = jnp.zeros((TB, 1, W + 2, width), bf16)
    pad_ref[:, :, 0:1, :] = jnp.zeros((TB, H + 2, 1, width), bf16)
    pad_ref[:, :, W + 1:W + 2, :] = jnp.zeros((TB, H + 2, 1, width), bf16)
    pad_ref[:, 1:H + 1, 1:W + 1, :] = h1.reshape(TB, H, W, width)

    # --- im2col: write the 9 taps once into the (M, 9*width) bf16 scratch.
    for dh in range(3):
        for dw in range(3):
            t = dh * 3 + dw
            col_ref[:, t * width:(t + 1) * width] = (
                pad_ref[:, dh:dh + H, dw:dw + W, :].reshape(M, width))

    # --- conv2 (1x3x3, stride 1, pad 1): one big-K GEMM (K = 9*width).
    h2 = jnp.dot(col_ref[...], w2_ref[...], preferred_element_type=jnp.float32)
    h2 = jnp.maximum(h2 + b2_ref[...], 0.0).astype(bf16)          # (M, width)

    # --- conv3 (1x1x1) + bias + identity residual + relu (downsample=None).
    #     Residual is re-read from the resident input block (kept out of the
    #     conv2 live range), upcast to f32 only here.
    h3 = jnp.dot(h2, w3_ref[...], preferred_element_type=jnp.float32)
    res = x_ref[...].reshape(M, Cout).astype(jnp.float32)
    o_ref[...] = jnp.maximum(h3 + b3_ref[...] + res, 0.0).reshape(
        TB, H, W, Cout).astype(o_ref.dtype)


def _vmem_budgets():
    """Per-TC block byte budget and scoped-VMEM limit from the chip's VMEM."""
    phys = 64 * 2**20                 # conservative fallback (v7x per-TC VMEM)
    try:
        phys = int(pltpu.get_tpu_info().vmem_capacity_bytes)
    except Exception:
        pass
    budget = int(phys * 0.55)         # block + scratch + intermediates budget
    limit = min(int(phys * 0.85), 110 * 2**20)
    return budget, limit


def _pick_frames_per_block(nt, H, W, cin, width, cout, budget_bytes):
    """Frames per grid block: the largest divisor of NT whose VMEM footprint
    (double-buffered bf16 in/out blocks + bf16 pad & im2col scratch + f32
    intermediates) fits the budget, preferring GEMM M >= 256 rows (fills the
    256-wide v6e/v7x MXU; v5e needs only 128) and an even grid length >= 2 so
    both v7x TensorCores get equal work."""
    hw = H * W

    def block_bytes(tb):
        m = tb * hw
        inp = tb * hw * cin * 2 * 2            # bf16 input, double-buffered
        out = tb * hw * cout * 2 * 2           # bf16 output, double-buffered
        pad = tb * (H + 2) * (W + 2) * width * 2
        col = m * 9 * width * 2
        interm = m * (3 * width + cout) * 4    # f32 h1/h2/h3-class temporaries
        return inp + out + pad + col + interm

    divisors = [d for d in range(1, nt + 1) if nt % d == 0]
    fits = [d for d in divisors if block_bytes(d) <= budget_bytes] or [1]

    def score(d):
        rows = d * hw
        g = nt // d
        return (rows >= 256, g >= 2 and g % 2 == 0, rows)

    return max(fits, key=score)


def bottleneck_forward(x_ncthw, params):
    w1, b1, w2, b2, w3, b3 = params
    N, C, T, H, W = x_ncthw.shape
    Cin, width = w1.shape
    Cout = w3.shape[1]
    assert C == Cin and Cout == Cin, "identity residual requires inplanes == planes*4"
    assert w2.shape == (9 * width, width)

    NT = N * T
    # TODO(synk): keep NTHWC/bf16 across blocks; this transpose is a full HBM
    # round trip when the block is used in isolation.
    x_cl = jnp.transpose(x_ncthw, (0, 2, 3, 4, 1)).reshape(
        NT, H, W, C).astype(jnp.bfloat16)

    budget, vmem_limit = _vmem_budgets()
    TB = _pick_frames_per_block(NT, H, W, Cin, width, Cout, budget)

    out_cl = pl.pallas_call(
        _bottleneck_kernel,
        out_shape=jax.ShapeDtypeStruct((NT, H, W, Cout), jnp.bfloat16),
        grid=(NT // TB,),
        in_specs=[
            pl.BlockSpec((TB, H, W, Cin), lambda n: (n, 0, 0, 0)),
            pl.BlockSpec((Cin, width), lambda n: (0, 0)),
            pl.BlockSpec((1, width), lambda n: (0, 0)),
            pl.BlockSpec((9 * width, width), lambda n: (0, 0)),
            pl.BlockSpec((1, width), lambda n: (0, 0)),
            pl.BlockSpec((width, Cout), lambda n: (0, 0)),
            pl.BlockSpec((1, Cout), lambda n: (0, 0)),
        ],
        out_specs=pl.BlockSpec((TB, H, W, Cout), lambda n: (n, 0, 0, 0)),
        scratch_shapes=[
            pltpu.VMEM((TB, H + 2, W + 2, width), jnp.bfloat16),   # padded h1
            pltpu.VMEM((TB * H * W, 9 * width), jnp.bfloat16),     # im2col
        ],
        compiler_params=pltpu.CompilerParams(
            dimension_semantics=("parallel",),
            vmem_limit_bytes=vmem_limit),
    )(x_cl, w1, b1, w2, b2, w3, b3)

    return jnp.transpose(out_cl.reshape(N, T, H, W, Cout), (0, 4, 1, 2, 3))


def make_params(key, inplanes, planes, base_width=64, groups=1, eps=1e-5):
    expansion = 4
    width = int(planes * (base_width / 64.0)) * groups
    cout = planes * expansion
    ks = jax.random.split(key, 15)

    # PyTorch conv weight shapes (temporal dim of size 1 dropped):
    # conv1 (width, inplanes), conv2 (width, width, 3, 3), conv3 (cout, width).
    w1 = 0.2 * jax.random.normal(ks[0], (width, inplanes), jnp.float32)
    w2 = 0.2 * jax.random.normal(ks[1], (width, width, 3, 3), jnp.float32)
    w3 = 0.2 * jax.random.normal(ks[2], (cout, width), jnp.float32)

    def fold_bn(c, k0):
        gamma = 1.0 + 0.1 * jax.random.normal(ks[k0], (c,), jnp.float32)
        beta = 0.1 * jax.random.normal(ks[k0 + 1], (c,), jnp.float32)
        mean = 0.1 * jax.random.normal(ks[k0 + 2], (c,), jnp.float32)
        var = jnp.abs(jax.random.normal(ks[k0 + 3], (c,), jnp.float32)) + 0.5
        s = gamma / jnp.sqrt(var + eps)
        b = beta - mean * s
        return s, b

    s1, b1 = fold_bn(width, 3)
    s2, b2 = fold_bn(width, 7)
    s3, b3 = fold_bn(cout, 11)

    # Kernel-layout weights with BN scale folded per output channel (exact in
    # f32, then cast to bf16 for native-rate MXU with f32 accumulation).
    w1_k = (jnp.transpose(w1, (1, 0)) * s1[None, :]).astype(jnp.bfloat16)        # (Cin, width)
    w2_hwio = jnp.transpose(w2, (2, 3, 1, 0)) * s2[None, None, None, :]          # (3,3,in,out)
    w2_k = w2_hwio.reshape(9 * width, width).astype(jnp.bfloat16)                # im2col layout
    w3_k = (jnp.transpose(w3, (1, 0)) * s3[None, :]).astype(jnp.bfloat16)        # (width, Cout)
    return (w1_k, b1.reshape(1, width).astype(jnp.float32),
            w2_k, b2.reshape(1, width).astype(jnp.float32),
            w3_k, b3.reshape(1, cout).astype(jnp.float32))


def reference_cl(x_cl_bf16, w1, b1, w2_hwio, b2, w3, b3):
    """Pure-JAX channels-last reference mirroring the kernel's numerics
    (bf16 operands, f32 accumulation, bf16 intermediate/output storage)."""
    f32 = jnp.float32
    h1 = jnp.einsum('nhwc,cd->nhwd', x_cl_bf16.astype(f32), w1.astype(f32))
    h1 = jnp.maximum(h1 + b1, 0.0).astype(jnp.bfloat16)
    h2 = lax.conv_general_dilated(h1.astype(f32), w2_hwio.astype(f32),
                                  (1, 1), ((1, 1), (1, 1)),
                                  dimension_numbers=('NHWC', 'HWIO', 'NHWC'))
    h2 = jnp.maximum(h2 + b2, 0.0).astype(jnp.bfloat16)
    h3 = jnp.einsum('nhwc,cd->nhwd', h2.astype(f32), w3.astype(f32)) + b3
    out = jnp.maximum(h3 + x_cl_bf16.astype(f32), 0.0)
    return out.astype(jnp.bfloat16)


if __name__ == "__main__":
    key = jax.random.PRNGKey(0)
    N, T, H, W = 2, 4, 8, 8
    planes = 16
    inplanes = planes * 4  # required so identity residual is valid (downsample=None)
    # NOTE: real ResNet configs (width/Cout multiples of 128) keep the channel
    # axes lane-dense; this test uses intentionally small shapes.

    kx, kp = jax.random.split(key)
    x = jax.random.normal(kx, (N, inplanes, T, H, W), jnp.float32)
    params = make_params(kp, inplanes, planes)

    out = jax.block_until_ready(bottleneck_forward(x, params))

    # pure-JAX reference check
    w1, b1, w2, b2, w3, b3 = params
    width = w1.shape[1]
    x_cl = jnp.transpose(x, (0, 2, 3, 4, 1)).reshape(
        N * T, H, W, inplanes).astype(jnp.bfloat16)
    w2_hwio = w2.reshape(3, 3, width, width)
    ref_cl = reference_cl(x_cl, w1, b1, w2_hwio, b2, w3, b3)
    ref = jnp.transpose(ref_cl.reshape(N, T, H, W, -1), (0, 4, 1, 2, 3))
    np.testing.assert_allclose(np.asarray(out, dtype=np.float32),
                               np.asarray(ref, dtype=np.float32),
                               rtol=2e-2, atol=2e-2)

    print("KERNEL_OK")
</pallas_src>

<mosaic_0001>
module attributes {stable_mosaic.version = 11 : i64} {
  func.func @_bottleneck_kernel(%arg0: i32, %arg1: memref<4x8x8x64xbf16, #tpu.memory_space<vmem>>, %arg2: memref<64x16xbf16, #tpu.memory_space<vmem>>, %arg3: memref<1x16xf32, #tpu.memory_space<vmem>>, %arg4: memref<144x16xbf16, #tpu.memory_space<vmem>>, %arg5: memref<1x16xf32, #tpu.memory_space<vmem>>, %arg6: memref<16x64xbf16, #tpu.memory_space<vmem>>, %arg7: memref<1x64xf32, #tpu.memory_space<vmem>>, %arg8: memref<4x8x8x64xbf16, #tpu.memory_space<vmem>>, %arg9: memref<4x10x10x16xbf16, #tpu.memory_space<vmem>>, %arg10: memref<256x144xbf16, #tpu.memory_space<vmem>>) attributes {dimension_semantics = [#tpu.dimension_semantics<parallel>], iteration_bounds = array<i64: 2>, scalar_prefetch = 0 : i64, scratch_operands = 2 : i64, tpu.core_type = #tpu.core_type<tc>, window_params = [{transform_indices = @transform_0, window_bounds = array<i64: 4, 8, 8, 64>}, {pipeline_mode = #tpu.pipeline_mode<synchronous>, transform_indices = @transform_1, window_bounds = array<i64: 64, 16>}, {pipeline_mode = #tpu.pipeline_mode<synchronous>, transform_indices = @transform_2, window_bounds = array<i64: 1, 16>}, {pipeline_mode = #tpu.pipeline_mode<synchronous>, transform_indices = @transform_3, window_bounds = array<i64: 144, 16>}, {pipeline_mode = #tpu.pipeline_mode<synchronous>, transform_indices = @transform_4, window_bounds = array<i64: 1, 16>}, {pipeline_mode = #tpu.pipeline_mode<synchronous>, transform_indices = @transform_5, window_bounds = array<i64: 16, 64>}, {pipeline_mode = #tpu.pipeline_mode<synchronous>, transform_indices = @transform_6, window_bounds = array<i64: 1, 64>}, {transform_indices = @transform_7, window_bounds = array<i64: 4, 8, 8, 64>}]} {
    %c0 = arith.constant 0 : index
    %c0_0 = arith.constant 0 : index
    %c0_1 = arith.constant 0 : index
    %c0_2 = arith.constant 0 : index
    %0 = vector.load %arg1[%c0, %c0_0, %c0_1, %c0_2] : memref<4x8x8x64xbf16, #tpu.memory_space<vmem>>, vector<4x8x8x64xbf16>
    %1 = vector.shape_cast %0 : vector<4x8x8x64xbf16> to vector<256x64xbf16>
    %c0_3 = arith.constant 0 : index
    %c0_4 = arith.constant 0 : index
    %2 = vector.load %arg2[%c0_3, %c0_4] : memref<64x16xbf16, #tpu.memory_space<vmem>>, vector<64x16xbf16>
    %cst = arith.constant dense<0.000000e+00> : vector<256x16xf32>
    %3 = tpu.matmul %1, %2, %cst {dimension_numbers = #tpu.dot_dimension_numbers<[1], [0], [0], [1], [0, 0, 1, 1], [], []>} : vector<256x64xbf16>, vector<64x16xbf16>, vector<256x16xf32> -> vector<256x16xf32>
    %c0_5 = arith.constant 0 : index
    %c0_6 = arith.constant 0 : index
    %4 = vector.load %arg3[%c0_5, %c0_6] : memref<1x16xf32, #tpu.memory_space<vmem>>, vector<1x16xf32>
    %5 = vector.broadcast %4 : vector<1x16xf32> to vector<256x16xf32>
    %6 = arith.addf %3, %5 : vector<256x16xf32>
    %cst_7 = arith.constant 0.000000e+00 : f32
    %7 = vector.broadcast %cst_7 : f32 to vector<256x16xf32>
    %8 = arith.maximumf %6, %7 : vector<256x16xf32>
    %9 = arith.truncf %8 : vector<256x16xf32> to vector<256x16xbf16>
    %cst_8 = arith.constant 0.000000e+00 : bf16
    %10 = vector.broadcast %cst_8 : bf16 to vector<4x1x10x16xbf16>
    %c0_9 = arith.constant 0 : index
    %c0_10 = arith.constant 0 : index
    %c0_11 = arith.constant 0 : index
    %c0_12 = arith.constant 0 : index
    %11 = vector.load %arg9[%c0_9, %c0_10, %c0_11, %c0_12] : memref<4x10x10x16xbf16, #tpu.memory_space<vmem>>, vector<4x1x10x16xbf16>
    tpu.vector_store %arg9[%c0_9, %c0_10, %c0_11, %c0_12], %10 {strides = array<i32>} : memref<4x10x10x16xbf16, #tpu.memory_space<vmem>>, vector<4x1x10x16xbf16>,
    %cst_13 = arith.constant 0.000000e+00 : bf16
    %12 = vector.broadcast %cst_13 : bf16 to vector<4x1x10x16xbf16>
    %c0_14 = arith.constant 0 : index
    %c9 = arith.constant 9 : index
    %c0_15 = arith.constant 0 : index
    %c0_16 = arith.constant 0 : index
    %13 = vector.load %arg9[%c0_14, %c9, %c0_15, %c0_16] : memref<4x10x10x16xbf16, #tpu.memory_space<vmem>>, vector<4x1x10x16xbf16>
    tpu.vector_store %arg9[%c0_14, %c9, %c0_15, %c0_16], %12 {strides = array<i32>} : memref<4x10x10x16xbf16, #tpu.memory_space<vmem>>, vector<4x1x10x16xbf16>,
    %cst_17 = arith.constant 0.000000e+00 : bf16
    %14 = vector.broadcast %cst_17 : bf16 to vector<4x10x1x16xbf16>
    %c0_18 = arith.constant 0 : index
    %c0_19 = arith.constant 0 : index
    %c0_20 = arith.constant 0 : index
    %c0_21 = arith.constant 0 : index
    %15 = vector.load %arg9[%c0_18, %c0_19, %c0_20, %c0_21] : memref<4x10x10x16xbf16, #tpu.memory_space<vmem>>, vector<4x10x1x16xbf16>
    tpu.vector_store %arg9[%c0_18, %c0_19, %c0_20, %c0_21], %14 {strides = array<i32>} : memref<4x10x10x16xbf16, #tpu.memory_space<vmem>>, vector<4x10x1x16xbf16>,
    %cst_22 = arith.constant 0.000000e+00 : bf16
    %16 = vector.broadcast %cst_22 : bf16 to vector<4x10x1x16xbf16>
    %c0_23 = arith.constant 0 : index
    %c0_24 = arith.constant 0 : index
    %c9_25 = arith.constant 9 : index
    %c0_26 = arith.constant 0 : index
    %17 = vector.load %arg9[%c0_23, %c0_24, %c9_25, %c0_26] : memref<4x10x10x16xbf16, #tpu.memory_space<vmem>>, vector<4x10x1x16xbf16>
    tpu.vector_store %arg9[%c0_23, %c0_24, %c9_25, %c0_26], %16 {strides = array<i32>} : memref<4x10x10x16xbf16, #tpu.memory_space<vmem>>, vector<4x10x1x16xbf16>,
    %18 = vector.shape_cast %9 : vector<256x16xbf16> to vector<4x8x8x16xbf16>
    %c0_27 = arith.constant 0 : index
    %c1 = arith.constant 1 : index
    %c1_28 = arith.constant 1 : index
    %c0_29 = arith.constant 0 : index
    %19 = vector.load %arg9[%c0_27, %c1, %c1_28, %c0_29] : memref<4x10x10x16xbf16, #tpu.memory_space<vmem>>, vector<4x8x8x16xbf16>
    tpu.vector_store %arg9[%c0_27, %c1, %c1_28, %c0_29], %18 {strides = array<i32>} : memref<4x10x10x16xbf16, #tpu.memory_space<vmem>>, vector<4x8x8x16xbf16>,
    %c0_30 = arith.constant 0 : index
    %c0_31 = arith.constant 0 : index
    %c0_32 = arith.constant 0 : index
    %c0_33 = arith.constant 0 : index
    %20 = vector.load %arg9[%c0_30, %c0_31, %c0_32, %c0_33] : memref<4x10x10x16xbf16, #tpu.memory_space<vmem>>, vector<4x8x8x16xbf16>
    %21 = vector.shape_cast %20 : vector<4x8x8x16xbf16> to vector<256x16xbf16>
    %c0_34 = arith.constant 0 : index
    %c0_35 = arith.constant 0 : index
    %22 = vector.load %arg10[%c0_34, %c0_35] : memref<256x144xbf16, #tpu.memory_space<vmem>>, vector<256x16xbf16>
    tpu.vector_store %arg10[%c0_34, %c0_35], %21 {strides = array<i32>} : memref<256x144xbf16, #tpu.memory_space<vmem>>, vector<256x16xbf16>,
    %c0_36 = arith.constant 0 : index
    %c0_37 = arith.constant 0 : index
    %c1_38 = arith.constant 1 : index
    %c0_39 = arith.constant 0 : index
    %23 = vector.load %arg9[%c0_36, %c0_37, %c1_38, %c0_39] : memref<4x10x10x16xbf16, #tpu.memory_space<vmem>>, vector<4x8x8x16xbf16>
    %24 = vector.shape_cast %23 : vector<4x8x8x16xbf16> to vector<256x16xbf16>
    %c0_40 = arith.constant 0 : index
    %c16 = arith.constant 16 : index
    %25 = vector.load %arg10[%c0_40, %c16] : memref<256x144xbf16, #tpu.memory_space<vmem>>, vector<256x16xbf16>
    tpu.vector_store %arg10[%c0_40, %c16], %24 {strides = array<i32>} : memref<256x144xbf16, #tpu.memory_space<vmem>>, vector<256x16xbf16>,
    %c0_41 = arith.constant 0 : index
    %c0_42 = arith.constant 0 : index
    %c2 = arith.constant 2 : index
    %c0_43 = arith.constant 0 : index
    %26 = vector.load %arg9[%c0_41, %c0_42, %c2, %c0_43] : memref<4x10x10x16xbf16, #tpu.memory_space<vmem>>, vector<4x8x8x16xbf16>
    %27 = vector.shape_cast %26 : vector<4x8x8x16xbf16> to vector<256x16xbf16>
    %c0_44 = arith.constant 0 : index
    %c32 = arith.constant 32 : index
    %28 = vector.load %arg10[%c0_44, %c32] : memref<256x144xbf16, #tpu.memory_space<vmem>>, vector<256x16xbf16>
    tpu.vector_store %arg10[%c0_44, %c32], %27 {strides = array<i32>} : memref<256x144xbf16, #tpu.memory_space<vmem>>, vector<256x16xbf16>,
    %c0_45 = arith.constant 0 : index
    %c1_46 = arith.constant 1 : index
    %c0_47 = arith.constant 0 : index
    %c0_48 = arith.constant 0 : index
    %29 = vector.load %arg9[%c0_45, %c1_46, %c0_47, %c0_48] : memref<4x10x10x16xbf16, #tpu.memory_space<vmem>>, vector<4x8x8x16xbf16>
    %30 = vector.shape_cast %29 : vector<4x8x8x16xbf16> to vector<256x16xbf16>
    %c0_49 = arith.constant 0 : index
    %c48 = arith.constant 48 : index
    %31 = vector.load %arg10[%c0_49, %c48] : memref<256x144xbf16, #tpu.memory_space<vmem>>, vector<256x16xbf16>
    tpu.vector_store %arg10[%c0_49, %c48], %30 {strides = array<i32>} : memref<256x144xbf16, #tpu.memory_space<vmem>>, vector<256x16xbf16>,
    %c0_50 = arith.constant 0 : index
    %c1_51 = arith.constant 1 : index
    %c1_52 = arith.constant 1 : index
    %c0_53 = arith.constant 0 : index
    %32 = vector.load %arg9[%c0_50, %c1_51, %c1_52, %c0_53] : memref<4x10x10x16xbf16, #tpu.memory_space<vmem>>, vector<4x8x8x16xbf16>
    %33 = vector.shape_cast %32 : vector<4x8x8x16xbf16> to vector<256x16xbf16>
    %c0_54 = arith.constant 0 : index
    %c64 = arith.constant 64 : index
    %34 = vector.load %arg10[%c0_54, %c64] : memref<256x144xbf16, #tpu.memory_space<vmem>>, vector<256x16xbf16>
    tpu.vector_store %arg10[%c0_54, %c64], %33 {strides = array<i32>} : memref<256x144xbf16, #tpu.memory_space<vmem>>, vector<256x16xbf16>,
    %c0_55 = arith.constant 0 : index
    %c1_56 = arith.constant 1 : index
    %c2_57 = arith.constant 2 : index
    %c0_58 = arith.constant 0 : index
    %35 = vector.load %arg9[%c0_55, %c1_56, %c2_57, %c0_58] : memref<4x10x10x16xbf16, #tpu.memory_space<vmem>>, vector<4x8x8x16xbf16>
    %36 = vector.shape_cast %35 : vector<4x8x8x16xbf16> to vector<256x16xbf16>
    %c0_59 = arith.constant 0 : index
    %c80 = arith.constant 80 : index
    %37 = vector.load %arg10[%c0_59, %c80] : memref<256x144xbf16, #tpu.memory_space<vmem>>, vector<256x16xbf16>
    tpu.vector_store %arg10[%c0_59, %c80], %36 {strides = array<i32>} : memref<256x144xbf16, #tpu.memory_space<vmem>>, vector<256x16xbf16>,
    %c0_60 = arith.constant 0 : index
    %c2_61 = arith.constant 2 : index
    %c0_62 = arith.constant 0 : index
    %c0_63 = arith.constant 0 : index
    %38 = vector.load %arg9[%c0_60, %c2_61, %c0_62, %c0_63] : memref<4x10x10x16xbf16, #tpu.memory_space<vmem>>, vector<4x8x8x16xbf16>
    %39 = vector.shape_cast %38 : vector<4x8x8x16xbf16> to vector<256x16xbf16>
    %c0_64 = arith.constant 0 : index
    %c96 = arith.constant 96 : index
    %40 = vector.load %arg10[%c0_64, %c96] : memref<256x144xbf16, #tpu.memory_space<vmem>>, vector<256x16xbf16>
    tpu.vector_store %arg10[%c0_64, %c96], %39 {strides = array<i32>} : memref<256x144xbf16, #tpu.memory_space<vmem>>, vector<256x16xbf16>,
    %c0_65 = arith.constant 0 : index
    %c2_66 = arith.constant 2 : index
    %c1_67 = arith.constant 1 : index
    %c0_68 = arith.constant 0 : index
    %41 = vector.load %arg9[%c0_65, %c2_66, %c1_67, %c0_68] : memref<4x10x10x16xbf16, #tpu.memory_space<vmem>>, vector<4x8x8x16xbf16>
    %42 = vector.shape_cast %41 : vector<4x8x8x16xbf16> to vector<256x16xbf16>
    %c0_69 = arith.constant 0 : index
    %c112 = arith.constant 112 : index
    %43 = vector.load %arg10[%c0_69, %c112] : memref<256x144xbf16, #tpu.memory_space<vmem>>, vector<256x16xbf16>
    tpu.vector_store %arg10[%c0_69, %c112], %42 {strides = array<i32>} : memref<256x144xbf16, #tpu.memory_space<vmem>>, vector<256x16xbf16>,
    %c0_70 = arith.constant 0 : index
    %c2_71 = arith.constant 2 : index
    %c2_72 = arith.constant 2 : index
    %c0_73 = arith.constant 0 : index
    %44 = vector.load %arg9[%c0_70, %c2_71, %c2_72, %c0_73] : memref<4x10x10x16xbf16, #tpu.memory_space<vmem>>, vector<4x8x8x16xbf16>
    %45 = vector.shape_cast %44 : vector<4x8x8x16xbf16> to vector<256x16xbf16>
    %c0_74 = arith.constant 0 : index
    %c128 = arith.constant 128 : index
    %46 = vector.load %arg10[%c0_74, %c128] : memref<256x144xbf16, #tpu.memory_space<vmem>>, vector<256x16xbf16>
    tpu.vector_store %arg10[%c0_74, %c128], %45 {strides = array<i32>} : memref<256x144xbf16, #tpu.memory_space<vmem>>, vector<256x16xbf16>,
    %c0_75 = arith.constant 0 : index
    %c0_76 = arith.constant 0 : index
    %47 = vector.load %arg10[%c0_75, %c0_76] : memref<256x144xbf16, #tpu.memory_space<vmem>>, vector<256x144xbf16>
    %c0_77 = arith.constant 0 : index
    %c0_78 = arith.constant 0 : index
    %48 = vector.load %arg4[%c0_77, %c0_78] : memref<144x16xbf16, #tpu.memory_space<vmem>>, vector<144x16xbf16>
    %cst_79 = arith.constant dense<0.000000e+00> : vector<256x16xf32>
    %49 = tpu.matmul %47, %48, %cst_79 {dimension_numbers = #tpu.dot_dimension_numbers<[1], [0], [0], [1], [0, 0, 1, 1], [], []>} : vector<256x144xbf16>, vector<144x16xbf16>, vector<256x16xf32> -> vector<256x16xf32>
    %c0_80 = arith.constant 0 : index
    %c0_81 = arith.constant 0 : index
    %50 = vector.load %arg5[%c0_80, %c0_81] : memref<1x16xf32, #tpu.memory_space<vmem>>, vector<1x16xf32>
    %51 = vector.broadcast %50 : vector<1x16xf32> to vector<256x16xf32>
    %52 = arith.addf %49, %51 : vector<256x16xf32>
    %cst_82 = arith.constant 0.000000e+00 : f32
    %53 = vector.broadcast %cst_82 : f32 to vector<256x16xf32>
    %54 = arith.maximumf %52, %53 : vector<256x16xf32>
    %55 = arith.truncf %54 : vector<256x16xf32> to vector<256x16xbf16>
    %c0_83 = arith.constant 0 : index
    %c0_84 = arith.constant 0 : index
    %56 = vector.load %arg6[%c0_83, %c0_84] : memref<16x64xbf16, #tpu.memory_space<vmem>>, vector<16x64xbf16>
    %cst_85 = arith.constant dense<0.000000e+00> : vector<256x64xf32>
    %57 = tpu.matmul %55, %56, %cst_85 {dimension_numbers = #tpu.dot_dimension_numbers<[1], [0], [0], [1], [0, 0, 1, 1], [], []>} : vector<256x16xbf16>, vector<16x64xbf16>, vector<256x64xf32> -> vector<256x64xf32>
    %c0_86 = arith.constant 0 : index
    %c0_87 = arith.constant 0 : index
    %c0_88 = arith.constant 0 : index
    %c0_89 = arith.constant 0 : index
    %58 = vector.load %arg1[%c0_86, %c0_87, %c0_88, %c0_89] : memref<4x8x8x64xbf16, #tpu.memory_space<vmem>>, vector<4x8x8x64xbf16>
    %59 = vector.shape_cast %58 : vector<4x8x8x64xbf16> to vector<256x64xbf16>
    %60 = arith.extf %59 : vector<256x64xbf16> to vector<256x64xf32>
    %c0_90 = arith.constant 0 : index
    %c0_91 = arith.constant 0 : index
    %61 = vector.load %arg7[%c0_90, %c0_91] : memref<1x64xf32, #tpu.memory_space<vmem>>, vector<1x64xf32>
    %62 = vector.broadcast %61 : vector<1x64xf32> to vector<256x64xf32>
    %63 = arith.addf %57, %62 : vector<256x64xf32>
    %64 = arith.addf %63, %60 : vector<256x64xf32>
    %cst_92 = arith.constant 0.000000e+00 : f32
    %65 = vector.broadcast %cst_92 : f32 to vector<256x64xf32>
    %66 = arith.maximumf %64, %65 : vector<256x64xf32>
    %67 = vector.shape_cast %66 : vector<256x64xf32> to vector<4x8x8x64xf32>
    %68 = arith.truncf %67 : vector<4x8x8x64xf32> to vector<4x8x8x64xbf16>
    %c0_93 = arith.constant 0 : index
    %c0_94 = arith.constant 0 : index
    %c0_95 = arith.constant 0 : index
    %c0_96 = arith.constant 0 : index
    %69 = vector.load %arg8[%c0_93, %c0_94, %c0_95, %c0_96] : memref<4x8x8x64xbf16, #tpu.memory_space<vmem>>, vector<4x8x8x64xbf16>
    tpu.vector_store %arg8[%c0_93, %c0_94, %c0_95, %c0_96], %68 {strides = array<i32>} : memref<4x8x8x64xbf16, #tpu.memory_space<vmem>>, vector<4x8x8x64xbf16>,
    return
  }
  func.func @transform_0(%arg0: i32) -> (i32, i32, i32, i32) {
    %c0_i32 = arith.constant 0 : i32
    %c0_i32_0 = arith.constant 0 : i32
    %c0_i32_1 = arith.constant 0 : i32
    %c0_i32_2 = arith.constant 0 : i32
    return %arg0, %c0_i32, %c0_i32_0, %c0_i32_1 : i32, i32, i32, i32
  }
  func.func @transform_1(%arg0: i32) -> (i32, i32) {
    %c0_i32 = arith.constant 0 : i32
    %c0_i32_0 = arith.constant 0 : i32
    %c0_i32_1 = arith.constant 0 : i32
    return %c0_i32, %c0_i32_0 : i32, i32
  }
  func.func @transform_2(%arg0: i32) -> (i32, i32) {
    %c0_i32 = arith.constant 0 : i32
    %c0_i32_0 = arith.constant 0 : i32
    %c0_i32_1 = arith.constant 0 : i32
    return %c0_i32, %c0_i32_0 : i32, i32
  }
  func.func @transform_3(%arg0: i32) -> (i32, i32) {
    %c0_i32 = arith.constant 0 : i32
    %c0_i32_0 = arith.constant 0 : i32
    %c0_i32_1 = arith.constant 0 : i32
    return %c0_i32, %c0_i32_0 : i32, i32
  }
  func.func @transform_4(%arg0: i32) -> (i32, i32) {
    %c0_i32 = arith.constant 0 : i32
    %c0_i32_0 = arith.constant 0 : i32
    %c0_i32_1 = arith.constant 0 : i32
    return %c0_i32, %c0_i32_0 : i32, i32
  }
  func.func @transform_5(%arg0: i32) -> (i32, i32) {
    %c0_i32 = arith.constant 0 : i32
    %c0_i32_0 = arith.constant 0 : i32
    %c0_i32_1 = arith.constant 0 : i32
    return %c0_i32, %c0_i32_0 : i32, i32
  }
  func.func @transform_6(%arg0: i32) -> (i32, i32) {
    %c0_i32 = arith.constant 0 : i32
    %c0_i32_0 = arith.constant 0 : i32
    %c0_i32_1 = arith.constant 0 : i32
    return %c0_i32, %c0_i32_0 : i32, i32
  }
  func.func @transform_7(%arg0: i32) -> (i32, i32, i32, i32) {
    %c0_i32 = arith.constant 0 : i32
    %c0_i32_0 = arith.constant 0 : i32
    %c0_i32_1 = arith.constant 0 : i32
    %c0_i32_2 = arith.constant 0 : i32
    return %arg0, %c0_i32, %c0_i32_0, %c0_i32_1 : i32, i32, i32, i32
  }
}

</mosaic_0001>

<bundles_post_ra>
// kernel: tpu_custom_call.1
= control target key start
LH: loop header
LB: loop body
LE: loop exit
PB: predicated region body
PF: predicated region fallthrough
CT: control target
= control target key end

     0   :  { %12 = vsyncpa [#allocation5], 0  ;;  %s8700_s0 = inlined_call_operand.hbm [shape: bf16[8,8,8,64], index: 0, kind: input, shape index: {}]   ;;  %s8701_s1 = inlined_call_operand.vmem [shape: bf16[64,16], index: 1, kind: input, shape index: {}]   ;;  %s8702_s2 = inlined_call_operand.vmem [shape: f32[1,16], index: 2, kind: input, shape index: {}]   ;;  %s8703_s3 = inlined_call_operand.vmem [shape: bf16[144,16], index: 3, kind: input, shape index: {}]   ;;  %s8704_s4 = inlined_call_operand.vmem [shape: f32[1,16], index: 4, kind: input, shape index: {}]   ;;  %s8705_s5 = inlined_call_operand.vmem [shape: bf16[16,64], index: 5, kind: input, shape index: {}]   ;;  %s8706_s6 = inlined_call_operand.vmem [shape: f32[1,64], index: 6, kind: input, shape index: {}]   ;;  %s8707_s7 = inlined_call_operand.hbm [shape: bf16[8,8,8,64], index: 7, kind: output, shape index: {}]  }
   0x1   :  { %14 = vsyncpa [#allocation5 + $0x1], 0 }
   0x2   :  { %15 = vsyncpa [#allocation6], 0 }
   0x3   :  { %17 = vsyncpa [#allocation6 + $0x1], 0  ;;  %s6798_s24 = smov 0   ;;  %s6800_s25 = smov 0  }
   0x4   :  { %s6802_s26 = smov 0   ;;  %s6804_s27 = smov 0  }
   0x5 LB: > { %s6819_s28 = sadd.s32 4294967295, %s6743_s27   ;;  %s5897_s29 = sadd.s32 4294967294, %s6743_s27   ;;  %s6743_s27 = sphi %s6804_s27, %s8730_s27   ;;  %s6739_s26 = sphi %s6802_s26, %s8729_s26   ;;  %s6735_s25 = sphi %s6800_s25, %s8728_s25   ;;  %s6731_s24 = sphi %s6798_s24, %s8727_s24  }
   0x6   : > { %s6823_s30 = sadd.s32 1, %s6743_s27   ;;  %s30_s8 = sadd.s32 1, %s6739_s26 }
   0x7   : > { %s27_s9 = ssub.s32 %s6743_s27, %s6823_s30  ;;  %p37_p0 = scmp.ne.s32.totalorder %s6739_s26, %s6735_s25 }
   0x8   : > { %p28_p1 = scmp.eq.s32.totalorder %s27_s9, 0  ;;  %p38_p2 = scmp.eq.s32.totalorder %s6743_s27, 0 }
   0x9   : > { %p43_p3 = scmp.ne.s32.totalorder %s6735_s25, %s6731_s24  ;;  %p44_p4 = scmp.eq.s32.totalorder %s6819_s28, 0 }
   0xa   : > { %s6835_s10 = scalar_select %p28_p1, %s6739_s26, %s30_s8  }
   0xb   : > { %p6837_p5 = por %p38_p2, %p37_p0  ;;  %p6841_p6 = por %p44_p4, %p43_p3 }
   0xc   : > { %p193_p7 = scmp.eq.s32.totalorder %s6819_s28, 1  ;;  %p199_p8 = scmp.eq.s32.totalorder %s5897_s29, 1 }
   0xd   : > { %p6522_p10 = scmp.lt.s32.totalorder %s6743_s27, 2  ;;  %s237_s15 = sand.u32 1, %s6739_s26  }
   0xe   : > { %p6848_p11 = por %p193_p7, %p37_p0  ;;  %p6852_p12 = por %p199_p8, %p43_p3 }
   0xf   : > { %s6267_s16 = sshll.u32 %s6743_s27, 11  ;;  %s5900_s17 = sshll.u32 %s237_s15, 7 }
  0x10   : > { %s8711_s13 = scalar_select %p6848_p11, 1, 0 }
  0x11   : > { %s8712_s14 = scalar_select %p6852_p12, 1, 0 }
  0x12   : > { %s6861_s20 = scalar_lea.hbm %s8700_s0, %s6267_s16  ;;  %s241_s21 = scalar_lea.vmem [#allocation4], %s5900_s17 }
  0x13   : > { %s249_s22 = sshll.u32 %s241_s21, 4  ;;  %p6865_p13 = pnand %p6522_p10, %p6837_p5  ;;  %s6869_s22 = int_to_ptr.vmem [resolvable:$true] %s249_s22 }
  0x14   : > { %s6871_s29 = scalar_lea.sflag [#allocation5], %s237_s15  ;;  %s6647_s8 = scalar_lea.hbm %s6861_s20, 2048 }
  0x15   : > { %p6648_p0 = scmp.ne.s32.totalorder %s6861_s20, %s6647_s8  ;;  %p6649_p1 = pneg %p6865_p13 }
  0x16   : > { %s6652_s16 = scalar_lea.hbm %s8700_s0, 4096  ;;  %p6653_p4 = scmp.lt.u32.totalorder %s6861_s20, %s8700_s0 }
  0x17   : > { %p6650_p2 = pnand %p6649_p1, %p6648_p0  ;;  %p6654_p5 = scmp.lt.u32.totalorder %s6652_s16, %s6647_s8 }
  0x18   : > { %p6656_p8 = scmp.lt.u32.totalorder %s6647_s8, %s6861_s20 }
  0x19   : > { %p6651_p3 = pneg %p6650_p2  ;;  %p6655_p7 = por %p6654_p5, %p6653_p4 }
  0x1b   : > { %p6657_p10 = por %p6656_p8, %p6655_p7 }
  0x1d   : > { %p6658_p9 = pnand %p6657_p10, %p6651_p3 }
  0x1f   : > { %6661 = shalt.err (!%p6658_p9)
}
  0x20   : > { %s6662_s15 = scalar_lea.vmem %s6869_s22, 2048  ;;  %s6745_s19 = smov [#allocation4]  }
  0x21   : > { %p6663_p0 = scmp.ne.s32.totalorder %s6869_s22, %s6662_s15  ;;  %s6667_s21 = sshll.u32 %s6745_s19, 4  ;;  %s6668_s21 = int_to_ptr.vmem [resolvable:$false] %s6667_s21 }
  0x22   : > { %s6669_s9 = scalar_lea.vmem %s6668_s21, 4096  ;;  %p6670_p11 = scmp.lt.s32.totalorder %s6869_s22, %s6668_s21 }
  0x23   : > { %p6665_p2 = pnand %p6663_p0, %p6649_p1  ;;  %p6671_p4 = scmp.lt.s32.totalorder %s6669_s9, %s6662_s15 }
  0x25   : > { %p6666_p12 = pneg %p6665_p2  ;;  %p6672_p5 = por %p6671_p4, %p6670_p11 }
  0x27   : > { %p6673_p7 = pnand %p6672_p5, %p6666_p12 }
  0x29   : > { %6676 = shalt.err (!%p6673_p7)
}
  0x2a   : > { %s6746_s8 = smov 64   ;;  %s6747_s11 = smov 4  }
  0x2b   : > { %6517 = dma.hbm_to_vmem [thread:$0]  (!%p6865_p13), %s6861_s20, 2048, %s6869_s22, %s6871_s29, %s6746_s8, %s6746_s8, %s6747_s11  }
  0x2c   : > { %p5904_p9 = scmp.ge.s32.totalorder %s6743_s27, 1  ;;  %p257_p1 = scmp.lt.s32.totalorder %s6743_s27, 3 }
  0x2e   : > { %p258_p3 = pnand %p5904_p9, %p257_p1 }
  0x2f   : > { %s6902_s16 = sand.u32 (!%p258_p3), 1, %s6735_s25  }
  0x30   : > { %261 = sbr.rel (%p258_p3) target bundleno = 1282 (0x502), region = 48  ;;  %s5905_s17 = sshll.u32 (!%p258_p3), %s6902_s16, 7 }
  0x31   : > { %s264_s18 = scalar_lea.sflag (!%p258_p3), [#allocation5], %s6902_s16  ;;  %s6908_s15 = scalar_lea.vmem (!%p258_p3), [#allocation4], %s5905_s17 }
  0x37   : > { %6722 = dma.done.wait (%p6841_p6), %s264_s18, 2048  }
  0x38   : > { %6724 = vsyncadd (%p6841_p6), %s264_s18, 4294965248  ;;  %v6567_v0 = vld [vmem:[%s8701_s1] sm:$0xff]   ;;  %v6568_v1 = vld [vmem:[%s8701_s1 + $0x8] sm:$0xff]   ;;  %vm452_vm0 = vcmask 523264   ;;  %vm712_vm1 = vcmask 122880   ;;  %vm710_vm6 = vcmask 125952  }
  0x39   : > { %6418 = vmatprep.subr.bf16.mxu0 %v6567_v0  ;;  %v6569_v2 = vld [vmem:[%s8701_s1 + $0x10] sm:$0xff]   ;;  %v6571_v3 = vld [vmem:[%s6908_s15] sm:$0xff]   ;;  %v6570_v4 = vld [vmem:[%s8701_s1 + $0x18] sm:$0xff]   ;;  %vm730_vm2 = vsmask.f32 256  ;;  %v6748_v55 = vmov 0  }
  0x3a   : > { %6419 = vmatpush3.bf16.msra.mxu0 %v6567_v0  ;;  %6426 = vmatprep.mubr.msk.bf16.mxu0 %vm452_vm0, %v6571_v3  ;;  %v6572_v5 = vld [vmem:[%s6908_s15 + $0x8] sm:$0xff]   ;;  %v6573_v6 = vld [vmem:[%s6908_s15 + $0x10] sm:$0xff]   ;;  %v6574_v7 = vld [vmem:[%s6908_s15 + $0x18] sm:$0xff]   ;;  %vm852_vm3 = vsmask.f32 7938  ;;  %vm2470_vm8 = vcmask 1042432  }
  0x3b   : > { %6420 = vmatprep.subr.bf16.mxu0 %v6568_v1  ;;  %v6575_v8 = vld [vmem:[%s6908_s15 + $0x20] sm:$0xff]   ;;  %v6576_v9 = vld [vmem:[%s6908_s15 + $0x28] sm:$0xff]   ;;  %v6577_v10 = vld [vmem:[%s6908_s15 + $0x30] sm:$0xff]   ;;  %711 = vst.msk [vmem:[#allocation2] sm:$0xf] %vm710_vm6, %v6748_v55  ;;  %6492 = vmatprep.subr.bf16.mxu1 %v6748_v55  ;;  %vm2471_vm9 = vcmask 1046532  }
  0x3c   : > { %v6578_v11 = vld [vmem:[%s6908_s15 + $0x38] sm:$0xff]   ;;  %v6579_v12 = vld [vmem:[%s6908_s15 + $0x40] sm:$0xff]   ;;  %v6580_v13 = vld [vmem:[%s6908_s15 + $0x48] sm:$0xff]   ;;  %713 = vst.msk [vmem:[#allocation2 + $0x4] sm:$0x1] %vm712_vm1, %v6748_v55  ;;  %s6749_s18 = smov 48  }
  0x3d   : > { %v6581_v14 = vld [vmem:[%s6908_s15 + $0x50] sm:$0xff]   ;;  %v6582_v15 = vld [vmem:[%s6908_s15 + $0x58] sm:$0xff]   ;;  %v6583_v16 = vld [vmem:[%s6908_s15 + $0x60] sm:$0xff]   ;;  %714 = vst.msk [vmem:[#allocation2 + $0x50] sm:$0xf] %vm710_vm6, %v6748_v55  ;;  %s6750_s20 = smov 96  }
  0x3e   : > { %6421 = vmatpush3.bf16.msra.mxu0 %v6568_v1  ;;  %v6584_v17 = vld [vmem:[%s6908_s15 + $0x68] sm:$0xff]   ;;  %v6585_v18 = vld [vmem:[%s6908_s15 + $0x70] sm:$0xff]   ;;  %v6586_v19 = vld [vmem:[%s6908_s15 + $0x78] sm:$0xff]   ;;  %715 = vst.msk [vmem:[#allocation2 + $0x54] sm:$0x1] %vm712_vm1, %v6748_v55  ;;  %s6751_s22 = smov 80  }
  0x3f   : > { %6422 = vmatprep.subr.bf16.mxu0 %v6569_v2  ;;  %vm6959_vm4 = vmand %vm712_vm1, %vm730_vm2  ;;  %v741_v21 = vld [vmem:[#allocation2 + $0x18] sm:$0x1]  ;;  %v863_v22 = vld [vmem:[#allocation2 + $0x1c] sm:$0x1]  ;;  %716 = vst.msk [vmem:[#allocation2 + $0xa0] sm:$0xf] %vm710_vm6, %v6748_v55 }
  0x40   : > { %v742_v23 = vsel %vm6959_vm4, 0, %v741_v21  ;;  %vm6967_vm5 = vmand %vm712_vm1, %vm852_vm3  ;;  %v735_v25 = vld [vmem:[#allocation2 + $0x8] sm:$0x1]  ;;  %v857_v26 = vld [vmem:[#allocation2 + $0xc] sm:$0x1]  ;;  %vm1697_vm14 = vcmask 130048  }
  0x41   : > { %743 = vst [vmem:[#allocation2 + $0x18] sm:$0x1] %v742_v23  ;;  %v864_v27 = vsel %vm6967_vm5, 0, %v863_v22  ;;  %v736_v28 = vsel %vm6959_vm4, 0, %v735_v25  ;;  %v858_v29 = vsel %vm6967_vm5, 0, %v857_v26  ;;  %vm6987_vm7 = vmand %vm710_vm6, %vm852_vm3  ;;  %s6752_s23 = smov 32  }
  0x42   : > { %6423 = vmatpush3.bf16.msra.mxu0 %v6569_v2  ;;  %v744_v30 = vld [vmem:[#allocation2 + $0x20] sm:$0x1]  ;;  %865 = vst [vmem:[#allocation2 + $0x1c] sm:$0x1] %v864_v27  ;;  %737 = vst [vmem:[#allocation2 + $0x8] sm:$0x1] %v736_v28 }
  0x43   : > { %6424 = vmatprep.subr.bf16.mxu0 %v6570_v4  ;;  %859 = vst [vmem:[#allocation2 + $0xc] sm:$0x1] %v858_v29  ;;  %v745_v31 = vsel %vm6959_vm4, 0, %v744_v30  ;;  %v866_v32 = vld [vmem:[#allocation2 + $0x24] sm:$0x1]  ;;  %vm7121_vm12 = vmor %vm2470_vm8, %vm2471_vm9  ;;  %s6753_s29 = smov 16  }
  0x44   : > { %v738_v33 = vld [vmem:[#allocation2 + $0x10] sm:$0x1]  ;;  %746 = vst [vmem:[#allocation2 + $0x20] sm:$0x1] %v745_v31  ;;  %v867_v34 = vsel %vm6967_vm5, 0, %v866_v32  ;;  %s6754_s19 = smov 112  }
  0x45   : > { %v739_v35 = vsel %vm6959_vm4, 0, %v738_v33  ;;  %v860_v36 = vld [vmem:[#allocation2 + $0x14] sm:$0x1]  ;;  %868 = vst [vmem:[#allocation2 + $0x24] sm:$0x1] %v867_v34  ;;  %s6755_s21 = smov 64  }
  0x46   : > { %6425 = vmatpush3.bf16.msra.mxu0 %v6570_v4  ;;  %740 = vst [vmem:[#allocation2 + $0x10] sm:$0x1] %v739_v35  ;;  %v861_v37 = vsel %vm6967_vm5, 0, %v860_v36  ;;  %v753_v39 = vld [vmem:[#allocation2 + $0x38] sm:$0x1]  ;;  %vm2325_vm15 = vcmask 261248  }
  0x47   : > { %862 = vst [vmem:[#allocation2 + $0x14] sm:$0x1] %v861_v37  ;;  %v754_v40 = vsel %vm6959_vm4, 0, %v753_v39  ;;  %v875_v41 = vld [vmem:[#allocation2 + $0x3c] sm:$0x1]  ;;  %5183 = vmatprep.subr.bf16.mxu0 %v6748_v55  ;;  %vm3499_vm2 = vcmask 654848  }
  0x48   : > { %755 = vst [vmem:[#allocation2 + $0x38] sm:$0x1] %v754_v40  ;;  %v747_v42 = vld [vmem:[#allocation2 + $0x28] sm:$0x1]  ;;  %v876_v43 = vsel %vm6967_vm5, 0, %v875_v41  ;;  %vm3868_vm3 = vcmask 786048  }
  0x49   : > { %6427 = vmatmul.mubr.msk.bf16.vlgmr.msra.gmra.mrb[0].mxu0 %vm452_vm0, %v6572_v5  ;;  %v748_v44 = vsel %vm6959_vm4, 0, %v747_v42  ;;  %877 = vst [vmem:[#allocation2 + $0x3c] sm:$0x1] %v876_v43  ;;  %v869_v45 = vld [vmem:[#allocation2 + $0x2c] sm:$0x1]  ;;  %vm4671_vm8 = vcmask 1048448  }
  0x4a   : > { %6430 = vmatprep.mubr.msk.bf16.mxu0 %vm452_vm0, %v6573_v6  ;;  %749 = vst [vmem:[#allocation2 + $0x28] sm:$0x1] %v748_v44  ;;  %v870_v46 = vsel %vm6967_vm5, 0, %v869_v45  ;;  %v756_v47 = vld [vmem:[#allocation2 + $0x40] sm:$0x1]  ;;  %s8533_s8 = scalar_lea.vmem [#allocation7], %s5905_s17 }
  0x4b   : > { %871 = vst [vmem:[#allocation2 + $0x2c] sm:$0x1] %v870_v46  ;;  %v878_v48 = vld [vmem:[#allocation2 + $0x44] sm:$0x1]  ;;  %v757_v49 = vsel %vm6959_vm4, 0, %v756_v47  ;;  %s6301_s17 = sshll.u32 %s6819_s28, 11 }
  0x4c   : > { %v879_v50 = vsel %vm6967_vm5, 0, %v878_v48  ;;  %v750_v51 = vld [vmem:[#allocation2 + $0x30] sm:$0x1]  ;;  %v872_v52 = vld [vmem:[#allocation2 + $0x34] sm:$0x1]  ;;  %s8646_s9 = scalar_lea.hbm %s8707_s7, %s6301_s17  ;;  %s5810_s28 = scalar_lea.sflag [#allocation6], %s6902_s16 }
  0x4d   : > { %758 = vst [vmem:[#allocation2 + $0x40] sm:$0x1] %v757_v49  ;;  %880 = vst [vmem:[#allocation2 + $0x44] sm:$0x1] %v879_v50  ;;  %v751_v53 = vsel %vm6959_vm4, 0, %v750_v51  ;;  %v873_v54 = vsel %vm6967_vm5, 0, %v872_v52 }
  0x4e   : > { %752 = vst [vmem:[#allocation2 + $0x30] sm:$0x1] %v751_v53  ;;  %874 = vst [vmem:[#allocation2 + $0x34] sm:$0x1] %v873_v54  ;;  %v771_v56 = vld [vmem:[#allocation2 + $0x68] sm:$0x1] }
  0x4f   : > { %717 = vst.msk [vmem:[#allocation2 + $0xa4] sm:$0x1] %vm712_vm1, %v6748_v55  ;;  %719 = vst.msk [vmem:[#allocation2 + $0xf4] sm:$0x1] %vm712_vm1, %v6748_v55  ;;  %v893_v57 = vld [vmem:[#allocation2 + $0x6c] sm:$0x1] }
  0x50   : > { %718 = vst.msk [vmem:[#allocation2 + $0xf0] sm:$0xf] %vm710_vm6, %v6748_v55  ;;  %721 = vst.msk [vmem:[#allocation2 + $0x48] sm:$0xf] %vm710_vm6, %v6748_v55  ;;  %v772_v58 = vsel %vm6959_vm4, 0, %v771_v56  ;;  %v894_v59 = vsel %vm6967_vm5, 0, %v893_v57 }
  0x51   : > { %6431 = vmatmul.mubr.msk.bf16.gmra.mrb[4].mxu0 %vm452_vm0, %v6574_v7  ;;  %722 = vst.msk [vmem:[#allocation2 + $0x4c] sm:$0x1] %vm712_vm1, %v6748_v55  ;;  %724 = vst.msk [vmem:[#allocation2 + $0x9c] sm:$0x1] %vm712_vm1, %v6748_v55  ;;  %v854_v60 = vld [vmem:[#allocation2 + $0x4] sm:$0x1] }
  0x52   : > { %6434 = vmatprep.mubr.msk.bf16.mxu0 %vm452_vm0, %v6575_v8  ;;  %723 = vst.msk [vmem:[#allocation2 + $0x98] sm:$0xf] %vm710_vm6, %v6748_v55  ;;  %725 = vst.msk [vmem:[#allocation2 + $0xe8] sm:$0xf] %vm710_vm6, %v6748_v55  ;;  %v765_v61 = vld [vmem:[#allocation2 + $0x58] sm:$0x1] }
  0x53   : > { %726 = vst.msk [vmem:[#allocation2 + $0xec] sm:$0x1] %vm712_vm1, %v6748_v55  ;;  %728 = vst.msk [vmem:[#allocation2 + $0x13c] sm:$0x1] %vm712_vm1, %v6748_v55  ;;  %v887_v62 = vld [vmem:[#allocation2 + $0x5c] sm:$0x1] }
  0x54   : > { %727 = vst.msk [vmem:[#allocation2 + $0x138] sm:$0xf] %vm710_vm6, %v6748_v55  ;;  %773 = vst [vmem:[#allocation2 + $0x68] sm:$0x1] %v772_v58  ;;  %v774_v63 = vld [vmem:[#allocation2 + $0x70] sm:$0x1] }
  0x55   : > { %895 = vst [vmem:[#allocation2 + $0x6c] sm:$0x1] %v894_v59  ;;  %v766_v0 = vsel %vm6959_vm4, 0, %v765_v61  ;;  %v888_v1 = vsel %vm6967_vm5, 0, %v887_v62  ;;  %v775_v2 = vsel %vm6959_vm4, 0, %v774_v63  ;;  %v855_v5 = vsel %vm6967_vm5, 0, %v854_v60 }
  0x56   : > { %v896_v3 = vld [vmem:[#allocation2 + $0x74] sm:$0x1]  ;;  %767 = vst [vmem:[#allocation2 + $0x58] sm:$0x1] %v766_v0  ;;  %889 = vst [vmem:[#allocation2 + $0x5c] sm:$0x1] %v888_v1 }
  0x57   : > { %776 = vst [vmem:[#allocation2 + $0x70] sm:$0x1] %v775_v2  ;;  %v897_v4 = vsel %vm6967_vm5, 0, %v896_v3  ;;  %856 = vst [vmem:[#allocation2 + $0x4] sm:$0x1] %v855_v5  ;;  %vm2874_vm1 = vcmask 523648  }
  0x58   : > { %898 = vst [vmem:[#allocation2 + $0x74] sm:$0x1] %v897_v4  ;;  %v768_v6 = vld [vmem:[#allocation2 + $0x60] sm:$0x1]  ;;  %v890_v7 = vld [vmem:[#allocation2 + $0x64] sm:$0x1] }
  0x59   : > { %6435 = vmatmul.mubr.msk.bf16.gmra.mrb[8].mxu0 %vm452_vm0, %v6576_v9  ;;  %v769_v8 = vsel %vm6959_vm4, 0, %v768_v6  ;;  %v891_v9 = vsel %vm6967_vm5, 0, %v890_v7  ;;  %v759_v21 = vld [vmem:[#allocation2 + $0x48] sm:$0x1]  ;;  %v881_v23 = vld [vmem:[#allocation2 + $0x4c] sm:$0x1] }
  0x5a   : > { %6438 = vmatprep.mubr.msk.bf16.mxu0 %vm452_vm0, %v6577_v10  ;;  %770 = vst [vmem:[#allocation2 + $0x60] sm:$0x1] %v769_v8  ;;  %892 = vst [vmem:[#allocation2 + $0x64] sm:$0x1] %v891_v9  ;;  %v777_v10 = vld [vmem:[#allocation2 + $0x78] sm:$0x1] }
  0x5b   : > { %v760_v22 = vsel %vm6959_vm4, 0, %v759_v21  ;;  %v882_v25 = vsel %vm6967_vm5, 0, %v881_v23  ;;  %v786_v26 = vld [vmem:[#allocation2 + $0x90] sm:$0x1]  ;;  %v908_v27 = vld [vmem:[#allocation2 + $0x94] sm:$0x1] }
  0x5c   : > { %761 = vst [vmem:[#allocation2 + $0x48] sm:$0x1] %v760_v22  ;;  %883 = vst [vmem:[#allocation2 + $0x4c] sm:$0x1] %v882_v25  ;;  %v787_v28 = vsel %vm6959_vm4, 0, %v786_v26  ;;  %v909_v29 = vsel %vm6967_vm5, 0, %v908_v27 }
  0x5d   : > { %788 = vst [vmem:[#allocation2 + $0x90] sm:$0x1] %v787_v28  ;;  %910 = vst [vmem:[#allocation2 + $0x94] sm:$0x1] %v909_v29  ;;  %v780_v30 = vld [vmem:[#allocation2 + $0x80] sm:$0x1] }
  0x5e   : > { %v902_v31 = vld [vmem:[#allocation2 + $0x84] sm:$0x1]  ;;  %v781_v32 = vsel %vm6959_vm4, 0, %v780_v30  ;;  %v884_v34 = vld [vmem:[#allocation2 + $0x54] sm:$0x1]  ;;  %vm4046_vm6 = vcmask 917248  }
  0x5f   : > { %v903_v33 = vsel %vm6967_vm5, 0, %v902_v31  ;;  %782 = vst [vmem:[#allocation2 + $0x80] sm:$0x1] %v781_v32  ;;  %v885_v35 = vsel %vm6967_vm5, 0, %v884_v34  ;;  %v801_v39 = vld [vmem:[#allocation2 + $0xb8] sm:$0x1] }
  0x60   : > { %904 = vst [vmem:[#allocation2 + $0x84] sm:$0x1] %v903_v33  ;;  %886 = vst [vmem:[#allocation2 + $0x54] sm:$0x1] %v885_v35  ;;  %v923_v40 = vld [vmem:[#allocation2 + $0xbc] sm:$0x1] }
  0x61   : > { %6439 = vmatmul.mubr.msk.bf16.gmra.mrb[12].mxu0 %vm452_vm0, %v6578_v11  ;;  %v783_v11 = vld [vmem:[#allocation2 + $0x88] sm:$0x1]  ;;  %v802_v41 = vsel %vm6959_vm4, 0, %v801_v39  ;;  %v924_v42 = vsel %vm6967_vm5, 0, %v923_v40  ;;  %v917_v48 = vld [vmem:[#allocation2 + $0xac] sm:$0x1] }
  0x62   : > { %6442 = vmatprep.mubr.msk.bf16.mxu0 %vm452_vm0, %v6579_v12  ;;  %v905_v12 = vld [vmem:[#allocation2 + $0x8c] sm:$0x1]  ;;  %803 = vst [vmem:[#allocation2 + $0xb8] sm:$0x1] %v802_v41  ;;  %925 = vst [vmem:[#allocation2 + $0xbc] sm:$0x1] %v924_v42 }
  0x63   : > { %v4077_v37 = vld [vmem:[#allocation2 + $0x48] sm:$0xf]  ;;  %v918_v50 = vsel %vm6967_vm5, 0, %v917_v48  ;;  %v1715_v51 = vld [vmem:[#allocation2 + $0x4] sm:$0x1]  ;;  %p8724_p11 = scmp.ne.s32.totalorder %s8711_s13, 0 }
  0x64   : > { %v4226_v45 = vshrl.u32 %v4077_v37, 16  ;;  %v4229_v46 = vshll.u32 %v4077_v37, 16  ;;  %v795_v47 = vld [vmem:[#allocation2 + $0xa8] sm:$0x1]  ;;  %919 = vst [vmem:[#allocation2 + $0xac] sm:$0x1] %v918_v50 }
  0x65   : > { %v796_v49 = vsel %vm6959_vm4, 0, %v795_v47  ;;  %v4078_v57 = vld [vmem:[#allocation2 + $0x4c] sm:$0x1]  ;;  %v7091_v58 = vld [vmem:[#allocation2] sm:$0xe]  ;;  %v1791_v59 = vshll.u32 %v1715_v51, 16 }
  0x66   : > { %797 = vst [vmem:[#allocation2 + $0xa8] sm:$0x1] %v796_v49  ;;  %v4228_v54 = vrot.slane %v4226_v45, 4  ;;  %v4231_v56 = vrot.slane %v4229_v46, 5  ;;  %v804_v60 = vld [vmem:[#allocation2 + $0xc0] sm:$0x1] }
  0x67   : > { %v2343_v61 = vld [vmem:[#allocation2 + $0x4] sm:$0x1]  ;;  %v805_v0 = vsel %vm6959_vm4, 0, %v804_v60  ;;  %v7098_v2 = vld [vmem:[%s8702_s2] ss:$0 sm:$0xff]  ;;  %v4235_v3 = vshll.u32 %v4078_v57, 16 }
  0x68   : > { %v4232_v63 = vor.u32 %v4231_v56, %v4228_v54  ;;  %v926_v1 = vld [vmem:[#allocation2 + $0xc4] sm:$0x1]  ;;  %806 = vst [vmem:[#allocation2 + $0xc0] sm:$0x1] %v805_v0  ;;  %v6008_v5 = vrot.slane %v7091_v58, 9  ;;  %v2475_v6 = vrot.slane %v2343_v61, 5 }
  0x69   : > { %6443 = vmatmul.mubr.msk.bf16.gmra.mrb[16].mxu0 %vm452_vm0, %v6580_v13  ;;  %v784_v13 = vsel %vm6959_vm4, 0, %v783_v11  ;;  %v927_v4 = vsel %vm6967_vm5, 0, %v926_v1  ;;  %vm1778_vm10 = vsmask.f32 3328  ;;  %vm1779_vm11 = vsmask.f32 7440 }
  0x6a   : > { %6446 = vmatprep.mubr.msk.bf16.mxu0 %vm452_vm0, %v6581_v14  ;;  %v906_v14 = vsel %vm6967_vm5, 0, %v905_v12  ;;  %785 = vst [vmem:[#allocation2 + $0x88] sm:$0x1] %v784_v13  ;;  %928 = vst [vmem:[#allocation2 + $0xc4] sm:$0x1] %v927_v4  ;;  %v7103_v7 = vrot.slane %v1791_v59, 5  ;;  %v7141_v46 = vsel %vm7121_vm12, %v6008_v5, %v2475_v6 }
  0x6b   : > { %907 = vst [vmem:[#allocation2 + $0x8c] sm:$0x1] %v906_v14  ;;  %v2358_v8 = vld [vmem:[#allocation2 + $0x50] sm:$0xe]  ;;  %v2359_v9 = vld [vmem:[#allocation2 + $0x54] sm:$0x1]  ;;  %vm7130_vm13 = vmor %vm1778_vm10, %vm1779_vm11 }
  0x6c   : > { %v7107_v11 = vrot.slane %v4232_v63, 4  ;;  %v798_v12 = vld [vmem:[#allocation2 + $0xb0] sm:$0x1]  ;;  %v920_v13 = vld [vmem:[#allocation2 + $0xb4] sm:$0x1]  ;;  %v6016_v22 = vrot.slane %v2358_v8, 9 }
  0x6d   : > { %v2507_v23 = vrot.slane %v2359_v9, 5  ;;  %v935_v26 = vld [vmem:[#allocation2 + $0xdc] sm:$0x1]  ;;  %v807_v31 = vld [vmem:[#allocation2 + $0xc8] sm:$0x1] }
  0x6e   : > { %v936_v30 = vsel %vm6967_vm5, 0, %v935_v26  ;;  %v929_v32 = vld [vmem:[#allocation2 + $0xcc] sm:$0x1]  ;;  %v808_v37 = vsel %vm6959_vm4, 0, %v807_v31  ;;  %v1392_v54 = vld [vmem:[#allocation2 + $0x1c] sm:$0x1] }
  0x6f   : > { %937 = vst [vmem:[#allocation2 + $0xdc] sm:$0x1] %v936_v30  ;;  %v930_v39 = vsel %vm6967_vm5, 0, %v929_v32  ;;  %809 = vst [vmem:[#allocation2 + $0xc8] sm:$0x1] %v808_v37  ;;  %v7153_v51 = vsel %vm7121_vm12, %v6016_v22, %v2507_v23 }
  0x70   : > { %931 = vst [vmem:[#allocation2 + $0xcc] sm:$0x1] %v930_v39  ;;  %v1377_v61 = vld [vmem:[#allocation2 + $0x8] sm:$0xf]  ;;  %v1380_v4 = vld [vmem:[#allocation2 + $0xc] sm:$0x1] }
  0x71   : > { %6447 = vmatmul.mubr.msk.bf16.gmra.mrb[20].mxu0 %vm452_vm0, %v6582_v15  ;;  %v778_v15 = vsel %vm6959_vm4, 0, %v777_v10  ;;  %v1398_v22 = vld [vmem:[#allocation2 + $0x24] sm:$0x1]  ;;  %v1383_v31 = vld [vmem:[#allocation2 + $0x10] sm:$0xf] }
  0x72   : > { %6450 = vmatprep.mubr.msk.bf16.mxu0 %vm452_vm0, %v6583_v16  ;;  %v899_v16 = vld [vmem:[#allocation2 + $0x7c] sm:$0x1]  ;;  %779 = vst [vmem:[#allocation2 + $0x78] sm:$0x1] %v778_v15  ;;  %v7109_v15 = vrot.slane %v4235_v3, 5 }
  0x73   : > { %v1386_v32 = vld [vmem:[#allocation2 + $0x14] sm:$0x1] }
  0x74   : > { %v4238_v50 = vsel %vm7130_vm13, %v7107_v11, %v7109_v15 }
  0x79   : > { %6451 = vmatmul.mubr.msk.bf16.gmra.mrb[24].mxu0 %vm452_vm0, %v6584_v17  ;;  %v900_v17 = vsel %vm6967_vm5, 0, %v899_v16  ;;  %v799_v16 = vsel %vm6959_vm4, 0, %v798_v12 }
  0x7a   : > { %6454 = vmatprep.mubr.msk.bf16.mxu0 %vm452_vm0, %v6585_v18  ;;  %901 = vst [vmem:[#allocation2 + $0x7c] sm:$0x1] %v900_v17  ;;  %v732_v18 = vld [vmem:[#allocation2] sm:$0x1]  ;;  %v921_v17 = vsel %vm6967_vm5, 0, %v920_v13 }
  0x7b   : > { %800 = vst [vmem:[#allocation2 + $0xb0] sm:$0x1] %v799_v16  ;;  %922 = vst [vmem:[#allocation2 + $0xb4] sm:$0x1] %v921_v17  ;;  %v1395_v16 = vld [vmem:[#allocation2 + $0x20] sm:$0xf] }
  0x81   : > { %6455 = vmatmul.mubr.msk.bf16.gmra.mrb[28].mxu0 %vm452_vm0, %v6586_v19  ;;  %v733_v19 = vsel %vm6959_vm4, 0, %v732_v18  ;;  %v813_v18 = vld [vmem:[#allocation2 + $0xd8] sm:$0x1]  ;;  %vm2697_vm0 = vcmask 392448  }
  0x82   : > { %734 = vst [vmem:[#allocation2] sm:$0x1] %v733_v19  ;;  %v814_v25 = vsel %vm6959_vm4, 0, %v813_v18 }
  0x83   : > { %815 = vst [vmem:[#allocation2 + $0xd8] sm:$0x1] %v814_v25 }
  0x89   : > { %v1714_v36 = vld [vmem:[#allocation2] sm:$0xf] }
  0x8a   : > { %v1782_v43 = vshrl.u32 %v1714_v36, 16  ;;  %v1785_v44 = vshll.u32 %v1714_v36, 16 }
  0x8c   : > { %v1784_v52 = vrot.slane %v1782_v43, 4  ;;  %v1787_v53 = vrot.slane %v1785_v44, 5 }
  0x8e   : > { %v1788_v62 = vor.u32 %v1787_v53, %v1784_v52  ;;  %v1389_v53 = vld [vmem:[#allocation2 + $0x18] sm:$0xf] }
  0x90   : > { %v7105_v10 = vrot.slane %v1788_v62, 4 }
  0x92   : > { %v1794_v47 = vsel %vm7130_vm13, %v7105_v10, %v7103_v7  ;;  %v1467_v10 = vld [vmem:[#allocation2 + $0x90] sm:$0xf] }
 0x11c   : > { %v6428_v14 = vpop.f32.mrb[0].mxu0 }
 0x11d   : > { %v544_v19 = vadd.f32 %v6428_v14, %v7098_v2  ;;  %v535_v21 = vpop.f32.mrb[1].mxu0 }
 0x11e   : > { %v536_v27 = vadd.f32 %v7098_v2, %v535_v21  ;;  %v6429_v28 = vpop.f32.mrb[2].mxu0 }
 0x11f   : > { %v664_v33 = vmax.f32 %v544_v19, 0.0  ;;  %v547_v34 = vadd.f32 %v6429_v28, %v7098_v2  ;;  %v538_v35 = vpop.f32.mrb[3].mxu0 }
 0x120   : > { %v662_v40 = vmax.f32 %v536_v27, 0.0  ;;  %v539_v41 = vadd.f32 %v7098_v2, %v538_v35 }
 0x121   : > { %v6270_v42 = vpack.c.bf16 %v664_v33, %v664_v33  ;;  %v665_v43 = vmax.f32 %v547_v34, 0.0 }
 0x122   : > { %v6268_v44 = vpack.c.bf16 %v662_v40, %v662_v40  ;;  %v663_v45 = vmax.f32 %v539_v41, 0.0 }
 0x123   : > { %v1071_v48 = vshrl.u32 %v6270_v42, 16  ;;  %v6271_v49 = vpack.c.bf16 %v665_v43, %v665_v43  ;;  %v1074_v52 = vshll.u32 %v6270_v42, 16 }
 0x124   : > { %v1055_v56 = vshrl.u32 %v6268_v44, 16  ;;  %v1058_v57 = vshll.u32 %v6268_v44, 16  ;;  %v6269_v58 = vpack.c.bf16 %v663_v45, %v663_v45  ;;  %v6432_v59 = vpop.f32.mrb[4].mxu0 }
 0x125   : > { %v1073_v60 = vrot.slane %v1071_v48, 7  ;;  %v1079_v62 = vshrl.u32 %v6271_v49, 16  ;;  %v1082_v63 = vshll.u32 %v6271_v49, 16  ;;  %v560_v0 = vadd.f32 %v6432_v59, %v7098_v2  ;;  %v551_v1 = vpop.f32.mrb[5].mxu0  ;;  %v1413_v59 = vld [vmem:[#allocation2 + $0x38] sm:$0xf] }
 0x126   : > { %v1057_v3 = vrot.slane %v1055_v56, 7  ;;  %v1063_v5 = vshrl.u32 %v6269_v58, 16  ;;  %v1066_v6 = vshll.u32 %v6269_v58, 16  ;;  %v552_v8 = vadd.f32 %v7098_v2, %v551_v1  ;;  %v6433_v9 = vpop.f32.mrb[6].mxu0 }
 0x127   : > { %v1076_v12 = vor.u32 %v1074_v52, %v1073_v60  ;;  %v1077_v13 = vrot.slane %v1073_v60, 4  ;;  %v1081_v14 = vrot.slane %v1079_v62, 7  ;;  %v668_v17 = vmax.f32 %v560_v0, 0.0  ;;  %v554_v18 = vpop.f32.mrb[7].mxu0  ;;  %v762_v52 = vld [vmem:[#allocation2 + $0x50] sm:$0x1] }
 0x128   : > { %v1060_v19 = vor.u32 %v1058_v57, %v1057_v3  ;;  %v1061_v21 = vrot.slane %v1057_v3, 4  ;;  %v1065_v23 = vrot.slane %v1063_v5, 7  ;;  %v666_v25 = vmax.f32 %v552_v8, 0.0  ;;  %v1401_v60 = vld [vmem:[#allocation2 + $0x28] sm:$0xf] }
 0x129   : > { %v1390_v26 = vsel %vm6987_vm7, %v1076_v12, %v1389_v53  ;;  %v1393_v27 = vsel %vm6959_vm4, %v1077_v13, %v1392_v54  ;;  %v1084_v28 = vor.u32 %v1082_v63, %v1081_v14  ;;  %v1085_v30 = vrot.slane %v1081_v14, 4  ;;  %v1404_v12 = vld [vmem:[#allocation2 + $0x2c] sm:$0x1] }
 0x12a   : > { %1391 = vst [vmem:[#allocation2 + $0x18] sm:$0xf] %v1390_v26  ;;  %1394 = vst [vmem:[#allocation2 + $0x1c] sm:$0x1] %v1393_v27  ;;  %v1378_v33 = vsel %vm6987_vm7, %v1060_v19, %v1377_v61  ;;  %v1381_v34 = vsel %vm6959_vm4, %v1061_v21, %v1380_v4  ;;  %v1068_v35 = vor.u32 %v1066_v6, %v1065_v23  ;;  %v1069_v37 = vrot.slane %v1065_v23, 4 }
 0x12b   : > { %1379 = vst [vmem:[#allocation2 + $0x8] sm:$0xf] %v1378_v33  ;;  %1382 = vst [vmem:[#allocation2 + $0xc] sm:$0x1] %v1381_v34  ;;  %v1396_v39 = vsel %vm6987_vm7, %v1084_v28, %v1395_v16  ;;  %v1399_v40 = vsel %vm6959_vm4, %v1085_v30, %v1398_v22  ;;  %v6274_v41 = vpack.c.bf16 %v668_v17, %v668_v17  ;;  %v1416_v4 = vld [vmem:[#allocation2 + $0x3c] sm:$0x1] }
 0x12c   : > { %v6272_v42 = vpack.c.bf16 %v666_v25, %v666_v25  ;;  %1397 = vst [vmem:[#allocation2 + $0x20] sm:$0xf] %v1396_v39  ;;  %1400 = vst [vmem:[#allocation2 + $0x24] sm:$0x1] %v1399_v40  ;;  %v1384_v43 = vsel %vm6987_vm7, %v1068_v35, %v1383_v31  ;;  %v1387_v44 = vsel %vm6959_vm4, %v1069_v37, %v1386_v32  ;;  %v6436_v49 = vpop.f32.mrb[8].mxu0 }
 0x12d   : > { %v563_v45 = vadd.f32 %v6433_v9, %v7098_v2  ;;  %v555_v48 = vadd.f32 %v7098_v2, %v554_v18  ;;  %1385 = vst [vmem:[#allocation2 + $0x10] sm:$0xf] %v1384_v43  ;;  %1388 = vst [vmem:[#allocation2 + $0x14] sm:$0x1] %v1387_v44  ;;  %v1103_v53 = vshrl.u32 %v6274_v41, 16  ;;  %v1106_v54 = vshll.u32 %v6274_v41, 16 }
 0x12e   : > { %v1087_v56 = vshrl.u32 %v6272_v42, 16  ;;  %v1090_v57 = vshll.u32 %v6272_v42, 16  ;;  %v567_v58 = vpop.f32.mrb[9].mxu0  ;;  %v576_v63 = vadd.f32 %v6436_v49, %v7098_v2  ;;  %v763_v9 = vsel %vm6959_vm4, 0, %v762_v52  ;;  %v1419_v35 = vld [vmem:[#allocation2 + $0x40] sm:$0xf] }
 0x12f   : > { %v669_v61 = vmax.f32 %v563_v45, 0.0  ;;  %v667_v62 = vmax.f32 %v555_v48, 0.0  ;;  %v568_v0 = vadd.f32 %v7098_v2, %v567_v58  ;;  %v6437_v1 = vpop.f32.mrb[10].mxu0  ;;  %v1105_v3 = vrot.slane %v1103_v53, 7  ;;  %764 = vst [vmem:[#allocation2 + $0x50] sm:$0x1] %v763_v9 }
 0x130   : > { %v1089_v5 = vrot.slane %v1087_v56, 7  ;;  %v7178_v6 = vadd.f32 %v6437_v1, %v7098_v2  ;;  %v7180_v8 = vpop.f32.mrb[11].mxu0  ;;  %v672_v16 = vmax.f32 %v576_v63, 0.0  ;;  %v1422_v37 = vld [vmem:[#allocation2 + $0x44] sm:$0x1] }
 0x131   : > { %v6275_v13 = vpack.c.bf16 %v669_v61, %v669_v61  ;;  %v6273_v14 = vpack.c.bf16 %v667_v62, %v667_v62  ;;  %v670_v17 = vmax.f32 %v568_v0, 0.0  ;;  %v1108_v18 = vor.u32 %v1106_v54, %v1105_v3  ;;  %v3520_v23 = vld [vmem:[#allocation2 + $0x18] sm:$0xe]  ;;  %v3521_v30 = vld [vmem:[#allocation2 + $0x1c] sm:$0x1] }
 0x132   : > { %v1109_v19 = vrot.slane %v1105_v3, 4  ;;  %v1092_v21 = vor.u32 %v1090_v57, %v1089_v5  ;;  %v1093_v22 = vrot.slane %v1089_v5, 4  ;;  %v1407_v39 = vld [vmem:[#allocation2 + $0x30] sm:$0xf]  ;;  %v1410_v44 = vld [vmem:[#allocation2 + $0x34] sm:$0x1]  ;;  %v6278_v45 = vpack.c.bf16 %v672_v16, %v672_v16 }
 0x133   : > { %v1111_v25 = vshrl.u32 %v6275_v13, 16  ;;  %v1114_v26 = vshll.u32 %v6275_v13, 16  ;;  %v1095_v27 = vshrl.u32 %v6273_v14, 16  ;;  %v1098_v28 = vshll.u32 %v6273_v14, 16  ;;  %v6587_v40 = vld [vmem:[#allocation2 + $0x18] ss:$8 sps:$4 sm:$0xff]  }
 0x134   : > { %v1414_v31 = vsel %vm6987_vm7, %v1108_v18, %v1413_v59  ;;  %v1417_v32 = vsel %vm6959_vm4, %v1109_v19, %v1416_v4  ;;  %v1402_v33 = vsel %vm6987_vm7, %v1092_v21, %v1401_v60  ;;  %v1405_v34 = vsel %vm6959_vm4, %v1093_v22, %v1404_v12  ;;  %v3522_v41 = vld [vmem:[#allocation2 + $0x20] sm:$0xe]  ;;  %v6440_v49 = vpop.f32.mrb[12].mxu0  ;;  %2828 = vrot.lane.b32.xlu1 %v6587_v40, %s6749_s18  ;;  %v3523_v53 = vld [vmem:[#allocation2 + $0x24] sm:$0x1] }
 0x135   : > { %1415 = vst [vmem:[#allocation2 + $0x38] sm:$0xf] %v1414_v31  ;;  %1418 = vst [vmem:[#allocation2 + $0x3c] sm:$0x1] %v1417_v32  ;;  %v1113_v42 = vrot.slane %v1111_v25, 7  ;;  %v1097_v43 = vrot.slane %v1095_v27, 7  ;;  %v6276_v48 = vpack.c.bf16 %v670_v17, %v670_v17  ;;  %v571_v25 = vadd.f32 %v7098_v2, %v7180_v8 }
 0x136   : > { %1403 = vst [vmem:[#allocation2 + $0x28] sm:$0xf] %v1402_v33  ;;  %1406 = vst [vmem:[#allocation2 + $0x2c] sm:$0x1] %v1405_v34  ;;  %v673_v52 = vmax.f32 %v7178_v6, 0.0  ;;  %v6090_v54 = vrot.slane %v3520_v23, 9 }
 0x137   : > { %v3654_v56 = vrot.slane %v3521_v30, 5  ;;  %v6091_v57 = vrot.slane %v3522_v41, 9  ;;  %v1116_v58 = vor.u32 %v1114_v26, %v1113_v42  ;;  %v1117_v59 = vrot.slane %v1113_v42, 4  ;;  %v6588_v62 = vld [vmem:[#allocation2 + $0x8] ss:$8 sps:$4 sm:$0xff]   ;;  %v583_v4 = vpop.f32.mrb[13].mxu0 }
 0x138   : > { %v1100_v60 = vor.u32 %v1098_v28, %v1097_v43  ;;  %v1101_v61 = vrot.slane %v1097_v43, 4  ;;  %v1135_v63 = vshrl.u32 %v6278_v45, 16  ;;  %v1138_v0 = vshll.u32 %v6278_v45, 16  ;;  %v1437_v13 = vld [vmem:[#allocation2 + $0x68] sm:$0xf]  ;;  %2826 = vrot.lane.b32.xlu1 %v6588_v62, %s6749_s18  ;;  %v7209_v31 = vpop.f32.mrb[14].mxu0 }
 0x139   : > { %v1119_v1 = vshrl.u32 %v6276_v48, 16  ;;  %v1122_v3 = vshll.u32 %v6276_v48, 16  ;;  %v1420_v5 = vsel %vm6987_vm7, %v1116_v58, %v1419_v35  ;;  %v1423_v6 = vsel %vm6959_vm4, %v1117_v59, %v1422_v37  ;;  %v1440_v14 = vld [vmem:[#allocation2 + $0x6c] sm:$0x1]  ;;  %v1425_v16 = vld [vmem:[#allocation2 + $0x58] sm:$0xf] }
 0x13a   : > { %v1408_v9 = vsel %vm6987_vm7, %v1100_v60, %v1407_v39  ;;  %v1411_v12 = vsel %vm6959_vm4, %v1101_v61, %v1410_v44  ;;  %v1428_v17 = vld [vmem:[#allocation2 + $0x5c] sm:$0x1]  ;;  %1421 = vst [vmem:[#allocation2 + $0x40] sm:$0xf] %v1420_v5  ;;  %1424 = vst [vmem:[#allocation2 + $0x44] sm:$0x1] %v1423_v6  ;;  %v6279_v21 = vpack.c.bf16 %v673_v52, %v673_v52 }
 0x13b   : > { %1409 = vst [vmem:[#allocation2 + $0x30] sm:$0xf] %v1408_v9  ;;  %1412 = vst [vmem:[#allocation2 + $0x34] sm:$0x1] %v1411_v12  ;;  %v1137_v18 = vrot.slane %v1135_v63, 7  ;;  %v1121_v19 = vrot.slane %v1119_v1, 7  ;;  %v3655_v22 = vsel %vm7121_vm12, %v6090_v54, %v3654_v56  ;;  %v592_v26 = vadd.f32 %v6440_v49, %v7098_v2 }
 0x13c   : > { %v3658_v23 = vrot.slane %v3523_v53, 5  ;;  %v584_v27 = vadd.f32 %v7098_v2, %v583_v4  ;;  %v2346_v28 = vld [vmem:[#allocation2 + $0x10] sm:$0xe]  ;;  %v2347_v30 = vld [vmem:[#allocation2 + $0x14] sm:$0x1]  ;;  %v1143_v39 = vshrl.u32 %v6279_v21, 16 }
 0x13d   : > { %v1140_v32 = vor.u32 %v1138_v0, %v1137_v18  ;;  %v1141_v33 = vrot.slane %v1137_v18, 4  ;;  %v1124_v34 = vor.u32 %v1122_v3, %v1121_v19  ;;  %v1125_v35 = vrot.slane %v1121_v19, 4  ;;  %v6589_v37 = vld [vmem:[#allocation2 + $0x10] ss:$8 sps:$4 sm:$0xff]   ;;  %v7213_v43 = vpop.f32.mrb[15].mxu0 }
 0x13e   : > { %v1146_v40 = vshll.u32 %v6279_v21, 16  ;;  %v3659_v41 = vsel %vm7121_vm12, %v6091_v57, %v3658_v23  ;;  %v671_v42 = vmax.f32 %v571_v25, 0.0  ;;  %v2348_v8 = vld [vmem:[#allocation2 + $0x18] sm:$0xe]  ;;  %v1443_v52 = vld [vmem:[#allocation2 + $0x70] sm:$0xf]  ;;  %3998 = vrot.lane.b32.xlu1 %v6589_v37, %s6750_s20 }
 0x13f   : > { %v1438_v44 = vsel %vm6987_vm7, %v1140_v32, %v1437_v13  ;;  %v1441_v45 = vsel %vm6959_vm4, %v1141_v33, %v1440_v14  ;;  %v1426_v48 = vsel %vm6987_vm7, %v1124_v34, %v1425_v16  ;;  %v1429_v49 = vsel %vm6959_vm4, %v1125_v35, %v1428_v17  ;;  %v1446_v53 = vld [vmem:[#allocation2 + $0x74] sm:$0x1]  ;;  %v2349_v59 = vld [vmem:[#allocation2 + $0x1c] sm:$0x1]  ;;  %v4688_v0 = vld [vmem:[#allocation2 + $0x10] sm:$0xe] }
 0x140   : > { %1439 = vst [vmem:[#allocation2 + $0x68] sm:$0xf] %v1438_v44  ;;  %1442 = vst [vmem:[#allocation2 + $0x6c] sm:$0x1] %v1441_v45  ;;  %v1145_v54 = vrot.slane %v1143_v39, 7  ;;  %v6121_v56 = vcombine.low %v3655_v22, %v3659_v41  ;;  %v6277_v57 = vpack.c.bf16 %v671_v42, %v671_v42  ;;  %v676_v58 = vmax.f32 %v592_v26, 0.0 }
 0x141   : > { %1427 = vst [vmem:[#allocation2 + $0x58] sm:$0xf] %v1426_v48  ;;  %1430 = vst [vmem:[#allocation2 + $0x5c] sm:$0x1] %v1429_v49  ;;  %v674_v60 = vmax.f32 %v584_v27, 0.0  ;;  %v6010_v61 = vrot.slane %v2346_v28, 9 }
 0x142   : > { %v2483_v62 = vrot.slane %v2347_v30, 5  ;;  %v6011_v63 = vrot.slane %v2348_v8, 9  ;;  %v1148_v1 = vor.u32 %v1146_v40, %v1145_v54  ;;  %v1149_v3 = vrot.slane %v1145_v54, 4  ;;  %3822 = vrot.lane.b32.xlu0 %v6121_v56, %s6751_s22  ;;  %v7225_v6 = vpop.f32.mrb[16].mxu0  ;;  %v1431_v9 = vld [vmem:[#allocation2 + $0x60] sm:$0xf] }
 0x143   : > { %v1127_v4 = vshrl.u32 %v6277_v57, 16  ;;  %v1130_v5 = vshll.u32 %v6277_v57, 16  ;;  %v1434_v12 = vld [vmem:[#allocation2 + $0x64] sm:$0x1]  ;;  %v6282_v13 = vpack.c.bf16 %v676_v58, %v676_v58  ;;  %v6280_v14 = vpack.c.bf16 %v674_v60, %v674_v60  ;;  %v4689_v18 = vld [vmem:[#allocation2 + $0x14] sm:$0x1] }
 0x144   : > { %v2484_v16 = vsel %vm7121_vm12, %v6010_v61, %v2483_v62  ;;  %v2487_v17 = vrot.slane %v2349_v59, 5  ;;  %v7229_v19 = vpop.f32.mrb[17].mxu0  ;;  %v1444_v21 = vsel %vm6987_vm7, %v1148_v1, %v1443_v52  ;;  %v1447_v22 = vsel %vm6959_vm4, %v1149_v3, %v1446_v53  ;;  %v4690_v25 = vld [vmem:[#allocation2 + $0x18] sm:$0xe]  ;;  %v4691_v26 = vld [vmem:[#allocation2 + $0x1c] sm:$0x1] }
 0x145   : > { %v1129_v23 = vrot.slane %v1127_v4, 7  ;;  %v6168_v27 = vrot.slane %v4688_v0, 9  ;;  %1445 = vst [vmem:[#allocation2 + $0x70] sm:$0xf] %v1444_v21  ;;  %1448 = vst [vmem:[#allocation2 + $0x74] sm:$0x1] %v1447_v22 }
 0x146   : > { %v1167_v28 = vshrl.u32 %v6282_v13, 16  ;;  %v1170_v30 = vshll.u32 %v6282_v13, 16  ;;  %v1151_v32 = vshrl.u32 %v6280_v14, 16  ;;  %v1154_v33 = vshll.u32 %v6280_v14, 16  ;;  %v2344_v34 = vld [vmem:[#allocation2 + $0x8] sm:$0xe] }
 0x147   : > { %v1132_v35 = vor.u32 %v1130_v5, %v1129_v23  ;;  %v1133_v37 = vrot.slane %v1129_v23, 4  ;;  %v1461_v39 = vld [vmem:[#allocation2 + $0x88] sm:$0xf]  ;;  %v1464_v40 = vld [vmem:[#allocation2 + $0x8c] sm:$0x1]  ;;  %v2488_v8 = vsel %vm7121_vm12, %v6011_v63, %v2487_v17  ;;  %v4818_v44 = vrot.slane %v4689_v18, 5 }
 0x148   : > { %v1449_v41 = vld [vmem:[#allocation2 + $0x78] sm:$0xf]  ;;  %v1452_v42 = vld [vmem:[#allocation2 + $0x7c] sm:$0x1]  ;;  %v2345_v45 = vld [vmem:[#allocation2 + $0xc] sm:$0x1]  ;;  %v6041_v53 = vcombine.low %v2484_v16, %v2488_v8 }
 0x149   : > { %v3516_v48 = vld [vmem:[#allocation2 + $0x8] sm:$0xe]  ;;  %v1169_v49 = vrot.slane %v1167_v28, 7  ;;  %v1153_v52 = vrot.slane %v1151_v32, 7  ;;  %v6169_v54 = vrot.slane %v4690_v25, 9  ;;  %v7237_v58 = vpop.f32.mrb[18].mxu0  ;;  %v1432_v59 = vsel %vm6987_vm7, %v1132_v35, %v1431_v9 }
 0x14a   : > { %v3517_v56 = vld [vmem:[#allocation2 + $0xc] sm:$0x1]  ;;  %v3518_v57 = vld [vmem:[#allocation2 + $0x10] sm:$0xe]  ;;  %v1435_v60 = vsel %vm6959_vm4, %v1133_v37, %v1434_v12  ;;  %v4819_v61 = vsel %vm7121_vm12, %v6168_v27, %v4818_v44  ;;  %v4822_v62 = vrot.slane %v4691_v26, 5  ;;  %v7245_v1 = vpop.f32.mrb[19].mxu0  ;;  %2651 = vrot.lane.b32.xlu0 %v6041_v53, %s6752_s23 }
 0x14b   : > { %v3519_v63 = vld [vmem:[#allocation2 + $0x14] sm:$0x1]  ;;  %v4692_v0 = vld [vmem:[#allocation2 + $0x20] sm:$0xe]  ;;  %1433 = vst [vmem:[#allocation2 + $0x60] sm:$0xf] %v1432_v59  ;;  %v1172_v3 = vor.u32 %v1170_v30, %v1169_v49  ;;  %v1156_v5 = vor.u32 %v1154_v33, %v1153_v52 }
 0x14c   : > { %1436 = vst [vmem:[#allocation2 + $0x64] sm:$0x1] %v1435_v60  ;;  %v1173_v4 = vrot.slane %v1169_v49, 4  ;;  %v1157_v13 = vrot.slane %v1153_v52, 4  ;;  %v6590_v9 = vld [vmem:[#allocation2 + $0x38] ss:$8 sps:$4 sm:$0xff]   ;;  %v4823_v16 = vsel %vm7121_vm12, %v6169_v54, %v4822_v62 }
 0x14d   : > { %v4693_v14 = vld [vmem:[#allocation2 + $0x24] sm:$0x1]  ;;  %v4694_v12 = vld [vmem:[#allocation2 + $0x28] sm:$0xe]  ;;  %v6009_v17 = vrot.slane %v2344_v34, 9  ;;  %v2479_v18 = vrot.slane %v2345_v45, 5  ;;  %v1462_v25 = vsel %vm6987_vm7, %v1172_v3, %v1461_v39  ;;  %v1450_v27 = vsel %vm6987_vm7, %v1156_v5, %v1449_v41 }
 0x14e   : > { %v6088_v21 = vrot.slane %v3516_v48, 9  ;;  %v4695_v22 = vld [vmem:[#allocation2 + $0x2c] sm:$0x1]  ;;  %v7250_v23 = vpop.f32.mrb[20].mxu0  ;;  %v1465_v26 = vsel %vm6959_vm4, %v1173_v4, %v1464_v40  ;;  %v1453_v28 = vsel %vm6959_vm4, %v1157_v13, %v1452_v42  ;;  %v1718_v30 = vld [vmem:[#allocation2 + $0x10] sm:$0xf]  ;;  %v6200_v32 = vcombine.low %v4819_v61, %v4823_v16  ;;  %2832 = vrot.lane.b32.xlu0 %v6590_v9, %s6749_s18 }
 0x14f   : > { %1463 = vst [vmem:[#allocation2 + $0x88] sm:$0xf] %v1462_v25  ;;  %1466 = vst [vmem:[#allocation2 + $0x8c] sm:$0x1] %v1465_v26  ;;  %v2480_v33 = vsel %vm7121_vm12, %v6009_v17, %v2479_v18  ;;  %v3646_v34 = vrot.slane %v3517_v56, 5  ;;  %v6089_v35 = vrot.slane %v3518_v57, 9 }
 0x150   : > { %1451 = vst [vmem:[#allocation2 + $0x78] sm:$0xf] %v1450_v27  ;;  %1454 = vst [vmem:[#allocation2 + $0x7c] sm:$0x1] %v1453_v28  ;;  %v1719_v37 = vld [vmem:[#allocation2 + $0x14] sm:$0x1]  ;;  %v6040_v40 = vcombine.low %v7141_v46, %v2480_v33 }
 0x151   : > { %v1720_v39 = vld [vmem:[#allocation2 + $0x18] sm:$0xf]  ;;  %v3650_v8 = vrot.slane %v3519_v63, 5  ;;  %v6170_v42 = vrot.slane %v4692_v0, 9  ;;  %v4826_v44 = vrot.slane %v4693_v14, 5  ;;  %v7264_v49 = vpop.f32.mrb[21].mxu0  ;;  %v3647_v52 = vsel %vm7121_vm12, %v6088_v21, %v3646_v34 }
 0x152   : > { %v6591_v41 = vld [vmem:[#allocation2 + $0x30] ss:$8 sps:$4 sm:$0xff]   ;;  %v1721_v45 = vld [vmem:[#allocation2 + $0x1c] sm:$0x1]  ;;  %v2350_v48 = vld [vmem:[#allocation2 + $0x20] sm:$0xe]  ;;  %2649 = vrot.lane.b32.xlu1 %v6040_v40, %s6752_s23 }
 0x153   : > { %5008 = vst.msk [vmem:[#allocation3 + $0x8] sm:$0xff] %vm1697_vm14, %v6200_v32  ;;  %v6171_v53 = vrot.slane %v4694_v12, 9  ;;  %v4830_v54 = vrot.slane %v4695_v22, 5  ;;  %v1810_v56 = vshrl.u32 %v1718_v30, 16  ;;  %v2351_v57 = vld [vmem:[#allocation2 + $0x24] sm:$0x1]  ;;  %v3651_v46 = vsel %vm7121_vm12, %v6089_v35, %v3650_v8  ;;  %4002 = vrot.lane.b32.xlu0 %v6591_v41, %s6750_s20 }
 0x154   : > { %v7269_v59 = vpop.f32.mrb[22].mxu0  ;;  %v4827_v60 = vsel %vm7121_vm12, %v6170_v42, %v4826_v44  ;;  %v1813_v61 = vshll.u32 %v1718_v30, 16  ;;  %v1819_v62 = vshll.u32 %v1719_v37, 16  ;;  %v2352_v63 = vld [vmem:[#allocation2 + $0x28] sm:$0xe]  ;;  %v6120_v0 = vcombine.low %v3647_v52, %v3651_v46 }
 0x155   : > { %v4831_v3 = vsel %vm7121_vm12, %v6171_v53, %v4830_v54  ;;  %v1812_v4 = vrot.slane %v1810_v56, 4  ;;  %v1824_v5 = vshrl.u32 %v1720_v39, 16  ;;  %v2353_v13 = vld [vmem:[#allocation2 + $0x2c] sm:$0x1]  ;;  %v3528_v9 = vld [vmem:[#allocation2 + $0x38] sm:$0xe] }
 0x156   : > { %v6201_v14 = vcombine.low %v4827_v60, %v4831_v3  ;;  %v1815_v12 = vrot.slane %v1813_v61, 5  ;;  %v1821_v16 = vrot.slane %v1819_v62, 5  ;;  %v1827_v17 = vshll.u32 %v1720_v39, 16  ;;  %v3529_v18 = vld [vmem:[#allocation2 + $0x3c] sm:$0x1]  ;;  %v7279_v21 = vpop.f32.mrb[23].mxu0  ;;  %3820 = vrot.lane.b32.xlu1 %v6120_v0, %s6751_s22 }
 0x157   : > { %v1826_v22 = vrot.slane %v1824_v5, 4  ;;  %v1833_v25 = vshll.u32 %v1721_v45, 16  ;;  %v6012_v26 = vrot.slane %v2350_v48, 9  ;;  %v2491_v27 = vrot.slane %v2351_v57, 5  ;;  %v3530_v28 = vld [vmem:[#allocation2 + $0x40] sm:$0xe] }
 0x158   : > { %5009 = vst.msk [vmem:[#allocation3 + $0x18] sm:$0xff] %vm1697_vm14, %v6201_v14  ;;  %v1816_v30 = vor.u32 %v1815_v12, %v1812_v4  ;;  %v1829_v32 = vrot.slane %v1827_v17, 5  ;;  %v6592_v33 = vld [vmem:[#allocation2 + $0x20] ss:$8 sps:$4 sm:$0xff]   ;;  %v6013_v34 = vrot.slane %v2352_v63, 9  ;;  %v2495_v35 = vrot.slane %v2353_v13, 5 }
 0x159   : > { %v3531_v37 = vld [vmem:[#allocation2 + $0x44] sm:$0x1]  ;;  %v1835_v40 = vrot.slane %v1833_v25, 5  ;;  %v7285_v39 = vsel %vm7121_vm12, %v6012_v26, %v2491_v27  ;;  %v6094_v41 = vrot.slane %v3528_v9, 9  ;;  %v3670_v8 = vrot.slane %v3529_v18, 5 }
 0x15a   : > { %v1716_v42 = vld [vmem:[#allocation2 + $0x8] sm:$0xf]  ;;  %v1817_v45 = vrot.slane %v1816_v30, 4  ;;  %v1830_v48 = vor.u32 %v1829_v32, %v1826_v22  ;;  %v2496_v52 = vsel %vm7121_vm12, %v6013_v34, %v2495_v35  ;;  %v6095_v53 = vrot.slane %v3530_v28, 9  ;;  %v1717_v54 = vld [vmem:[#allocation2 + $0xc] sm:$0x1]  ;;  %4000 = vrot.lane.b32.xlu1 %v6592_v33, %s6750_s20 }
 0x15b   : > { %v5025_v44 = vld [vmem:[#allocation3 + $0x8] sm:$0xff]  ;;  %v6042_v56 = vcombine.low %v7285_v39, %v2496_v52  ;;  %v7293_v57 = vsel %vm7121_vm12, %v6094_v41, %v3670_v8  ;;  %v3674_v46 = vrot.slane %v3531_v37, 5  ;;  %v1796_v60 = vshrl.u32 %v1716_v42, 16  ;;  %v4067_v61 = vld [vmem:[#allocation2 + $0x20] sm:$0xf] }
 0x15c   : > { %6226 = vmatprep.mubr.msk.bf16.mxu0 %vm1697_vm14, %v5025_v44  ;;  %v4068_v62 = vld [vmem:[#allocation2 + $0x24] sm:$0x1]  ;;  %v1822_v63 = vsel %vm7130_vm13, %v1817_v45, %v1821_v16  ;;  %v1831_v0 = vrot.slane %v1830_v48, 4  ;;  %v1799_v3 = vshll.u32 %v1716_v42, 16  ;;  %v1805_v4 = vshll.u32 %v1717_v54, 16 }
 0x15d   : > { %v4069_v5 = vld [vmem:[#allocation2 + $0x28] sm:$0xf]  ;;  %v7300_v13 = vsel %vm7121_vm12, %v6095_v53, %v3674_v46  ;;  %v1798_v9 = vrot.slane %v1796_v60, 4  ;;  %v4070_v14 = vld [vmem:[#allocation2 + $0x2c] sm:$0x1]  ;;  %v4156_v12 = vshrl.u32 %v4067_v61, 16  ;;  %v595_v45 = vadd.f32 %v7209_v31, %v7098_v2 }
 0x15e   : > { %v4159_v17 = vshll.u32 %v4067_v61, 16  ;;  %v1836_v18 = vsel %vm7130_vm13, %v1831_v0, %v1835_v40  ;;  %v6593_v22 = vld [vmem:[#allocation2 + $0x40] ss:$8 sps:$4 sm:$0xff]   ;;  %v6123_v16 = vcombine.low %v7293_v57, %v7300_v13  ;;  %v1801_v25 = vrot.slane %v1799_v3, 5  ;;  %v2895_v27 = vld [vmem:[#allocation2 + $0x18] sm:$0xf] }
 0x15f   : > { %v1807_v26 = vrot.slane %v1805_v4, 5  ;;  %v5027_v28 = vld [vmem:[#allocation3 + $0x18] sm:$0xff]  ;;  %v5993_v30 = vcombine.low %v1822_v63, %v1836_v18  ;;  %v4158_v32 = vrot.slane %v4156_v12, 4  ;;  %v4165_v34 = vshll.u32 %v4068_v62, 16  ;;  %4004 = vrot.lane.b32.xlu1 %v6593_v22, %s6750_s20  ;;  %v2897_v8 = vld [vmem:[#allocation2 + $0x20] sm:$0xf] }
 0x160   : > { %v4161_v33 = vrot.slane %v4159_v17, 5  ;;  %v2896_v35 = vld [vmem:[#allocation2 + $0x1c] sm:$0x1]  ;;  %6227 = vmatprep.mubr.msk.bf16.mxu1 %vm1697_vm14, %v5027_v28  ;;  %v1802_v37 = vor.u32 %v1801_v25, %v1798_v9  ;;  %v4170_v39 = vshrl.u32 %v4069_v5, 16  ;;  %v4173_v40 = vshll.u32 %v4069_v5, 16 }
 0x161   : > { %v4179_v41 = vshll.u32 %v4070_v14, 16  ;;  %2279 = vrot.lane.b32.xlu0 %v5993_v30, %s6753_s29  ;;  %v4167_v44 = vrot.slane %v4165_v34, 5  ;;  %v2984_v48 = vshrl.u32 %v2895_v27, 16  ;;  %v677_v60 = vmax.f32 %v595_v45, 0.0  ;;  %v2898_v3 = vld [vmem:[#allocation2 + $0x24] sm:$0x1] }
 0x162   : > { %v4162_v42 = vor.u32 %v4161_v33, %v4158_v32  ;;  %v1803_v52 = vrot.slane %v1802_v37, 4  ;;  %v4172_v53 = vrot.slane %v4170_v39, 4  ;;  %v4175_v54 = vrot.slane %v4173_v40, 5  ;;  %v4075_v12 = vld [vmem:[#allocation2 + $0x40] sm:$0xf] }
 0x163   : > { %v4181_v57 = vrot.slane %v4179_v41, 5  ;;  %v2986_v61 = vrot.slane %v2984_v48, 4  ;;  %v2987_v62 = vshll.u32 %v2895_v27, 16  ;;  %v2993_v4 = vshll.u32 %v2896_v35, 16  ;;  %v4076_v33 = vld [vmem:[#allocation2 + $0x44] sm:$0x1] }
 0x164   : > { %v4163_v46 = vrot.slane %v4162_v42, 4  ;;  %v1808_v63 = vsel %vm7130_vm13, %v1803_v52, %v1807_v26  ;;  %v4176_v0 = vor.u32 %v4175_v54, %v4172_v53  ;;  %v2998_v5 = vshrl.u32 %v2897_v8, 16  ;;  %v2891_v35 = vld [vmem:[#allocation2 + $0x8] sm:$0xf] }
 0x165   : > { %2653 = vrot.lane.b32.xlu0 %v6042_v56, %s6752_s23  ;;  %v5992_v31 = vcombine.low %v1794_v47, %v1808_v63  ;;  %v6283_v9 = vpack.c.bf16 %v677_v60, %v677_v60  ;;  %v2989_v14 = vrot.slane %v2987_v62, 5  ;;  %v2995_v18 = vrot.slane %v2993_v4, 5  ;;  %v1470_v47 = vld [vmem:[#allocation2 + $0x94] sm:$0x1]  ;;  %v2893_v63 = vld [vmem:[#allocation2 + $0x10] sm:$0xf] }
 0x166   : > { %v4168_v13 = vsel %vm7130_vm13, %v4163_v46, %v4167_v44  ;;  %v4177_v17 = vrot.slane %v4176_v0, 4  ;;  %v3000_v22 = vrot.slane %v2998_v5, 4  ;;  %v3001_v25 = vshll.u32 %v2897_v8, 16  ;;  %v2892_v46 = vld [vmem:[#allocation2 + $0xc] sm:$0x1] }
 0x167   : > { %2277 = vrot.lane.b32.xlu1 %v5992_v31, %s6753_s29  ;;  %v1175_v26 = vshrl.u32 %v6283_v9, 16  ;;  %v1178_v56 = vshll.u32 %v6283_v9, 16  ;;  %v2990_v27 = vor.u32 %v2989_v14, %v2986_v61  ;;  %v3007_v28 = vshll.u32 %v2898_v3, 16  ;;  %v4063_v9 = vld [vmem:[#allocation2 + $0x10] sm:$0xf] }
 0x168   : > { %v4182_v7 = vsel %vm7130_vm13, %v4177_v17, %v4181_v57  ;;  %v3003_v30 = vrot.slane %v3001_v25, 5  ;;  %v587_v32 = vadd.f32 %v7098_v2, %v7213_v43  ;;  %v4212_v34 = vshrl.u32 %v4075_v12, 16  ;;  %v6594_v17 = vld [vmem:[#allocation2 + $0x68] ss:$8 sps:$4 sm:$0xff]  }
 0x169   : > { %3826 = vrot.lane.b32.xlu0 %v6123_v16, %s6751_s22  ;;  %v6153_v37 = vcombine.low %v4168_v13, %v4182_v7  ;;  %v1177_v39 = vrot.slane %v1175_v26, 7  ;;  %v2991_v40 = vrot.slane %v2990_v27, 4  ;;  %v3009_v41 = vrot.slane %v3007_v28, 5  ;;  %v2894_v13 = vld [vmem:[#allocation2 + $0x14] sm:$0x1] }
 0x16a   : > { %v3004_v8 = vor.u32 %v3003_v30, %v3000_v22  ;;  %v675_v42 = vmax.f32 %v587_v32, 0.0  ;;  %v4214_v44 = vrot.slane %v4212_v34, 4  ;;  %v4215_v45 = vshll.u32 %v4075_v12, 16  ;;  %v1455_v12 = vld [vmem:[#allocation2 + $0x80] sm:$0xf] }
 0x16b   : > { %v1180_v48 = vor.u32 %v1178_v56, %v1177_v39  ;;  %v1181_v52 = vrot.slane %v1177_v39, 4  ;;  %v2996_v53 = vsel %vm7130_vm13, %v2991_v40, %v2995_v18  ;;  %v4221_v54 = vshll.u32 %v4076_v33, 16  ;;  %v1458_v56 = vld [vmem:[#allocation2 + $0x84] sm:$0x1]  ;;  %v4064_v33 = vld [vmem:[#allocation2 + $0x14] sm:$0x1] }
 0x16c   : > { %v3005_v2 = vrot.slane %v3004_v8, 4  ;;  %v6281_v43 = vpack.c.bf16 %v675_v42, %v675_v42  ;;  %v4217_v57 = vrot.slane %v4215_v45, 5  ;;  %v2956_v60 = vshrl.u32 %v2891_v35, 16  ;;  %v4066_v8 = vld [vmem:[#allocation2 + $0x1c] sm:$0x1] }
 0x16d   : > { %4625 = vrot.lane.b32.xlu0 %v6153_v37, %s6754_s19  ;;  %v1468_v16 = vsel %vm6987_vm7, %v1180_v48, %v1467_v10  ;;  %v1471_v61 = vsel %vm6959_vm4, %v1181_v52, %v1470_v47  ;;  %v4223_v62 = vrot.slane %v4221_v54, 5  ;;  %v2959_v0 = vshll.u32 %v2891_v35, 16  ;;  %v6595_v10 = vld [vmem:[#allocation2 + $0x28] ss:$8 sps:$4 sm:$0xff]  }
 0x16e   : > { %1469 = vst [vmem:[#allocation2 + $0x90] sm:$0xf] %v1468_v16  ;;  %1472 = vst [vmem:[#allocation2 + $0x94] sm:$0x1] %v1471_v61  ;;  %v3010_v3 = vsel %vm7130_vm13, %v3005_v2, %v3009_v41  ;;  %v1159_v4 = vshrl.u32 %v6281_v43, 16  ;;  %v1162_v5 = vshll.u32 %v6281_v43, 16  ;;  %v4218_v31 = vor.u32 %v4217_v57, %v4214_v44 }
 0x16f   : > { %v6073_v14 = vcombine.low %v2996_v53, %v3010_v3  ;;  %v2958_v18 = vrot.slane %v2956_v60, 4  ;;  %v2961_v22 = vrot.slane %v2959_v0, 5  ;;  %v2965_v25 = vshll.u32 %v2892_v46, 16  ;;  %v4065_v41 = vld [vmem:[#allocation2 + $0x18] sm:$0xf] }
 0x170   : > { %v1161_v26 = vrot.slane %v1159_v4, 7  ;;  %v4219_v27 = vrot.slane %v4218_v31, 4  ;;  %v2970_v28 = vshrl.u32 %v2893_v63, 16  ;;  %v2973_v7 = vshll.u32 %v2893_v63, 16  ;;  %v2899_v52 = vld [vmem:[#allocation2 + $0x28] sm:$0xf] }
 0x171   : > { %3453 = vrot.lane.b32.xlu1 %v6073_v14, %s6755_s21  ;;  %2836 = vrot.lane.b32.xlu0 %v6594_v17, %s6749_s18  ;;  %v2962_v47 = vor.u32 %v2961_v22, %v2958_v18  ;;  %v2967_v30 = vrot.slane %v2965_v25, 5  ;;  %v2979_v32 = vshll.u32 %v2894_v13, 16  ;;  %v4128_v34 = vshrl.u32 %v4063_v9, 16  ;;  %v2900_v60 = vld [vmem:[#allocation2 + $0x2c] sm:$0x1] }
 0x172   : > { %v1164_v35 = vor.u32 %v1162_v5, %v1161_v26  ;;  %v1165_v37 = vrot.slane %v1161_v26, 4  ;;  %v4224_v39 = vsel %vm7130_vm13, %v4219_v27, %v4223_v62  ;;  %v2972_v40 = vrot.slane %v2970_v28, 4  ;;  %v2901_v63 = vld [vmem:[#allocation2 + $0x30] sm:$0xf]  ;;  %v2902_v31 = vld [vmem:[#allocation2 + $0x34] sm:$0x1] }
 0x173   : > { %v6155_v42 = vcombine.low %v4224_v39, %v4238_v50  ;;  %v2963_v44 = vrot.slane %v2962_v47, 4  ;;  %v2975_v45 = vrot.slane %v2973_v7, 5  ;;  %v2981_v48 = vrot.slane %v2979_v32, 5  ;;  %v6596_v50 = vld [vmem:[#allocation2 + $0x60] ss:$8 sps:$4 sm:$0xff]  }
 0x174   : > { %v1456_v53 = vsel %vm6987_vm7, %v1164_v35, %v1455_v12  ;;  %v1459_v54 = vsel %vm6959_vm4, %v1165_v37, %v1458_v56  ;;  %v4130_v2 = vrot.slane %v4128_v34, 4  ;;  %v4131_v43 = vshll.u32 %v4063_v9, 16  ;;  %v3524_v18 = vld [vmem:[#allocation2 + $0x28] sm:$0xe]  ;;  %v3525_v27 = vld [vmem:[#allocation2 + $0x2c] sm:$0x1] }
 0x175   : > { %1457 = vst [vmem:[#allocation2 + $0x80] sm:$0xf] %v1456_v53  ;;  %1460 = vst [vmem:[#allocation2 + $0x84] sm:$0x1] %v1459_v54  ;;  %2830 = vrot.lane.b32.xlu1 %v6595_v10, %s6749_s18  ;;  %4629 = vrot.lane.b32.xlu0 %v6155_v42, %s6754_s19  ;;  %v2968_v11 = vsel %vm7130_vm13, %v2963_v44, %v2967_v30  ;;  %v2976_v15 = vor.u32 %v2975_v45, %v2972_v40  ;;  %v4137_v57 = vshll.u32 %v4064_v33, 16  ;;  %v6606_v40 = vld [vmem:[%s8703_s3] sm:$0xff]  }
 0x176   : > { %v4142_v46 = vshrl.u32 %v4065_v41, 16  ;;  %v4133_v16 = vrot.slane %v4131_v43, 5  ;;  %v4145_v61 = vshll.u32 %v4065_v41, 16  ;;  %v4151_v62 = vshll.u32 %v4066_v8, 16  ;;  %v3526_v30 = vld [vmem:[#allocation2 + $0x30] sm:$0xe]  ;;  %6501 = vmatpush1.bf16.msra.mxu1 %v6606_v40  ;;  %5184 = vmatpush1.bf16.msra.mxu0 %v6606_v40 }
 0x177   : > { %v3012_v0 = vshrl.u32 %v2899_v52, 16  ;;  %v2977_v3 = vrot.slane %v2976_v15, 4  ;;  %v4139_v4 = vrot.slane %v4137_v57, 5  ;;  %v3015_v13 = vshll.u32 %v2899_v52, 16  ;;  %v3527_v32 = vld [vmem:[#allocation2 + $0x34] sm:$0x1]  ;;  %6493 = vmatprep.subr.bf16.mxu1 %v6748_v55  ;;  %5185 = vmatprep.subr.bf16.mxu0 %v6748_v55 }
 0x178   : > { %v4144_v5 = vrot.slane %v4142_v46, 4  ;;  %v4134_v9 = vor.u32 %v4133_v16, %v4130_v2  ;;  %v4147_v14 = vrot.slane %v4145_v61, 5  ;;  %v4153_v12 = vrot.slane %v4151_v62, 5  ;;  %v1726_v39 = vld [vmem:[#allocation2 + $0x30] sm:$0xf] }
 0x179   : > { %v3014_v17 = vrot.slane %v3012_v0, 4  ;;  %v2982_v22 = vsel %vm7130_vm13, %v2977_v3, %v2981_v48  ;;  %4006 = vrot.lane.b32.xlu0 %v6596_v50, %s6750_s20  ;;  %v3017_v25 = vrot.slane %v3015_v13, 5  ;;  %v3021_v26 = vshll.u32 %v2900_v60, 16  ;;  %v1727_v45 = vld [vmem:[#allocation2 + $0x34] sm:$0x1]  ;;  %v7370_v3 = vpop.f32.mrb[24].mxu0 }
 0x17a   : > { %v3026_v56 = vshrl.u32 %v2901_v63, 16  ;;  %v6072_v28 = vcombine.low %v2968_v11, %v2982_v22  ;;  %v4135_v7 = vrot.slane %v4134_v9, 4  ;;  %v4148_v10 = vor.u32 %v4147_v14, %v4144_v5  ;;  %v1728_v2 = vld [vmem:[#allocation2 + $0x38] sm:$0xf]  ;;  %v1729_v50 = vld [vmem:[#allocation2 + $0x3c] sm:$0x1] }
 0x17b   : > { %v3029_v47 = vshll.u32 %v2901_v63, 16  ;;  %v3018_v33 = vor.u32 %v3017_v25, %v3014_v17  ;;  %v3023_v34 = vrot.slane %v3021_v26, 5  ;;  %v3035_v37 = vshll.u32 %v2902_v31, 16  ;;  %v2354_v46 = vld [vmem:[#allocation2 + $0x30] sm:$0xe]  ;;  %v7374_v14 = vpop.f32.mrb[25].mxu0 }
 0x17c   : > { %v3028_v35 = vrot.slane %v3026_v56, 4  ;;  %3451 = vrot.lane.b32.xlu1 %v6072_v28, %s6755_s21  ;;  %v4140_v41 = vsel %vm7130_vm13, %v4135_v7, %v4139_v4  ;;  %v4149_v8 = vrot.slane %v4148_v10, 4  ;;  %v6092_v44 = vrot.slane %v3524_v18, 9  ;;  %v2355_v63 = vld [vmem:[#allocation2 + $0x34] sm:$0x1]  ;;  %v7379_v10 = vpop.f32.mrb[26].mxu0 }
 0x17d   : > { %v3031_v42 = vrot.slane %v3029_v47, 5  ;;  %v3019_v48 = vrot.slane %v3018_v33, 4  ;;  %v3037_v52 = vrot.slane %v3035_v37, 5  ;;  %v3662_v53 = vrot.slane %v3525_v27, 5  ;;  %v2356_v0 = vld [vmem:[#allocation2 + $0x38] sm:$0xe] }
 0x17e   : > { %v6093_v54 = vrot.slane %v3526_v30, 9  ;;  %v4154_v43 = vsel %vm7130_vm13, %v4149_v8, %v4153_v12  ;;  %v3666_v15 = vrot.slane %v3527_v32, 5  ;;  %v1866_v57 = vshrl.u32 %v1726_v39, 16  ;;  %v2357_v9 = vld [vmem:[#allocation2 + $0x3c] sm:$0x1] }
 0x17f   : > { %v3032_v11 = vor.u32 %v3031_v42, %v3028_v35  ;;  %v6152_v60 = vcombine.low %v4140_v41, %v4154_v43  ;;  %v3024_v16 = vsel %vm7130_vm13, %v3019_v48, %v3023_v34  ;;  %v3663_v61 = vsel %vm7121_vm12, %v6092_v44, %v3662_v53  ;;  %v2360_v25 = vld [vmem:[#allocation2 + $0x58] sm:$0xe]  ;;  %v2361_v7 = vld [vmem:[#allocation2 + $0x5c] sm:$0x1]  ;;  %v1722_v34 = vld [vmem:[#allocation2 + $0x20] sm:$0xf] }
 0x180   : > { %v1869_v62 = vshll.u32 %v1726_v39, 16  ;;  %v3667_v5 = vsel %vm7121_vm12, %v6093_v54, %v3666_v15  ;;  %v1868_v31 = vrot.slane %v1866_v57, 4  ;;  %v1875_v13 = vshll.u32 %v1727_v45, 16  ;;  %v1723_v35 = vld [vmem:[#allocation2 + $0x24] sm:$0x1]  ;;  %v6608_v53 = vld [vmem:[%s8703_s3 + $0x8] sm:$0xff]  }
 0x181   : > { %v3033_v4 = vrot.slane %v3032_v11, 4  ;;  %4623 = vrot.lane.b32.xlu1 %v6152_v60, %s6754_s19  ;;  %v6122_v12 = vcombine.low %v3663_v61, %v3667_v5  ;;  %v1880_v18 = vshrl.u32 %v1728_v2, 16  ;;  %v1883_v22 = vshll.u32 %v1728_v2, 16  ;;  %v1724_v8 = vld [vmem:[#allocation2 + $0x28] sm:$0xf]  ;;  %6502 = vmatpush1.bf16.msra.mxu1 %v6608_v53 }
 0x182   : > { %v1871_v17 = vrot.slane %v1869_v62, 5  ;;  %v1877_v56 = vrot.slane %v1875_v13, 5  ;;  %v1889_v27 = vshll.u32 %v1729_v50, 16  ;;  %v6014_v28 = vrot.slane %v2354_v46, 9  ;;  %v1725_v42 = vld [vmem:[#allocation2 + $0x2c] sm:$0x1]  ;;  %5186 = vmatpush1.bf16.msra.mxu0 %v6608_v53  ;;  %6494 = vmatprep.subr.bf16.mxu1 %v6748_v55 }
 0x183   : > { %v3038_v26 = vsel %vm7130_vm13, %v3033_v4, %v3037_v52  ;;  %v1882_v32 = vrot.slane %v1880_v18, 4  ;;  %v1885_v33 = vrot.slane %v1883_v22, 5  ;;  %v2499_v39 = vrot.slane %v2355_v63, 5  ;;  %v3536_v15 = vld [vmem:[#allocation2 + $0x68] sm:$0xe]  ;;  %5187 = vmatprep.subr.bf16.mxu0 %v6748_v55 }
 0x184   : > { %v6074_v47 = vcombine.low %v3024_v16, %v3038_v26  ;;  %v1872_v30 = vor.u32 %v1871_v17, %v1868_v31  ;;  %v1891_v37 = vrot.slane %v1889_v27, 5  ;;  %v6015_v40 = vrot.slane %v2356_v0, 9  ;;  %v3537_v16 = vld [vmem:[#allocation2 + $0x6c] sm:$0x1]  ;;  %v3538_v61 = vld [vmem:[#allocation2 + $0x70] sm:$0xe] }
 0x185   : > { %v2503_v41 = vrot.slane %v2357_v9, 5  ;;  %3824 = vrot.lane.b32.xlu1 %v6122_v12, %s6751_s22  ;;  %v1886_v45 = vor.u32 %v1885_v33, %v1882_v32  ;;  %v6017_v48 = vrot.slane %v2360_v25, 9  ;;  %v2511_v52 = vrot.slane %v2361_v7, 5  ;;  %v3539_v25 = vld [vmem:[#allocation2 + $0x74] sm:$0x1] }
 0x186   : > { %3455 = vrot.lane.b32.xlu0 %v6074_v47, %s6755_s21  ;;  %v1873_v44 = vrot.slane %v1872_v30, 4  ;;  %v2500_v54 = vsel %vm7121_vm12, %v6014_v28, %v2499_v39  ;;  %v1838_v43 = vshrl.u32 %v1722_v34, 16  ;;  %v1841_v11 = vshll.u32 %v1722_v34, 16  ;;  %v2903_v26 = vld [vmem:[#allocation2 + $0x38] sm:$0xf] }
 0x187   : > { %v2504_v2 = vsel %vm7121_vm12, %v6015_v40, %v2503_v41  ;;  %v1887_v57 = vrot.slane %v1886_v45, 4  ;;  %v2512_v60 = vsel %vm7121_vm12, %v6017_v48, %v2511_v52  ;;  %v1847_v4 = vshll.u32 %v1723_v35, 16  ;;  %v7414_v45 = vpop.f32.mrb[27].mxu0 }
 0x188   : > { %v1878_v50 = vsel %vm7130_vm13, %v1873_v44, %v1877_v56  ;;  %v6043_v46 = vcombine.low %v2500_v54, %v2504_v2  ;;  %v6044_v62 = vcombine.low %v7153_v51, %v2512_v60  ;;  %v1840_v63 = vrot.slane %v1838_v43, 4  ;;  %v7403_v51 = vld [vmem:[%s8702_s2] ss:$0 sm:$0xff] }
 0x189   : > { %v1843_v0 = vrot.slane %v1841_v11, 5  ;;  %v1892_v5 = vsel %vm7130_vm13, %v1887_v57, %v1891_v37  ;;  %v1852_v31 = vshrl.u32 %v1724_v8, 16  ;;  %v1855_v13 = vshll.u32 %v1724_v8, 16  ;;  %v2904_v8 = vld [vmem:[#allocation2 + $0x3c] sm:$0x1] }
 0x18a   : > { %2655 = vrot.lane.b32.xlu1 %v6043_v46, %s6752_s23  ;;  %v1861_v9 = vshll.u32 %v1725_v42, 16  ;;  %v5995_v12 = vcombine.low %v1878_v50, %v1892_v5  ;;  %v1849_v18 = vrot.slane %v1847_v4, 5  ;;  %v608_v22 = vadd.f32 %v7403_v51, %v7225_v6  ;;  %v2905_v42 = vld [vmem:[#allocation2 + $0x40] sm:$0xf] }
 0x18b   : > { %v1844_v17 = vor.u32 %v1843_v0, %v1840_v63  ;;  %v1854_v56 = vrot.slane %v1852_v31, 4  ;;  %v1857_v27 = vrot.slane %v1855_v13, 5  ;;  %v6098_v7 = vrot.slane %v3536_v15, 9  ;;  %v1485_v63 = vld [vmem:[#allocation2 + $0xb8] sm:$0xf] }
 0x18c   : > { %v1863_v28 = vrot.slane %v1861_v9, 5  ;;  %2283 = vrot.lane.b32.xlu0 %v5995_v12, %s6753_s29  ;;  %v680_v30 = vmax.f32 %v608_v22, 0.0  ;;  %v3686_v32 = vrot.slane %v3537_v16, 5  ;;  %v6099_v33 = vrot.slane %v3538_v61, 9  ;;  %v2906_v0 = vld [vmem:[#allocation2 + $0x44] sm:$0x1] }
 0x18d   : > { %v1845_v47 = vrot.slane %v1844_v17, 4  ;;  %v1858_v34 = vor.u32 %v1857_v27, %v1854_v56  ;;  %v3690_v35 = vrot.slane %v3539_v25, 5  ;;  %v600_v37 = vadd.f32 %v7403_v51, %v7229_v19  ;;  %v7418_v19 = vpop.f32.mrb[28].mxu0  ;;  %v1488_v31 = vld [vmem:[#allocation2 + $0xbc] sm:$0x1] }
 0x18e   : > { %v3040_v39 = vshrl.u32 %v2903_v26, 16  ;;  %v6286_v40 = vpack.c.bf16 %v680_v30, %v680_v30  ;;  %v3687_v41 = vsel %vm7121_vm12, %v6098_v7, %v3686_v32  ;;  %v3043_v44 = vshll.u32 %v2903_v26, 16  ;;  %v7425_v26 = vpop.f32.mrb[29].mxu0  ;;  %v1473_v27 = vld [vmem:[#allocation2 + $0xa8] sm:$0xf] }
 0x18f   : > { %v1850_v6 = vsel %vm7130_vm13, %v1845_v47, %v1849_v18  ;;  %v1859_v48 = vrot.slane %v1858_v34, 4  ;;  %v3691_v52 = vsel %vm7121_vm12, %v6099_v33, %v3690_v35  ;;  %v678_v53 = vmax.f32 %v600_v37, 0.0  ;;  %v1476_v33 = vld [vmem:[#allocation2 + $0xac] sm:$0x1]  ;;  %v6597_v37 = vld [vmem:[#allocation2 + $0x88] ss:$8 sps:$4 sm:$0xff]  }
 0x190   : > { %v3042_v54 = vrot.slane %v3040_v39, 4  ;;  %2657 = vrot.lane.b32.xlu0 %v6044_v62, %s6752_s23  ;;  %v1199_v2 = vshrl.u32 %v6286_v40, 16  ;;  %v1202_v43 = vshll.u32 %v6286_v40, 16  ;;  %v6125_v11 = vcombine.low %v3687_v41, %v3691_v52  ;;  %v7437_v39 = vld [vmem:[#allocation2 + $0x30] sm:$0xf] }
 0x191   : > { %v3045_v15 = vrot.slane %v3043_v44, 5  ;;  %v1864_v50 = vsel %vm7130_vm13, %v1859_v48, %v1863_v28  ;;  %v6284_v57 = vpack.c.bf16 %v678_v53, %v678_v53  ;;  %v3049_v46 = vshll.u32 %v2904_v8, 16  ;;  %v6609_v41 = vld [vmem:[%s8703_s3 + $0x10] sm:$0xff]   ;;  %v6599_v52 = vld [vmem:[#allocation2 + $0x80] ss:$8 sps:$4 sm:$0xff]  }
 0x192   : > { %v3054_v60 = vshrl.u32 %v2905_v42, 16  ;;  %v5994_v16 = vcombine.low %v1850_v6, %v1864_v50  ;;  %v1201_v61 = vrot.slane %v1199_v2, 7  ;;  %v3057_v5 = vshll.u32 %v2905_v42, 16  ;;  %6503 = vmatpush1.bf16.msra.mxu1 %v6609_v41  ;;  %5188 = vmatpush1.bf16.msra.mxu0 %v6609_v41  ;;  %v1497_v41 = vld [vmem:[#allocation2 + $0xc8] sm:$0xf] }
 0x193   : > { %v3046_v4 = vor.u32 %v3045_v15, %v3042_v54  ;;  %v1183_v13 = vshrl.u32 %v6284_v57, 16  ;;  %v1186_v9 = vshll.u32 %v6284_v57, 16  ;;  %v3051_v62 = vrot.slane %v3049_v46, 5  ;;  %v7457_v46 = vld [vmem:[#allocation2 + $0x38] sm:$0xf]  ;;  %6495 = vmatprep.subr.bf16.mxu1 %v6748_v55  ;;  %5189 = vmatprep.subr.bf16.mxu0 %v6748_v55 }
 0x194   : > { %v3056_v12 = vrot.slane %v3054_v60, 4  ;;  %2281 = vrot.lane.b32.xlu1 %v5994_v16, %s6753_s29  ;;  %v1204_v17 = vor.u32 %v1202_v43, %v1201_v61  ;;  %v1205_v18 = vrot.slane %v1201_v61, 4  ;;  %3830 = vrot.lane.b32.xlu0 %v6125_v11, %s6751_s22  ;;  %v3059_v25 = vrot.slane %v3057_v5, 5  ;;  %v4072_v43 = vld [vmem:[#allocation2 + $0x34] sm:$0x1] }
 0x195   : > { %v3047_v22 = vrot.slane %v3046_v4, 4  ;;  %v1185_v56 = vrot.slane %v1183_v13, 7  ;;  %v3063_v28 = vshll.u32 %v2906_v0, 16  ;;  %v611_v7 = vadd.f32 %v7403_v51, %v7237_v58  ;;  %v1491_v0 = vld [vmem:[#allocation2 + $0xc0] sm:$0xf] }
 0x196   : > { %v603_v47 = vadd.f32 %v7403_v51, %v7245_v1  ;;  %v1486_v30 = vsel %vm6987_vm7, %v1204_v17, %v1485_v63  ;;  %v1489_v32 = vsel %vm6959_vm4, %v1205_v18, %v1488_v31  ;;  %v3060_v35 = vor.u32 %v3059_v25, %v3056_v12  ;;  %v1494_v4 = vld [vmem:[#allocation2 + $0xc4] sm:$0x1]  ;;  %v1479_v12 = vld [vmem:[#allocation2 + $0xb0] sm:$0xf] }
 0x197   : > { %v3052_v34 = vsel %vm7130_vm13, %v3047_v22, %v3051_v62  ;;  %1487 = vst [vmem:[#allocation2 + $0xb8] sm:$0xf] %v1486_v30  ;;  %1490 = vst [vmem:[#allocation2 + $0xbc] sm:$0x1] %v1489_v32  ;;  %v1188_v58 = vor.u32 %v1186_v9, %v1185_v56  ;;  %v1189_v6 = vrot.slane %v1185_v56, 4  ;;  %v3065_v40 = vrot.slane %v3063_v28, 5 }
 0x198   : > { %v681_v1 = vmax.f32 %v611_v7, 0.0  ;;  %v3061_v8 = vrot.slane %v3060_v35, 4  ;;  %v679_v42 = vmax.f32 %v603_v47, 0.0  ;;  %v624_v44 = vadd.f32 %v7403_v51, %v7250_v23  ;;  %2840 = vrot.lane.b32.xlu0 %v6597_v37, %s6749_s18  ;;  %v6613_v23 = vld [vmem:[%s8703_s3 + $0x18] sm:$0xff]   ;;  %v6615_v25 = vld [vmem:[%s8703_s3 + $0x20] sm:$0xff]  }
 0x199   : > { %v616_v48 = vadd.f32 %v7403_v51, %v7264_v49  ;;  %v1474_v53 = vsel %vm6987_vm7, %v1188_v58, %v1473_v27  ;;  %v1477_v54 = vsel %vm6959_vm4, %v1189_v6, %v1476_v33  ;;  %v4184_v11 = vshrl.u32 %v7437_v39, 16  ;;  %6504 = vmatpush1.bf16.msra.mxu1 %v6613_v23  ;;  %v1482_v27 = vld [vmem:[#allocation2 + $0xb4] sm:$0x1]  ;;  %5190 = vmatpush1.bf16.msra.mxu0 %v6613_v23  ;;  %v1509_v33 = vld [vmem:[#allocation2 + $0xd8] sm:$0xf] }
 0x19a   : > { %v6287_v2 = vpack.c.bf16 %v681_v1, %v681_v1  ;;  %1475 = vst [vmem:[#allocation2 + $0xa8] sm:$0xf] %v1474_v53  ;;  %1478 = vst [vmem:[#allocation2 + $0xac] sm:$0x1] %v1477_v54  ;;  %v3066_v49 = vsel %vm7130_vm13, %v3061_v8, %v3065_v40  ;;  %v6285_v15 = vpack.c.bf16 %v679_v42, %v679_v42  ;;  %v684_v50 = vmax.f32 %v624_v44, 0.0 }
 0x19b   : > { %v682_v57 = vmax.f32 %v616_v48, 0.0  ;;  %v6075_v60 = vcombine.low %v3052_v34, %v3066_v49  ;;  %v4186_v63 = vrot.slane %v4184_v11, 4  ;;  %v4187_v17 = vshll.u32 %v7437_v39, 16  ;;  %6496 = vmatprep.subr.bf16.mxu1 %v6748_v55  ;;  %v1512_v34 = vld [vmem:[#allocation2 + $0xdc] sm:$0x1]  ;;  %5191 = vmatprep.subr.bf16.mxu0 %v6748_v55 }
 0x19c   : > { %v1207_v16 = vshrl.u32 %v6287_v2, 16  ;;  %v1210_v61 = vshll.u32 %v6287_v2, 16  ;;  %v1191_v5 = vshrl.u32 %v6285_v15, 16  ;;  %v1194_v31 = vshll.u32 %v6285_v15, 16  ;;  %4010 = vrot.lane.b32.xlu0 %v6599_v52, %s6750_s20  ;;  %v6598_v37 = vld [vmem:[#allocation2 + $0x58] ss:$8 sps:$4 sm:$0xff]  }
 0x19d   : > { %v6290_v13 = vpack.c.bf16 %v684_v50, %v684_v50  ;;  %v6288_v9 = vpack.c.bf16 %v682_v57, %v682_v57  ;;  %3457 = vrot.lane.b32.xlu1 %v6075_v60, %s6755_s21  ;;  %v4193_v18 = vshll.u32 %v4072_v43, 16  ;;  %v4198_v22 = vshrl.u32 %v7457_v46, 16  ;;  %v1500_v8 = vld [vmem:[#allocation2 + $0xcc] sm:$0x1]  ;;  %v4074_v48 = vld [vmem:[#allocation2 + $0x3c] sm:$0x1]  ;;  %6505 = vmatpush1.bf16.msra.mxu1 %v6615_v25 }
 0x19e   : > { %v1209_v62 = vrot.slane %v1207_v16, 7  ;;  %v1193_v56 = vrot.slane %v1191_v5, 7  ;;  %v4189_v39 = vrot.slane %v4187_v17, 5  ;;  %v2907_v54 = vld [vmem:[#allocation2 + $0x58] sm:$0xf]  ;;  %6497 = vmatprep.subr.bf16.mxu1 %v6748_v55  ;;  %v6618_v50 = vld [vmem:[%s8703_s3 + $0x28] sm:$0xff]   ;;  %5192 = vmatpush1.bf16.msra.mxu0 %v6615_v25 }
 0x19f   : > { %v1231_v28 = vshrl.u32 %v6290_v13, 16  ;;  %v1234_v7 = vshll.u32 %v6290_v13, 16  ;;  %v1215_v47 = vshrl.u32 %v6288_v9, 16  ;;  %v1218_v35 = vshll.u32 %v6288_v9, 16  ;;  %v2908_v49 = vld [vmem:[#allocation2 + $0x5c] sm:$0x1]  ;;  %5193 = vmatprep.subr.bf16.mxu0 %v6748_v55 }
 0x1a0   : > { %v1212_v30 = vor.u32 %v1210_v61, %v1209_v62  ;;  %v1213_v32 = vrot.slane %v1209_v62, 4  ;;  %v1196_v58 = vor.u32 %v1194_v31, %v1193_v56  ;;  %v1197_v6 = vrot.slane %v1193_v56, 4  ;;  %v2909_v15 = vld [vmem:[#allocation2 + $0x60] sm:$0xf]  ;;  %v3532_v13 = vld [vmem:[#allocation2 + $0x58] sm:$0xe] }
 0x1a1   : > { %v1233_v40 = vrot.slane %v1231_v28, 7  ;;  %v1217_v1 = vrot.slane %v1215_v47, 7  ;;  %2834 = vrot.lane.b32.xlu1 %v6598_v37, %s6749_s18  ;;  %v4190_v52 = vor.u32 %v4189_v39, %v4186_v63  ;;  %v7475_v53 = vrot.slane %v4193_v18, 5  ;;  %v2910_v63 = vld [vmem:[#allocation2 + $0x64] sm:$0x1]  ;;  %6506 = vmatpush1.bf16.msra.mxu1 %v6618_v50 }
 0x1a2   : > { %v1492_v42 = vsel %vm6987_vm7, %v1212_v30, %v1491_v0  ;;  %v1495_v44 = vsel %vm6959_vm4, %v1213_v32, %v1494_v4  ;;  %v1480_v2 = vsel %vm6987_vm7, %v1196_v58, %v1479_v12  ;;  %v1483_v43 = vsel %vm6959_vm4, %v1197_v6, %v1482_v27  ;;  %v3533_v18 = vld [vmem:[#allocation2 + $0x5c] sm:$0x1]  ;;  %v3535_v28 = vld [vmem:[#allocation2 + $0x64] sm:$0x1]  ;;  %6498 = vmatprep.subr.bf16.mxu1 %v6748_v55  ;;  %v6619_v6 = vld [vmem:[%s8703_s3 + $0x30] sm:$0xff]  }
 0x1a3   : > { %1493 = vst [vmem:[#allocation2 + $0xc0] sm:$0xf] %v1492_v42  ;;  %1496 = vst [vmem:[#allocation2 + $0xc4] sm:$0x1] %v1495_v44  ;;  %v1236_v11 = vor.u32 %v1234_v7, %v1233_v40  ;;  %v1237_v23 = vrot.slane %v1233_v40, 4  ;;  %v1220_v57 = vor.u32 %v1218_v35, %v1217_v1  ;;  %v1221_v60 = vrot.slane %v1217_v1, 4  ;;  %5194 = vmatpush1.bf16.msra.mxu0 %v6618_v50 }
 0x1a4   : > { %1481 = vst [vmem:[#allocation2 + $0xb0] sm:$0xf] %v1480_v2  ;;  %1484 = vst [vmem:[#allocation2 + $0xb4] sm:$0x1] %v1483_v43  ;;  %v7485_v16 = vrot.slane %v4190_v52, 4  ;;  %v4200_v61 = vrot.slane %v4198_v22, 4  ;;  %5195 = vmatprep.subr.bf16.mxu0 %v6748_v55 }
 0x1a5   : > { %v1510_v0 = vsel %vm6987_vm7, %v1236_v11, %v1509_v33  ;;  %v1513_v4 = vsel %vm6959_vm4, %v1237_v23, %v1512_v34  ;;  %v4201_v5 = vshll.u32 %v7457_v46, 16  ;;  %v4207_v31 = vshll.u32 %v4074_v48, 16  ;;  %v3534_v22 = vld [vmem:[#allocation2 + $0x60] sm:$0xe]  ;;  %v1735_v58 = vld [vmem:[#allocation2 + $0x64] sm:$0x1]  ;;  %6507 = vmatpush1.bf16.msra.mxu1 %v6619_v6 }
 0x1a6   : > { %1511 = vst [vmem:[#allocation2 + $0xd8] sm:$0xf] %v1510_v0  ;;  %1514 = vst [vmem:[#allocation2 + $0xdc] sm:$0x1] %v1513_v4  ;;  %v1498_v9 = vsel %vm6987_vm7, %v1220_v57, %v1497_v41  ;;  %v1501_v62 = vsel %vm6959_vm4, %v1221_v60, %v1500_v8  ;;  %v4196_v12 = vsel %vm7130_vm13, %v7485_v16, %v7475_v53  ;;  %v3068_v17 = vshrl.u32 %v2907_v54, 16 }
 0x1a7   : > { %1499 = vst [vmem:[#allocation2 + $0xc8] sm:$0xf] %v1498_v9  ;;  %1502 = vst [vmem:[#allocation2 + $0xcc] sm:$0x1] %v1501_v62  ;;  %v4203_v46 = vrot.slane %v4201_v5, 5  ;;  %v4209_v25 = vrot.slane %v4207_v31, 5  ;;  %5196 = vmatpush1.bf16.msra.mxu0 %v6619_v6  ;;  %6499 = vmatprep.subr.bf16.mxu1 %v6748_v55 }
 0x1a8   : > { %v3071_v56 = vshll.u32 %v2907_v54, 16  ;;  %v3077_v27 = vshll.u32 %v2908_v49, 16  ;;  %v3070_v7 = vrot.slane %v3068_v17, 4  ;;  %v3082_v47 = vshrl.u32 %v2909_v15, 16  ;;  %v1734_v33 = vld [vmem:[#allocation2 + $0x60] sm:$0xf]  ;;  %5197 = vmatprep.subr.bf16.mxu0 %v6748_v55 }
 0x1a9   : > { %v3085_v30 = vshll.u32 %v2909_v15, 16  ;;  %v3091_v32 = vshll.u32 %v2910_v63, 16  ;;  %v4204_v34 = vor.u32 %v4203_v46, %v4200_v61  ;;  %v6096_v39 = vrot.slane %v3532_v13, 9  ;;  %v1736_v42 = vld [vmem:[#allocation2 + $0x68] sm:$0xf] }
 0x1aa   : > { %v3073_v35 = vrot.slane %v3071_v56, 5  ;;  %v3079_v37 = vrot.slane %v3077_v27, 5  ;;  %v3084_v40 = vrot.slane %v3082_v47, 4  ;;  %v3678_v8 = vrot.slane %v3533_v18, 5  ;;  %v1737_v54 = vld [vmem:[#allocation2 + $0x6c] sm:$0x1] }
 0x1ab   : > { %v3087_v1 = vrot.slane %v3085_v30, 5  ;;  %v3093_v41 = vrot.slane %v3091_v32, 5  ;;  %v4205_v44 = vrot.slane %v4204_v34, 4  ;;  %v6097_v52 = vrot.slane %v3534_v22, 9  ;;  %v2362_v49 = vld [vmem:[#allocation2 + $0x60] sm:$0xe] }
 0x1ac   : > { %v3074_v48 = vor.u32 %v3073_v35, %v3070_v7  ;;  %v3682_v53 = vrot.slane %v3535_v28, 5  ;;  %v3679_v43 = vsel %vm7121_vm12, %v6096_v39, %v3678_v8  ;;  %v1922_v11 = vshrl.u32 %v1734_v33, 16  ;;  %v2363_v15 = vld [vmem:[#allocation2 + $0x64] sm:$0x1]  ;;  %v2364_v61 = vld [vmem:[#allocation2 + $0x68] sm:$0xe] }
 0x1ad   : > { %v3088_v2 = vor.u32 %v3087_v1, %v3084_v40  ;;  %v1925_v23 = vshll.u32 %v1734_v33, 16  ;;  %v4210_v50 = vsel %vm7130_vm13, %v4205_v44, %v4209_v25  ;;  %v1931_v16 = vshll.u32 %v1735_v58, 16  ;;  %v2365_v63 = vld [vmem:[#allocation2 + $0x6c] sm:$0x1]  ;;  %v2366_v13 = vld [vmem:[#allocation2 + $0x70] sm:$0xe] }
 0x1ae   : > { %v3075_v57 = vrot.slane %v3074_v48, 4  ;;  %v3683_v60 = vsel %vm7121_vm12, %v6097_v52, %v3682_v53  ;;  %v6154_v0 = vcombine.low %v4196_v12, %v4210_v50  ;;  %v1924_v31 = vrot.slane %v1922_v11, 4  ;;  %v2367_v9 = vld [vmem:[#allocation2 + $0x74] sm:$0x1]  ;;  %v2368_v46 = vld [vmem:[#allocation2 + $0x78] sm:$0xe] }
 0x1af   : > { %v3089_v4 = vrot.slane %v3088_v2, 4  ;;  %v6124_v5 = vcombine.low %v3679_v43, %v3683_v60  ;;  %v1927_v17 = vrot.slane %v1925_v23, 5  ;;  %v1933_v18 = vrot.slane %v1931_v16, 5  ;;  %v2369_v25 = vld [vmem:[#allocation2 + $0x7c] sm:$0x1] }
 0x1b0   : > { %v3080_v62 = vsel %vm7130_vm13, %v3075_v57, %v3079_v37  ;;  %v1936_v22 = vshrl.u32 %v1736_v42, 16  ;;  %v6620_v56 = vld [vmem:[%s8703_s3 + $0x38] sm:$0xff]   ;;  %4627 = vrot.lane.b32.xlu1 %v6154_v0, %s6754_s19  ;;  %v1939_v27 = vshll.u32 %v1736_v42, 16  ;;  %v1945_v28 = vshll.u32 %v1737_v54, 16  ;;  %v3544_v47 = vld [vmem:[#allocation2 + $0x88] sm:$0xe] }
 0x1b1   : > { %v3094_v12 = vsel %vm7130_vm13, %v3089_v4, %v3093_v41  ;;  %v6018_v7 = vrot.slane %v2362_v49, 9  ;;  %v1928_v32 = vor.u32 %v1927_v17, %v1924_v31  ;;  %v2515_v34 = vrot.slane %v2363_v15, 5  ;;  %v3545_v35 = vld [vmem:[#allocation2 + $0x8c] sm:$0x1]  ;;  %v3546_v37 = vld [vmem:[#allocation2 + $0x90] sm:$0xe]  ;;  %6508 = vmatpush1.bf16.msra.mxu1 %v6620_v56  ;;  %5198 = vmatpush1.bf16.msra.mxu0 %v6620_v56 }
 0x1b2   : > { %v6076_v30 = vcombine.low %v3080_v62, %v3094_v12  ;;  %v1938_v33 = vrot.slane %v1936_v22, 4  ;;  %v1941_v39 = vrot.slane %v1939_v27, 5  ;;  %v1947_v58 = vrot.slane %v1945_v28, 5  ;;  %6500 = vmatprep.subr.bf16.mxu1 %v6748_v55  ;;  %5199 = vmatprep.subr.bf16.mxu0 %v6748_v55  ;;  %v3547_v54 = vld [vmem:[#allocation2 + $0x94] sm:$0x1] }
 0x1b3   : > { %v6019_v6 = vrot.slane %v2364_v61, 9  ;;  %v2519_v40 = vrot.slane %v2365_v63, 5  ;;  %v1929_v1 = vrot.slane %v1928_v32, 4  ;;  %v2516_v41 = vsel %vm7121_vm12, %v6018_v7, %v2515_v34  ;;  %v1730_v2 = vld [vmem:[#allocation2 + $0x50] sm:$0xf] }
 0x1b4   : > { %3459 = vrot.lane.b32.xlu0 %v6076_v30, %s6755_s21  ;;  %v6020_v8 = vrot.slane %v2366_v13, 9  ;;  %v2523_v42 = vrot.slane %v2367_v9, 5  ;;  %3828 = vrot.lane.b32.xlu1 %v6124_v5, %s6751_s22  ;;  %v1942_v44 = vor.u32 %v1941_v39, %v1938_v33  ;;  %v6021_v52 = vrot.slane %v2368_v46, 9  ;;  %v1731_v49 = vld [vmem:[#allocation2 + $0x54] sm:$0x1]  ;;  %v7546_v33 = vpop.f32.mrb[30].mxu0 }
 0x1b5   : > { %v2520_v48 = vsel %vm7121_vm12, %v6019_v6, %v2519_v40  ;;  %v2527_v53 = vrot.slane %v2369_v25, 5  ;;  %v1934_v55 = vsel %vm7130_vm13, %v1929_v1, %v1933_v18  ;;  %v6102_v23 = vrot.slane %v3544_v47, 9  ;;  %v1732_v15 = vld [vmem:[#allocation2 + $0x58] sm:$0xf]  ;;  %v1733_v9 = vld [vmem:[#allocation2 + $0x5c] sm:$0x1] }
 0x1b6   : > { %v6045_v43 = vcombine.low %v2516_v41, %v2520_v48  ;;  %v2524_v11 = vsel %vm7121_vm12, %v6020_v8, %v2523_v42  ;;  %v1943_v50 = vrot.slane %v1942_v44, 4  ;;  %v3702_v60 = vrot.slane %v3545_v35, 5  ;;  %v6600_v31 = vld [vmem:[#allocation2 + $0x70] ss:$8 sps:$4 sm:$0xff]   ;;  %v4084_v12 = vld [vmem:[#allocation2 + $0x74] sm:$0x1] }
 0x1b7   : > { %v2528_v57 = vsel %vm7121_vm12, %v6021_v52, %v2527_v53  ;;  %v6103_v16 = vrot.slane %v3546_v37, 9  ;;  %v3706_v63 = vrot.slane %v3547_v54, 5  ;;  %v1894_v0 = vshrl.u32 %v1730_v2, 16  ;;  %v4083_v18 = vld [vmem:[#allocation2 + $0x70] sm:$0xf]  ;;  %v7549_v6 = vpop.f32.mrb[31].mxu0 }
 0x1b8   : > { %v6046_v61 = vcombine.low %v2524_v11, %v2528_v57  ;;  %v1897_v4 = vshll.u32 %v1730_v2, 16  ;;  %v1948_v5 = vsel %vm7130_vm13, %v1943_v50, %v1947_v58  ;;  %2659 = vrot.lane.b32.xlu1 %v6045_v43, %s6752_s23  ;;  %v7541_v13 = vsel %vm7121_vm12, %v6102_v23, %v3702_v60  ;;  %v4085_v27 = vld [vmem:[#allocation2 + $0x78] sm:$0xf]  ;;  %v4086_v32 = vld [vmem:[#allocation2 + $0x7c] sm:$0x1] }
 0x1b9   : > { %v1903_v62 = vshll.u32 %v1731_v49, 16  ;;  %v1908_v17 = vshrl.u32 %v1732_v15, 16  ;;  %v5997_v22 = vcombine.low %v1934_v55, %v1948_v5  ;;  %v3707_v46 = vsel %vm7121_vm12, %v6103_v16, %v3706_v63  ;;  %v789_v58 = vld [vmem:[#allocation2 + $0x98] sm:$0x1]  ;;  %v911_v42 = vld [vmem:[#allocation2 + $0x9c] sm:$0x1] }
 0x1ba   : > { %v1896_v25 = vrot.slane %v1894_v0, 4  ;;  %v1899_v56 = vrot.slane %v1897_v4, 5  ;;  %v6127_v28 = vcombine.low %v7541_v13, %v3707_v46  ;;  %v1911_v30 = vshll.u32 %v1732_v15, 16  ;;  %v4091_v54 = vld [vmem:[#allocation2 + $0x90] sm:$0xf]  ;;  %v6621_v49 = vld [vmem:[%s8703_s3 + $0x40] sm:$0xff]  }
 0x1bb   : > { %v1905_v7 = vrot.slane %v1903_v62, 5  ;;  %v1910_v47 = vrot.slane %v1908_v17, 4  ;;  %2287 = vrot.lane.b32.xlu0 %v5997_v22, %s6753_s29  ;;  %v1917_v35 = vshll.u32 %v1733_v9, 16  ;;  %v4268_v37 = vshrl.u32 %v4083_v18, 16  ;;  %v4092_v23 = vld [vmem:[#allocation2 + $0x94] sm:$0x1]  ;;  %6509 = vmatpush1.bf16.msra.mxu1 %v6621_v49 }
 0x1bc   : > { %v1900_v34 = vor.u32 %v1899_v56, %v1896_v25  ;;  %v4271_v39 = vshll.u32 %v4083_v18, 16  ;;  %4008 = vrot.lane.b32.xlu1 %v6600_v31, %s6750_s20  ;;  %v1913_v40 = vrot.slane %v1911_v30, 5  ;;  %v4277_v1 = vshll.u32 %v4084_v12, 16  ;;  %v2911_v16 = vld [vmem:[#allocation2 + $0x68] sm:$0xf]  ;;  %5200 = vmatpush1.bf16.msra.mxu0 %v6621_v49 }
 0x1bd   : > { %v4282_v41 = vshrl.u32 %v4085_v27, 16  ;;  %v4285_v8 = vshll.u32 %v4085_v27, 16  ;;  %v1919_v48 = vrot.slane %v1917_v35, 5  ;;  %v4270_v52 = vrot.slane %v4268_v37, 4  ;;  %v2912_v62 = vld [vmem:[#allocation2 + $0x6c] sm:$0x1] }
 0x1be   : > { %v1901_v44 = vrot.slane %v1900_v34, 4  ;;  %v4273_v53 = vrot.slane %v4271_v39, 5  ;;  %v1914_v2 = vor.u32 %v1913_v40, %v1910_v47  ;;  %v4279_v55 = vrot.slane %v4277_v1, 5  ;;  %v2913_v46 = vld [vmem:[#allocation2 + $0x70] sm:$0xf] }
 0x1bf   : > { %v4284_v43 = vrot.slane %v4282_v41, 4  ;;  %v4287_v11 = vrot.slane %v4285_v8, 5  ;;  %2661 = vrot.lane.b32.xlu0 %v6046_v61, %s6752_s23  ;;  %v4291_v57 = vshll.u32 %v4086_v32, 16  ;;  %v790_v60 = vsel %vm6959_vm4, 0, %v789_v58  ;;  %v2914_v47 = vld [vmem:[#allocation2 + $0x74] sm:$0x1] }
 0x1c0   : > { %v1906_v15 = vsel %vm7130_vm13, %v1901_v44, %v1905_v7  ;;  %v4274_v50 = vor.u32 %v4273_v53, %v4270_v52  ;;  %v1915_v63 = vrot.slane %v1914_v2, 4  ;;  %791 = vst [vmem:[#allocation2 + $0x98] sm:$0x1] %v790_v60  ;;  %v912_v4 = vsel %vm6967_vm5, 0, %v911_v42  ;;  %v816_v42 = vld [vmem:[#allocation2 + $0xe0] sm:$0x1]  ;;  %v7574_v44 = vpop.permute.xlu1 %2828 }
 0x1c1   : > { %v4288_v0 = vor.u32 %v4287_v11, %v4284_v43  ;;  %v4324_v5 = vshrl.u32 %v4091_v54, 16  ;;  %v4293_v61 = vrot.slane %v4291_v57, 5  ;;  %913 = vst [vmem:[#allocation2 + $0x9c] sm:$0x1] %v912_v4  ;;  %v4327_v13 = vshll.u32 %v4091_v54, 16 }
 0x1c2   : > { %v4275_v31 = vrot.slane %v4274_v50, 4  ;;  %v4333_v9 = vshll.u32 %v4092_v23, 16  ;;  %v1920_v17 = vsel %vm7130_vm13, %v1915_v63, %v1919_v48  ;;  %v3096_v25 = vshrl.u32 %v2911_v16, 16  ;;  %v938_v53 = vld [vmem:[#allocation2 + $0xe4] sm:$0x1] }
 0x1c3   : > { %v4289_v18 = vrot.slane %v4288_v0, 4  ;;  %v4326_v22 = vrot.slane %v4324_v5, 4  ;;  %3834 = vrot.lane.b32.xlu0 %v6127_v28, %s6751_s22  ;;  %v5996_v56 = vcombine.low %v1906_v15, %v1920_v17  ;;  %v4329_v27 = vrot.slane %v4327_v13, 5  ;;  %v810_v60 = vld [vmem:[#allocation2 + $0xd0] sm:$0x1] }
 0x1c4   : > { %v4280_v12 = vsel %vm7130_vm13, %v4275_v31, %v4279_v55  ;;  %v7567_v7 = vrot.slane %v4333_v9, 5  ;;  %v3098_v32 = vrot.slane %v3096_v25, 4  ;;  %v3099_v34 = vshll.u32 %v2911_v16, 16 }
 0x1c5   : > { %v4294_v30 = vsel %vm7130_vm13, %v4289_v18, %v4293_v61  ;;  %v3105_v35 = vshll.u32 %v2912_v62, 16  ;;  %2285 = vrot.lane.b32.xlu1 %v5996_v56, %s6753_s29  ;;  %v4330_v39 = vor.u32 %v4329_v27, %v4326_v22  ;;  %v3110_v58 = vshrl.u32 %v2913_v46, 16  ;;  %v4079_v61 = vld [vmem:[#allocation2 + $0x60] sm:$0xf]  ;;  %v4080_v18 = vld [vmem:[#allocation2 + $0x64] sm:$0x1]  ;;  %v7601_v22 = vpop.permute.xlu0 %3822 }
 0x1c6   : > { %v6157_v37 = vcombine.low %v4280_v12, %v4294_v30  ;;  %v3113_v28 = vshll.u32 %v2913_v46, 16  ;;  %v3101_v40 = vrot.slane %v3099_v34, 5  ;;  %v3119_v41 = vshll.u32 %v2914_v47, 16  ;;  %v7603_v46 = vpop.permute.xlu1 %2826  ;;  %v4081_v30 = vld [vmem:[#allocation2 + $0x68] sm:$0xf] }
 0x1c7   : > { %v3107_v1 = vrot.slane %v3105_v35, 5  ;;  %v627_v8 = vadd.f32 %v7403_v51, %v7269_v59  ;;  %v6601_v48 = vld [vmem:[#allocation2 + $0x90] ss:$8 sps:$4 sm:$0xff]   ;;  %v619_v54 = vadd.f32 %v7403_v51, %v7279_v21  ;;  %v7581_v2 = vadd.f32 %v7403_v51, %v7370_v3 }
 0x1c8   : > { %4633 = vrot.lane.b32.xlu0 %v6157_v37, %s6754_s19  ;;  %v4093_v52 = vld [vmem:[#allocation2 + $0x98] sm:$0xf]  ;;  %v7585_v55 = vadd.f32 %v7403_v51, %v7374_v14  ;;  %v7589_v59 = vadd.f32 %v7403_v51, %v7379_v10  ;;  %v4094_v43 = vld [vmem:[#allocation2 + $0x9c] sm:$0x1]  ;;  %v4331_v11 = vrot.slane %v4330_v39, 4  ;;  %v3102_v15 = vor.u32 %v3101_v40, %v3098_v32 }
 0x1c9   : > { %v4338_v23 = vshrl.u32 %v4093_v52, 16  ;;  %v4341_v49 = vshll.u32 %v4093_v52, 16  ;;  %4012 = vrot.lane.b32.xlu1 %v6601_v48, %s6750_s20  ;;  %v4347_v21 = vshll.u32 %v4094_v43, 16  ;;  %v3112_v50 = vrot.slane %v3110_v58, 4  ;;  %v932_v51 = vld [vmem:[#allocation2 + $0xd4] sm:$0x1] }
 0x1ca   : > { %v3115_v57 = vrot.slane %v3113_v28, 5  ;;  %v3121_v3 = vrot.slane %v3119_v41, 5  ;;  %v4336_v14 = vsel %vm7130_vm13, %v4331_v11, %v7567_v7  ;;  %v3103_v10 = vrot.slane %v3102_v15, 4  ;;  %v6603_v11 = vld [vmem:[#allocation2 + $0x78] ss:$8 sps:$4 sm:$0xff]  }
 0x1cb   : > { %v4340_v16 = vrot.slane %v4338_v23, 4  ;;  %v4343_v63 = vrot.slane %v4341_v49, 5  ;;  %v4349_v0 = vrot.slane %v4347_v21, 5  ;;  %v685_v5 = vmax.f32 %v627_v8, 0.0  ;;  %v4082_v8 = vld [vmem:[#allocation2 + $0x6c] sm:$0x1] }
 0x1cc   : > { %v3116_v4 = vor.u32 %v3115_v57, %v3112_v50  ;;  %v817_v31 = vsel %vm6959_vm4, 0, %v816_v42  ;;  %v3108_v9 = vsel %vm7130_vm13, %v3103_v10, %v3107_v1  ;;  %v939_v62 = vsel %vm6967_vm5, 0, %v938_v53  ;;  %v2916_v21 = vld [vmem:[#allocation2 + $0x7c] sm:$0x1]  ;;  %v2917_v50 = vld [vmem:[#allocation2 + $0x80] sm:$0xf]  ;;  %v7616_v57 = vpop.permute.xlu0 %2651 }
 0x1cd   : > { %v4344_v13 = vor.u32 %v4343_v63, %v4340_v16  ;;  %818 = vst [vmem:[#allocation2 + $0xe0] sm:$0x1] %v817_v31  ;;  %v683_v17 = vmax.f32 %v619_v54, 0.0  ;;  %940 = vst [vmem:[#allocation2 + $0xe4] sm:$0x1] %v939_v62  ;;  %v6291_v56 = vpack.c.bf16 %v685_v5, %v685_v5  ;;  %v811_v12 = vsel %vm6959_vm4, 0, %v810_v60 }
 0x1ce   : > { %v3117_v25 = vrot.slane %v3116_v4, 4  ;;  %v933_v27 = vsel %vm6967_vm5, 0, %v932_v51  ;;  %812 = vst [vmem:[#allocation2 + $0xd0] sm:$0x1] %v811_v12  ;;  %v4240_v32 = vshrl.u32 %v4079_v61, 16  ;;  %v4243_v34 = vshll.u32 %v4079_v61, 16 }
 0x1cf   : > { %v4345_v7 = vrot.slane %v4344_v13, 4  ;;  %934 = vst [vmem:[#allocation2 + $0xd4] sm:$0x1] %v933_v27  ;;  %v6289_v47 = vpack.c.bf16 %v683_v17, %v683_v17  ;;  %v1239_v37 = vshrl.u32 %v6291_v56, 16  ;;  %v1242_v39 = vshll.u32 %v6291_v56, 16 }
 0x1d0   : > { %v3122_v35 = vsel %vm7130_vm13, %v3117_v25, %v3121_v3  ;;  %v4249_v58 = vshll.u32 %v4080_v18, 16  ;;  %v4242_v52 = vrot.slane %v4240_v32, 4  ;;  %v4245_v53 = vrot.slane %v4243_v34, 5  ;;  %v2915_v54 = vld [vmem:[#allocation2 + $0x78] sm:$0xf]  ;;  %v7618_v3 = vpop.permute.xlu1 %3998 }
 0x1d1   : > { %v4350_v28 = vsel %vm7130_vm13, %v4345_v7, %v4349_v0  ;;  %v6077_v40 = vcombine.low %v3108_v9, %v3122_v35  ;;  %v1223_v1 = vshrl.u32 %v6289_v47, 16  ;;  %v1226_v41 = vshll.u32 %v6289_v47, 16  ;;  %v6602_v63 = vld [vmem:[#allocation2 + $0xa8] ss:$8 sps:$4 sm:$0xff]   ;;  %v2918_v0 = vld [vmem:[#allocation2 + $0x84] sm:$0x1] }
 0x1d2   : > { %v6159_v42 = vcombine.low %v4336_v14, %v4350_v28  ;;  %v1241_v48 = vrot.slane %v1239_v37, 7  ;;  %v7614_v23 = vrot.slane %v4249_v58, 5  ;;  %v4254_v49 = vshrl.u32 %v4081_v30, 16  ;;  %v3540_v9 = vld [vmem:[#allocation2 + $0x78] sm:$0xe] }
 0x1d3   : > { %3461 = vrot.lane.b32.xlu1 %v6077_v40, %s6755_s21  ;;  %v1225_v43 = vrot.slane %v1223_v1, 7  ;;  %v4257_v15 = vshll.u32 %v4081_v30, 16  ;;  %v4246_v10 = vor.u32 %v4245_v53, %v4242_v52  ;;  %v4263_v51 = vshll.u32 %v4082_v8, 16  ;;  %v3541_v27 = vld [vmem:[#allocation2 + $0x7c] sm:$0x1]  ;;  %v7634_v53 = vpop.permute.xlu0 %2832 }
 0x1d4   : > { %4637 = vrot.lane.b32.xlu0 %v6159_v42, %s6754_s19  ;;  %v1244_v60 = vor.u32 %v1242_v39, %v1241_v48  ;;  %v1245_v14 = vrot.slane %v1241_v48, 4  ;;  %v1515_v16 = vld [vmem:[#allocation2 + $0xe0] sm:$0xf]  ;;  %v1518_v4 = vld [vmem:[#allocation2 + $0xe4] sm:$0x1]  ;;  %v4256_v61 = vrot.slane %v4254_v49, 4 }
 0x1d5   : > { %v1228_v5 = vor.u32 %v1226_v41, %v1225_v43  ;;  %v1229_v31 = vrot.slane %v1225_v43, 4  ;;  %v4259_v13 = vrot.slane %v4257_v15, 5  ;;  %v1503_v18 = vld [vmem:[#allocation2 + $0xd0] sm:$0xf]  ;;  %v4247_v56 = vrot.slane %v4246_v10, 4  ;;  %v7636_v43 = vpop.permute.xlu1 %2649 }
 0x1d6   : > { %v1516_v62 = vsel %vm6987_vm7, %v1244_v60, %v1515_v16  ;;  %v1519_v17 = vsel %vm6959_vm4, %v1245_v14, %v1518_v4  ;;  %v1506_v25 = vld [vmem:[#allocation2 + $0xd4] sm:$0x1]  ;;  %v4265_v12 = vrot.slane %v4263_v51, 5  ;;  %v3124_v32 = vshrl.u32 %v2915_v54, 16  ;;  %v3542_v34 = vld [vmem:[#allocation2 + $0x80] sm:$0xe] }
 0x1d7   : > { %1517 = vst [vmem:[#allocation2 + $0xe0] sm:$0xf] %v1516_v62  ;;  %1520 = vst [vmem:[#allocation2 + $0xe4] sm:$0x1] %v1519_v17  ;;  %v1504_v7 = vsel %vm6987_vm7, %v1228_v5, %v1503_v18  ;;  %v1507_v47 = vsel %vm6959_vm4, %v1229_v31, %v1506_v25  ;;  %2838 = vrot.lane.b32.xlu1 %v6603_v11, %s6749_s18  ;;  %v4260_v30 = vor.u32 %v4259_v13, %v4256_v61  ;;  %v3543_v35 = vld [vmem:[#allocation2 + $0x84] sm:$0x1] }
 0x1d8   : > { %1505 = vst [vmem:[#allocation2 + $0xd0] sm:$0xf] %v1504_v7  ;;  %1508 = vst [vmem:[#allocation2 + $0xd4] sm:$0x1] %v1507_v47  ;;  %2842 = vrot.lane.b32.xlu0 %v6602_v63, %s6749_s18  ;;  %v6604_v37 = vld [vmem:[#allocation2 + $0xb0] ss:$8 sps:$4 sm:$0xff]   ;;  %v4252_v39 = vsel %vm7130_vm13, %v4247_v56, %v7614_v23 }
 0x1d9   : > { %v3127_v58 = vshll.u32 %v2915_v54, 16  ;;  %v3133_v28 = vshll.u32 %v2916_v21, 16  ;;  %v3138_v40 = vshrl.u32 %v2917_v50, 16  ;;  %v1742_v1 = vld [vmem:[#allocation2 + $0x80] sm:$0xf]  ;;  %v4261_v41 = vrot.slane %v4260_v30, 4 }
 0x1da   : > { %v3126_v8 = vrot.slane %v3124_v32, 4  ;;  %v3141_v42 = vshll.u32 %v2917_v50, 16  ;;  %v3147_v48 = vshll.u32 %v2918_v0, 16  ;;  %v1743_v52 = vld [vmem:[#allocation2 + $0x84] sm:$0x1]  ;;  %v6100_v60 = vrot.slane %v3540_v9, 9 }
 0x1db   : > { %v3129_v11 = vrot.slane %v3127_v58, 5  ;;  %v3135_v49 = vrot.slane %v3133_v28, 5  ;;  %v3140_v15 = vrot.slane %v3138_v40, 4  ;;  %v1744_v14 = vld [vmem:[#allocation2 + $0x88] sm:$0xf]  ;;  %v4266_v54 = vsel %vm7130_vm13, %v4261_v41, %v4265_v12 }
 0x1dc   : > { %v3143_v23 = vrot.slane %v3141_v42, 5  ;;  %v3149_v21 = vrot.slane %v3147_v48, 5  ;;  %v3694_v16 = vrot.slane %v3541_v27, 5  ;;  %4014 = vrot.lane.b32.xlu0 %v6604_v37, %s6750_s20  ;;  %v6156_v50 = vcombine.low %v4252_v39, %v4266_v54  ;;  %v1745_v0 = vld [vmem:[#allocation2 + $0x8c] sm:$0x1]  ;;  %v7650_v37 = vpop.permute.xlu1 %3820 }
 0x1dd   : > { %v3130_v63 = vor.u32 %v3129_v11, %v3126_v8  ;;  %v6101_v10 = vrot.slane %v3542_v34, 9  ;;  %v3698_v51 = vrot.slane %v3543_v35, 5  ;;  %v2370_v4 = vld [vmem:[#allocation2 + $0x80] sm:$0xe]  ;;  %v1978_v61 = vshrl.u32 %v1742_v1, 16  ;;  %v7648_v35 = vpop.permute.xlu0 %4002 }
 0x1de   : > { %v3144_v5 = vor.u32 %v3143_v23, %v3140_v15  ;;  %v3695_v31 = vsel %vm7121_vm12, %v6100_v60, %v3694_v16  ;;  %v1981_v13 = vshll.u32 %v1742_v1, 16  ;;  %v2371_v9 = vld [vmem:[#allocation2 + $0x84] sm:$0x1]  ;;  %v2372_v62 = vld [vmem:[#allocation2 + $0x88] sm:$0xe]  ;;  %4631 = vrot.lane.b32.xlu1 %v6156_v50, %s6754_s19  ;;  %v1987_v25 = vshll.u32 %v1743_v52, 16 }
 0x1df   : > { %v3131_v17 = vrot.slane %v3130_v63, 4  ;;  %v3699_v18 = vsel %vm7121_vm12, %v6101_v10, %v3698_v51  ;;  %v1992_v56 = vshrl.u32 %v1744_v14, 16  ;;  %v2373_v12 = vld [vmem:[#allocation2 + $0x8c] sm:$0x1]  ;;  %v914_v27 = vld [vmem:[#allocation2 + $0xa4] sm:$0x1] }
 0x1e0   : > { %v3145_v7 = vrot.slane %v3144_v5, 4  ;;  %v6126_v47 = vcombine.low %v3695_v31, %v3699_v18  ;;  %v1980_v30 = vrot.slane %v1978_v61, 4  ;;  %v1983_v32 = vrot.slane %v1981_v13, 5  ;;  %v7646_v34 = vld [vmem:[#allocation2 + $0xa0] sm:$0xe] }
 0x1e1   : > { %v3136_v39 = vsel %vm7130_vm13, %v3131_v17, %v3135_v49  ;;  %v1989_v58 = vrot.slane %v1987_v25, 5  ;;  %v1994_v28 = vrot.slane %v1992_v56, 4  ;;  %v1995_v40 = vshll.u32 %v1744_v14, 16  ;;  %v2376_v1 = vld [vmem:[#allocation2 + $0xa8] sm:$0xe]  ;;  %v7667_v25 = vpop.permute.xlu0 %2279  ;;  %v7669_v56 = vpop.permute.xlu1 %4000 }
 0x1e2   : > { %v3150_v41 = vsel %vm7130_vm13, %v3145_v7, %v3149_v21  ;;  %v1984_v8 = vor.u32 %v1983_v32, %v1980_v30  ;;  %v2001_v42 = vshll.u32 %v1745_v0, 16  ;;  %v6022_v48 = vrot.slane %v2370_v4, 9  ;;  %v2377_v52 = vld [vmem:[#allocation2 + $0xac] sm:$0x1]  ;;  %v1738_v11 = vld [vmem:[#allocation2 + $0x70] sm:$0xf]  ;;  %3832 = vrot.lane.b32.xlu1 %v6126_v47, %s6751_s22 }
 0x1e3   : > { %v6078_v15 = vcombine.low %v3136_v39, %v3150_v41  ;;  %v1997_v60 = vrot.slane %v1995_v40, 5  ;;  %v2531_v54 = vrot.slane %v2371_v9, 5  ;;  %v6023_v23 = vrot.slane %v2372_v62, 9  ;;  %v1739_v16 = vld [vmem:[#allocation2 + $0x74] sm:$0x1] }
 0x1e4   : > { %v1985_v49 = vrot.slane %v1984_v8, 4  ;;  %v2003_v50 = vrot.slane %v2001_v42, 5  ;;  %v2535_v63 = vrot.slane %v2373_v12, 5  ;;  %v915_v14 = vsel %vm6967_vm5, 0, %v914_v27  ;;  %v1740_v10 = vld [vmem:[#allocation2 + $0x78] sm:$0xf] }
 0x1e5   : > { %3463 = vrot.lane.b32.xlu0 %v6078_v15, %s6755_s21  ;;  %v1998_v21 = vor.u32 %v1997_v60, %v1994_v28  ;;  %v2532_v51 = vsel %vm7121_vm12, %v6022_v48, %v2531_v54  ;;  %916 = vst [vmem:[#allocation2 + $0xa4] sm:$0x1] %v915_v14  ;;  %v6024_v0 = vrot.slane %v7646_v34, 9  ;;  %v6025_v4 = vrot.slane %v2376_v1, 9  ;;  %v1741_v5 = vld [vmem:[#allocation2 + $0x7c] sm:$0x1] }
 0x1e6   : > { %v3548_v31 = vld [vmem:[#allocation2 + $0xa8] sm:$0xe]  ;;  %v1990_v61 = vsel %vm7130_vm13, %v1985_v49, %v1989_v58  ;;  %v2536_v13 = vsel %vm7121_vm12, %v6023_v23, %v2535_v63  ;;  %v2543_v9 = vrot.slane %v2377_v52, 5  ;;  %v1950_v62 = vshrl.u32 %v1738_v11, 16  ;;  %v3549_v17 = vld [vmem:[#allocation2 + $0xac] sm:$0x1] }
 0x1e7   : > { %v3550_v18 = vld [vmem:[#allocation2 + $0xb0] sm:$0xe]  ;;  %v1999_v12 = vrot.slane %v1998_v21, 4  ;;  %v6047_v27 = vcombine.low %v2532_v51, %v2536_v13  ;;  %v1953_v7 = vshll.u32 %v1738_v11, 16  ;;  %v1959_v47 = vshll.u32 %v1739_v16, 16  ;;  %v7677_v13 = vpop.permute.xlu0 %2653 }
 0x1e8   : > { %v3551_v30 = vld [vmem:[#allocation2 + $0xb4] sm:$0x1]  ;;  %v2378_v32 = vld [vmem:[#allocation2 + $0xb0] sm:$0xe]  ;;  %v2544_v34 = vsel %vm7121_vm12, %v6025_v4, %v2543_v9  ;;  %v1952_v39 = vrot.slane %v1950_v62, 4  ;;  %v1964_v58 = vshrl.u32 %v1740_v10, 16 }
 0x1e9   : > { %v1967_v28 = vshll.u32 %v1740_v10, 16  ;;  %v2379_v40 = vld [vmem:[#allocation2 + $0xb4] sm:$0x1]  ;;  %v2004_v1 = vsel %vm7130_vm13, %v1999_v12, %v2003_v50  ;;  %2663 = vrot.lane.b32.xlu1 %v6047_v27, %s6752_s23  ;;  %v1955_v41 = vrot.slane %v1953_v7, 5  ;;  %v1961_v8 = vrot.slane %v1959_v47, 5 }
 0x1ea   : > { %v1973_v42 = vshll.u32 %v1741_v5, 16  ;;  %v2380_v48 = vld [vmem:[#allocation2 + $0xb8] sm:$0xe]  ;;  %v5999_v52 = vcombine.low %v1990_v61, %v2004_v1  ;;  %v1966_v11 = vrot.slane %v1964_v58, 4  ;;  %v6104_v60 = vrot.slane %v3548_v31, 9  ;;  %v7679_v5 = vpop.permute.xlu1 %4004 }
 0x1eb   : > { %v1969_v15 = vrot.slane %v1967_v28, 5  ;;  %v2381_v54 = vld [vmem:[#allocation2 + $0xbc] sm:$0x1]  ;;  %v1956_v23 = vor.u32 %v1955_v41, %v1952_v39  ;;  %v3710_v49 = vrot.slane %v3549_v17, 5  ;;  %v6105_v63 = vrot.slane %v3550_v18, 9 }
 0x1ec   : > { %v1975_v16 = vrot.slane %v1973_v42, 5  ;;  %v2919_v14 = vld [vmem:[#allocation2 + $0x88] sm:$0xf]  ;;  %2291 = vrot.lane.b32.xlu0 %v5999_v52, %s6753_s29  ;;  %v2375_v10 = vld [vmem:[#allocation2 + $0xa4] sm:$0x1]  ;;  %v3714_v21 = vrot.slane %v3551_v30, 5 }
 0x1ed   : > { %v1970_v50 = vor.u32 %v1969_v15, %v1966_v11  ;;  %v6026_v51 = vrot.slane %v2378_v32, 9  ;;  %v2547_v4 = vrot.slane %v2379_v40, 5  ;;  %v2539_v61 = vrot.slane %v2375_v10, 5  ;;  %v2920_v7 = vld [vmem:[#allocation2 + $0x8c] sm:$0x1]  ;;  %v7699_v10 = vpop.permute.xlu0 %3826 }
 0x1ee   : > { %v1957_v9 = vrot.slane %v1956_v23, 4  ;;  %v3711_v31 = vsel %vm7121_vm12, %v6104_v60, %v3710_v49  ;;  %v6027_v62 = vrot.slane %v2380_v48, 9  ;;  %v3715_v18 = vsel %vm7121_vm12, %v6105_v63, %v3714_v21  ;;  %v2921_v47 = vld [vmem:[#allocation2 + $0x90] sm:$0xf]  ;;  %v2922_v58 = vld [vmem:[#allocation2 + $0x94] sm:$0x1] }
 0x1ef   : > { %v1971_v17 = vrot.slane %v1970_v50, 4  ;;  %v7687_v12 = vsel %vm7121_vm12, %v6026_v51, %v2547_v4  ;;  %v2551_v27 = vrot.slane %v2381_v54, 5  ;;  %v2540_v30 = vsel %vm7121_vm12, %v6024_v0, %v2539_v61  ;;  %v4087_v40 = vld [vmem:[#allocation2 + $0x80] sm:$0xf]  ;;  %v4088_v52 = vld [vmem:[#allocation2 + $0x84] sm:$0x1] }
 0x1f0   : > { %v1962_v32 = vsel %vm7130_vm13, %v1957_v9, %v1961_v8  ;;  %v6128_v39 = vcombine.low %v3711_v31, %v3715_v18  ;;  %v3152_v28 = vshrl.u32 %v2919_v14, 16  ;;  %v6048_v1 = vcombine.low %v2540_v30, %v2544_v34  ;;  %v4089_v11 = vld [vmem:[#allocation2 + $0x88] sm:$0xf]  ;;  %v4090_v8 = vld [vmem:[#allocation2 + $0x8c] sm:$0x1] }
 0x1f1   : > { %v1976_v41 = vsel %vm7130_vm13, %v1971_v17, %v1975_v16  ;;  %v2552_v42 = vsel %vm7121_vm12, %v6027_v62, %v2551_v27  ;;  %v3155_v48 = vshll.u32 %v2919_v14, 16  ;;  %v3161_v54 = vshll.u32 %v2920_v7, 16  ;;  %v7701_v16 = vpop.permute.xlu1 %2277  ;;  %v6605_v14 = vld [vmem:[#allocation2 + $0xb8] ss:$8 sps:$4 sm:$0xff]   ;;  %v831_v61 = vld [vmem:[#allocation2 + $0x108] sm:$0x1] }
 0x1f2   : > { %v5998_v15 = vcombine.low %v1962_v32, %v1976_v41  ;;  %v6049_v0 = vcombine.low %v7687_v12, %v2552_v42  ;;  %v3154_v60 = vrot.slane %v3152_v28, 4  ;;  %2665 = vrot.lane.b32.xlu0 %v6048_v1, %s6752_s23  ;;  %v3166_v49 = vshrl.u32 %v2921_v47, 16  ;;  %v953_v18 = vld [vmem:[#allocation2 + $0x10c] sm:$0x1]  ;;  %v825_v30 = vld [vmem:[#allocation2 + $0xf8] sm:$0x1] }
 0x1f3   : > { %v3157_v23 = vrot.slane %v3155_v48, 5  ;;  %v3169_v34 = vshll.u32 %v2921_v47, 16  ;;  %v3175_v63 = vshll.u32 %v2922_v58, 16  ;;  %v3163_v50 = vrot.slane %v3161_v54, 5  ;;  %v947_v32 = vld [vmem:[#allocation2 + $0xfc] sm:$0x1] }
 0x1f4   : > { %2289 = vrot.lane.b32.xlu1 %v5998_v15, %s6753_s29  ;;  %v4296_v21 = vshrl.u32 %v4087_v40, 16  ;;  %v4299_v51 = vshll.u32 %v4087_v40, 16  ;;  %v4305_v4 = vshll.u32 %v4088_v52, 16  ;;  %v3168_v31 = vrot.slane %v3166_v49, 4  ;;  %v6612_v41 = vld [vmem:[#allocation2 + $0x10] ss:$8 sps:$4 sm:$0xff]  }
 0x1f5   : > { %v3158_v9 = vor.u32 %v3157_v23, %v3154_v60  ;;  %v3171_v62 = vrot.slane %v3169_v34, 5  ;;  %v3177_v17 = vrot.slane %v3175_v63, 5  ;;  %v4310_v47 = vshrl.u32 %v4089_v11, 16  ;;  %v834_v60 = vld [vmem:[#allocation2 + $0x110] sm:$0x1]  ;;  %1699 = vst.msk [vmem:[#allocation3 + $0x10] sm:$0xff] %vm1697_vm14, %v6612_v41  ;;  %v7716_v34 = vpop.permute.xlu1 %3453 }
 0x1f6   : > { %v4298_v12 = vrot.slane %v4296_v21, 4  ;;  %v4301_v27 = vrot.slane %v4299_v51, 5  ;;  %v7704_v7 = vrot.slane %v4305_v4, 5  ;;  %3836 = vrot.lane.b32.xlu0 %v6128_v39, %s6751_s22  ;;  %v4313_v1 = vshll.u32 %v4089_v11, 16  ;;  %v956_v11 = vld [vmem:[#allocation2 + $0x114] sm:$0x1] }
 0x1f7   : > { %v3159_v58 = vrot.slane %v3158_v9, 4  ;;  %v3172_v28 = vor.u32 %v3171_v62, %v3168_v31  ;;  %v4319_v40 = vshll.u32 %v4090_v8, 16  ;;  %v4312_v48 = vrot.slane %v4310_v47, 4  ;;  %v7714_v8 = vpop.permute.xlu0 %4625  ;;  %v792_v51 = vld [vmem:[#allocation2 + $0xa0] sm:$0x1]  ;;  %2327 = vst.msk [vmem:[#allocation3 + $0x10] sm:$0xff] %vm2325_vm15, %v7667_v25 }
 0x1f8   : > { %2844 = vrot.lane.b32.xlu1 %v6605_v14, %s6749_s18  ;;  %v4302_v42 = vor.u32 %v4301_v27, %v4298_v12  ;;  %v688_v52 = vmax.f32 %v7581_v2, 0.0  ;;  %v832_v15 = vsel %vm6959_vm4, 0, %v831_v61  ;;  %v4315_v39 = vrot.slane %v4313_v1, 5  ;;  %v6607_v4 = vld [vmem:[#allocation2 + $0xc0] ss:$8 sps:$4 sm:$0xff]   ;;  %2699 = vst.msk [vmem:[#allocation3 + $0x10] sm:$0xff] %vm2697_vm0, %v7616_v57 }
 0x1f9   : > { %v3164_v54 = vsel %vm7130_vm13, %v3159_v58, %v3163_v50  ;;  %v3173_v23 = vrot.slane %v3172_v28, 4  ;;  %v4321_v49 = vrot.slane %v4319_v40, 5  ;;  %833 = vst [vmem:[#allocation2 + $0x108] sm:$0x1] %v832_v15  ;;  %v954_v2 = vsel %vm6967_vm5, 0, %v953_v18  ;;  %v7744_v15 = vpop.permute.xlu1 %2830  ;;  %2876 = vst.msk [vmem:[#allocation3 + $0x10] sm:$0xff] %vm2874_vm1, %v7574_v44 }
 0x1fa   : > { %v4303_v63 = vrot.slane %v4302_v42, 4  ;;  %v6294_v14 = vpack.c.bf16 %v688_v52, %v688_v52  ;;  %v686_v21 = vmax.f32 %v7585_v55, 0.0  ;;  %2667 = vrot.lane.b32.xlu0 %v6049_v0, %s6752_s23  ;;  %v4316_v61 = vor.u32 %v4315_v39, %v4312_v48  ;;  %955 = vst [vmem:[#allocation2 + $0x10c] sm:$0x1] %v954_v2  ;;  %v1747_v62 = vld [vmem:[#allocation2 + $0xa4] sm:$0x1] }
 0x1fb   : > { %v3178_v50 = vsel %vm7130_vm13, %v3173_v23, %v3177_v17  ;;  %v826_v9 = vsel %vm6959_vm4, 0, %v825_v30  ;;  %v948_v31 = vsel %vm6967_vm5, 0, %v947_v32  ;;  %v1748_v17 = vld [vmem:[#allocation2 + $0xa8] sm:$0xf]  ;;  %v689_v58 = vmax.f32 %v7589_v59, 0.0  ;;  %v7742_v52 = vpop.permute.xlu0 %2836  ;;  %3501 = vst.msk [vmem:[#allocation3 + $0x10] sm:$0xff] %vm3499_vm2, %v7716_v34 }
 0x1fc   : > { %v6079_v18 = vcombine.low %v3164_v54, %v3178_v50  ;;  %v4308_v55 = vsel %vm7130_vm13, %v4303_v63, %v7704_v7  ;;  %v1263_v12 = vshrl.u32 %v6294_v14, 16  ;;  %v1266_v0 = vshll.u32 %v6294_v14, 16  ;;  %827 = vst [vmem:[#allocation2 + $0xf8] sm:$0x1] %v826_v9  ;;  %949 = vst [vmem:[#allocation2 + $0xfc] sm:$0x1] %v948_v31 }
 0x1fd   : > { %v4317_v27 = vrot.slane %v4316_v61, 4  ;;  %v6292_v47 = vpack.c.bf16 %v686_v21, %v686_v21  ;;  %v835_v30 = vsel %vm6959_vm4, 0, %v834_v60  ;;  %v957_v28 = vsel %vm6967_vm5, 0, %v956_v11  ;;  %v1749_v48 = vld [vmem:[#allocation2 + $0xac] sm:$0x1]  ;;  %3870 = vst.msk [vmem:[#allocation3 + $0x10] sm:$0xff] %vm3868_vm3, %v7601_v22 }
 0x1fe   : > { %3465 = vrot.lane.b32.xlu1 %v6079_v18, %s6755_s21  ;;  %v1265_v32 = vrot.slane %v1263_v12, 7  ;;  %836 = vst [vmem:[#allocation2 + $0x110] sm:$0x1] %v835_v30  ;;  %v793_v7 = vsel %vm6959_vm4, 0, %v792_v51  ;;  %v2015_v1 = vshll.u32 %v1747_v62, 16  ;;  %4016 = vrot.lane.b32.xlu0 %v6607_v4, %s6750_s20  ;;  %v6295_v42 = vpack.c.bf16 %v689_v58, %v689_v58  ;;  %4048 = vst.msk [vmem:[#allocation3 + $0x10] sm:$0xff] %vm4046_vm6, %v7669_v56 }
 0x1ff   : > { %v4322_v40 = vsel %vm7130_vm13, %v4317_v27, %v4321_v49  ;;  %v1247_v59 = vshrl.u32 %v6292_v47, 16  ;;  %v1250_v41 = vshll.u32 %v6292_v47, 16  ;;  %958 = vst [vmem:[#allocation2 + $0x114] sm:$0x1] %v957_v28  ;;  %794 = vst [vmem:[#allocation2 + $0xa0] sm:$0x1] %v793_v7 }
 0x200   : > { %v6158_v60 = vcombine.low %v4308_v55, %v4322_v40  ;;  %v1268_v54 = vor.u32 %v1266_v0, %v1265_v32  ;;  %v1269_v23 = vrot.slane %v1265_v32, 4  ;;  %v1533_v39 = vld [vmem:[#allocation2 + $0x108] sm:$0xf]  ;;  %v7746_v11 = vrot.slane %v2015_v1, 5  ;;  %v828_v21 = vld [vmem:[#allocation2 + $0x100] sm:$0x1] }
 0x201   : > { %v1249_v63 = vrot.slane %v1247_v59, 7  ;;  %v1271_v2 = vshrl.u32 %v6295_v42, 16  ;;  %v1274_v14 = vshll.u32 %v6295_v42, 16  ;;  %v2020_v49 = vshrl.u32 %v1748_v17, 16  ;;  %v1536_v50 = vld [vmem:[#allocation2 + $0x10c] sm:$0x1] }
 0x202   : > { %4635 = vrot.lane.b32.xlu1 %v6158_v60, %s6754_s19  ;;  %v1534_v51 = vsel %vm6987_vm7, %v1268_v54, %v1533_v39  ;;  %v2023_v4 = vshll.u32 %v1748_v17, 16  ;;  %v2029_v61 = vshll.u32 %v1749_v48, 16  ;;  %v7754_v9 = vld [vmem:[%s8702_s2] ss:$0 sm:$0xff]  ;;  %v950_v62 = vld [vmem:[#allocation2 + $0x104] sm:$0x1]  ;;  %v1537_v18 = vsel %vm6959_vm4, %v1269_v23, %v1536_v50  ;;  %v7766_v60 = vpop.permute.xlu0 %4629  ;;  %v7768_v54 = vpop.permute.xlu1 %3451 }
 0x203   : > { %v635_v31 = vadd.f32 %v7754_v9, %v7414_v45  ;;  %1535 = vst [vmem:[#allocation2 + $0x108] sm:$0xf] %v1534_v51  ;;  %v1252_v55 = vor.u32 %v1250_v41, %v1249_v63  ;;  %v1253_v12 = vrot.slane %v1249_v63, 4  ;;  %v1521_v0 = vld [vmem:[#allocation2 + $0xf8] sm:$0xf]  ;;  %v1273_v47 = vrot.slane %v1271_v2, 7 }
 0x204   : > { %v1524_v27 = vld [vmem:[#allocation2 + $0xfc] sm:$0x1]  ;;  %v3552_v17 = vld [vmem:[#allocation2 + $0xb8] sm:$0xe]  ;;  %1538 = vst [vmem:[#allocation2 + $0x10c] sm:$0x1] %v1537_v18 }
 0x205   : > { %v2022_v58 = vrot.slane %v2020_v49, 4  ;;  %v2025_v30 = vrot.slane %v2023_v4, 5  ;;  %v7760_v32 = vrot.slane %v2029_v61, 5  ;;  %v687_v28 = vmax.f32 %v635_v31, 0.0  ;;  %v3553_v7 = vld [vmem:[#allocation2 + $0xbc] sm:$0x1] }
 0x206   : > { %v3554_v1 = vld [vmem:[#allocation2 + $0xc0] sm:$0xe]  ;;  %v1522_v45 = vsel %vm6987_vm7, %v1252_v55, %v1521_v0  ;;  %v1525_v40 = vsel %vm6959_vm4, %v1253_v12, %v1524_v27  ;;  %v1276_v59 = vor.u32 %v1274_v14, %v1273_v47  ;;  %v1277_v41 = vrot.slane %v1273_v47, 4  ;;  %v1539_v42 = vld [vmem:[#allocation2 + $0x110] sm:$0xf]  ;;  %4673 = vst.msk [vmem:[#allocation3 + $0x10] sm:$0xff] %vm4671_vm8, %v7714_v8 }
 0x207   : > { %v6617_v48 = vld [vmem:[#allocation2] ss:$8 sps:$4 sm:$0xff]   ;;  %1523 = vst [vmem:[#allocation2 + $0xf8] sm:$0xf] %v1522_v45  ;;  %1526 = vst [vmem:[#allocation2 + $0xfc] sm:$0x1] %v1525_v40  ;;  %v2026_v63 = vor.u32 %v2025_v30, %v2022_v58  ;;  %v6293_v51 = vpack.c.bf16 %v687_v28, %v687_v28 }
 0x208   : > { %v1542_v23 = vld [vmem:[#allocation2 + $0x114] sm:$0x1]  ;;  %v1746_v39 = vld [vmem:[#allocation2 + $0xa0] sm:$0xf]  ;;  %v829_v2 = vsel %vm6959_vm4, 0, %v828_v21  ;;  %v951_v49 = vsel %vm6967_vm5, 0, %v950_v62  ;;  %v1540_v14 = vsel %vm6987_vm7, %v1276_v59, %v1539_v42  ;;  %v656_v59 = vadd.f32 %v7754_v9, %v7418_v19 }
 0x209   : > { %v1543_v50 = vsel %vm6959_vm4, %v1277_v41, %v1542_v23  ;;  %v2006_v4 = vshrl.u32 %v1746_v39, 16  ;;  %v2009_v61 = vshll.u32 %v1746_v39, 16  ;;  %830 = vst [vmem:[#allocation2 + $0x100] sm:$0x1] %v829_v2  ;;  %952 = vst [vmem:[#allocation2 + $0x104] sm:$0x1] %v951_v49  ;;  %v7790_v39 = vpop.permute.xlu0 %4006 }
 0x20a   : > { %v3555_v31 = vld [vmem:[#allocation2 + $0xc4] sm:$0x1]  ;;  %v843_v18 = vld [vmem:[#allocation2 + $0x128] sm:$0x1]  ;;  %1698 = vst.msk [vmem:[#allocation3] sm:$0xff] %vm1697_vm14, %v6617_v48  ;;  %v2027_v21 = vrot.slane %v2026_v63, 4 }
 0x20b   : > { %1541 = vst [vmem:[#allocation2 + $0x110] sm:$0xf] %v1540_v14  ;;  %1544 = vst [vmem:[#allocation2 + $0x114] sm:$0x1] %v1543_v50  ;;  %v1255_v55 = vshrl.u32 %v6293_v51, 16  ;;  %v1258_v62 = vshll.u32 %v6293_v51, 16  ;;  %v648_v50 = vadd.f32 %v7754_v9, %v7425_v26 }
 0x20c   : > { %v6106_v12 = vrot.slane %v3552_v17, 9  ;;  %v965_v0 = vld [vmem:[#allocation2 + $0x12c] sm:$0x1]  ;;  %v2008_v27 = vrot.slane %v2006_v4, 4  ;;  %v2011_v47 = vrot.slane %v2009_v61, 5  ;;  %v3718_v58 = vrot.slane %v3553_v7, 5 }
 0x20d   : > { %v6107_v30 = vrot.slane %v3554_v1, 9  ;;  %v2032_v28 = vsel %vm7130_vm13, %v2027_v21, %v7760_v32  ;;  %v1257_v45 = vrot.slane %v1255_v55, 7  ;;  %v3722_v40 = vrot.slane %v3555_v31, 5  ;;  %v837_v41 = vld [vmem:[#allocation2 + $0x118] sm:$0x1]  ;;  %v7792_v32 = vpop.permute.xlu1 %4623  ;;  %2326 = vst.msk [vmem:[#allocation3] sm:$0xff] %vm2325_vm15, %v7701_v16 }
 0x20e   : > { %v2012_v42 = vor.u32 %v2011_v47, %v2008_v27  ;;  %v3719_v48 = vsel %vm7121_vm12, %v6106_v12, %v3718_v58  ;;  %v844_v17 = vsel %vm6959_vm4, 0, %v843_v18  ;;  %v966_v7 = vsel %vm6967_vm5, 0, %v965_v0  ;;  %v959_v1 = vld [vmem:[#allocation2 + $0x11c] sm:$0x1]  ;;  %v819_v23 = vld [vmem:[#allocation2 + $0xe8] sm:$0x1] }
 0x20f   : > { %v1260_v63 = vor.u32 %v1258_v62, %v1257_v45  ;;  %v1261_v2 = vrot.slane %v1257_v45, 4  ;;  %v3723_v19 = vsel %vm7121_vm12, %v6107_v30, %v3722_v40  ;;  %v692_v49 = vmax.f32 %v656_v59, 0.0  ;;  %845 = vst [vmem:[#allocation2 + $0x128] sm:$0x1] %v844_v17  ;;  %967 = vst [vmem:[#allocation2 + $0x12c] sm:$0x1] %v966_v7 }
 0x210   : > { %v2013_v51 = vrot.slane %v2012_v42, 4  ;;  %v6129_v14 = vcombine.low %v3719_v48, %v3723_v19  ;;  %v838_v4 = vsel %vm6959_vm4, 0, %v837_v41  ;;  %v2927_v61 = vld [vmem:[#allocation2 + $0xb8] sm:$0xf]  ;;  %v1527_v31 = vld [vmem:[#allocation2 + $0x100] sm:$0xf]  ;;  %v7816_v48 = vpop.permute.xlu0 %3455 }
 0x211   : > { %v1530_v18 = vld [vmem:[#allocation2 + $0x104] sm:$0x1]  ;;  %v6298_v21 = vpack.c.bf16 %v692_v49, %v692_v49  ;;  %839 = vst [vmem:[#allocation2 + $0x118] sm:$0x1] %v838_v4  ;;  %v960_v55 = vsel %vm6967_vm5, 0, %v959_v1  ;;  %v820_v62 = vsel %vm6959_vm4, 0, %v819_v23  ;;  %v1528_v26 = vsel %vm6987_vm7, %v1260_v63, %v1527_v31  ;;  %v7818_v17 = vpop.permute.xlu1 %3824 }
 0x212   : > { %v2018_v12 = vsel %vm7130_vm13, %v2013_v51, %v7746_v11  ;;  %v1531_v0 = vsel %vm6959_vm4, %v1261_v2, %v1530_v18  ;;  %3838 = vrot.lane.b32.xlu1 %v6129_v14, %s6751_s22  ;;  %v690_v27 = vmax.f32 %v648_v50, 0.0  ;;  %961 = vst [vmem:[#allocation2 + $0x11c] sm:$0x1] %v960_v55  ;;  %821 = vst [vmem:[#allocation2 + $0xe8] sm:$0x1] %v820_v62  ;;  %v3208_v41 = vshrl.u32 %v2927_v61, 16 }
 0x213   : > { %v2928_v47 = vld [vmem:[#allocation2 + $0xbc] sm:$0x1]  ;;  %v2929_v58 = vld [vmem:[#allocation2 + $0xc0] sm:$0xf]  ;;  %v6000_v30 = vcombine.low %v2018_v12, %v2032_v28  ;;  %1529 = vst [vmem:[#allocation2 + $0x100] sm:$0xf] %v1528_v26  ;;  %v7828_v14 = vadd.f32 %v7754_v9, %v7546_v33 }
 0x214   : > { %1532 = vst [vmem:[#allocation2 + $0x104] sm:$0x1] %v1531_v0  ;;  %v1295_v45 = vshrl.u32 %v6298_v21, 16  ;;  %v1298_v40 = vshll.u32 %v6298_v21, 16  ;;  %v6296_v11 = vpack.c.bf16 %v690_v27, %v690_v27  ;;  %v6611_v59 = vld [vmem:[#allocation2 + $0xd8] ss:$8 sps:$4 sm:$0xff]  }
 0x215   : > { %v3211_v42 = vshll.u32 %v2927_v61, 16  ;;  %2293 = vrot.lane.b32.xlu0 %v6000_v30, %s6753_s29  ;;  %v2930_v7 = vld [vmem:[#allocation2 + $0xc4] sm:$0x1]  ;;  %v3217_v1 = vshll.u32 %v2928_v47, 16  ;;  %v3222_v23 = vshrl.u32 %v2929_v58, 16  ;;  %v3225_v63 = vshll.u32 %v2929_v58, 16 }
 0x216   : > { %v1297_v28 = vrot.slane %v1295_v45, 7  ;;  %2698 = vst.msk [vmem:[#allocation3] sm:$0xff] %vm2697_vm0, %v7636_v43  ;;  %v1557_v25 = vld [vmem:[#allocation2 + $0x128] sm:$0xf]  ;;  %v1560_v2 = vld [vmem:[#allocation2 + $0x12c] sm:$0x1]  ;;  %2848 = vrot.lane.b32.xlu1 %v6611_v59, %s6749_s18  ;;  %v7836_v47 = vadd.f32 %v7754_v9, %v7549_v6  ;;  %v7839_v59 = vpop.permute.xlu0 %2283 }
 0x217   : > { %v1279_v16 = vshrl.u32 %v6296_v11, 16  ;;  %v1282_v19 = vshll.u32 %v6296_v11, 16  ;;  %v6614_v49 = vld [vmem:[#allocation2 + $0xd0] ss:$8 sps:$4 sm:$0xff]   ;;  %v3210_v4 = vrot.slane %v3208_v41, 4  ;;  %v3213_v61 = vrot.slane %v3211_v42, 5  ;;  %v7841_v41 = vpop.permute.xlu1 %2655 }
 0x218   : > { %v1750_v51 = vld [vmem:[#allocation2 + $0xb0] sm:$0xf]  ;;  %v1300_v57 = vor.u32 %v1298_v40, %v1297_v28  ;;  %v1301_v50 = vrot.slane %v1297_v28, 4  ;;  %v1751_v31 = vld [vmem:[#allocation2 + $0xb4] sm:$0x1]  ;;  %v3219_v43 = vrot.slane %v3217_v1, 5 }
 0x219   : > { %v1281_v18 = vrot.slane %v1279_v16, 7  ;;  %v1545_v21 = vld [vmem:[#allocation2 + $0x118] sm:$0xf]  ;;  %v3224_v55 = vrot.slane %v3222_v23, 4  ;;  %v3227_v62 = vrot.slane %v3225_v63, 5  ;;  %v3214_v33 = vor.u32 %v3213_v61, %v3210_v4  ;;  %2875 = vst.msk [vmem:[#allocation3] sm:$0xff] %vm2874_vm1, %v7603_v46 }
 0x21a   : > { %v1558_v12 = vsel %vm6987_vm7, %v1300_v57, %v1557_v25  ;;  %v1561_v26 = vsel %vm6959_vm4, %v1301_v50, %v1560_v2  ;;  %v1548_v0 = vld [vmem:[#allocation2 + $0x11c] sm:$0x1]  ;;  %v6610_v27 = vld [vmem:[#allocation2 + $0xe0] ss:$8 sps:$4 sm:$0xff]   ;;  %v3231_v40 = vshll.u32 %v2930_v7, 16  ;;  %4018 = vrot.lane.b32.xlu1 %v6614_v49, %s6750_s20  ;;  %v2034_v1 = vshrl.u32 %v1750_v51, 16 }
 0x21b   : > { %1559 = vst [vmem:[#allocation2 + $0x128] sm:$0xf] %v1558_v12  ;;  %1562 = vst [vmem:[#allocation2 + $0x12c] sm:$0x1] %v1561_v26  ;;  %v1284_v58 = vor.u32 %v1282_v19, %v1281_v18  ;;  %v1285_v30 = vrot.slane %v1281_v18, 4  ;;  %v3228_v45 = vor.u32 %v3227_v62, %v3224_v55  ;;  %4020 = vrot.lane.b32.xlu0 %v6610_v27, %s6750_s20  ;;  %v3215_v42 = vrot.slane %v3214_v33, 4 }
 0x21c   : > { %v1752_v11 = vld [vmem:[#allocation2 + $0xb8] sm:$0xf]  ;;  %v1753_v28 = vld [vmem:[#allocation2 + $0xbc] sm:$0x1]  ;;  %v2037_v6 = vshll.u32 %v1750_v51, 16  ;;  %v2043_v9 = vshll.u32 %v1751_v31, 16 }
 0x21d   : > { %v1546_v23 = vsel %vm6987_vm7, %v1284_v58, %v1545_v21  ;;  %v1549_v7 = vsel %vm6959_vm4, %v1285_v30, %v1548_v0  ;;  %v3229_v63 = vrot.slane %v3228_v45, 4  ;;  %v3233_v25 = vrot.slane %v3231_v40, 5  ;;  %v2923_v2 = vld [vmem:[#allocation2 + $0xa8] sm:$0xf]  ;;  %v2924_v50 = vld [vmem:[#allocation2 + $0xac] sm:$0x1]  ;;  %v7852_v45 = vpop.permute.xlu0 %2657  ;;  %v7854_v40 = vpop.permute.xlu1 %2281 }
 0x21e   : > { %1547 = vst [vmem:[#allocation2 + $0x118] sm:$0xf] %v1546_v23  ;;  %1550 = vst [vmem:[#allocation2 + $0x11c] sm:$0x1] %v1549_v7  ;;  %v3220_v16 = vsel %vm7130_vm13, %v3215_v42, %v3219_v43  ;;  %v2036_v19 = vrot.slane %v2034_v1, 4  ;;  %v2039_v49 = vrot.slane %v2037_v6, 5 }
 0x21f   : > { %v2045_v57 = vrot.slane %v2043_v9, 5  ;;  %v3234_v51 = vsel %vm7130_vm13, %v3229_v63, %v3233_v25  ;;  %v2048_v4 = vshrl.u32 %v1752_v11, 16  ;;  %v2051_v61 = vshll.u32 %v1752_v11, 16  ;;  %v2925_v18 = vld [vmem:[#allocation2 + $0xb0] sm:$0xf]  ;;  %3500 = vst.msk [vmem:[#allocation3] sm:$0xff] %vm3499_vm2, %v7768_v54 }
 0x220   : > { %v2057_v31 = vshll.u32 %v1753_v28, 16  ;;  %v6081_v21 = vcombine.low %v3220_v16, %v3234_v51  ;;  %v2040_v55 = vor.u32 %v2039_v49, %v2036_v19  ;;  %v2926_v62 = vld [vmem:[#allocation2 + $0xb4] sm:$0x1]  ;;  %v3180_v12 = vshrl.u32 %v2923_v2, 16  ;;  %v2382_v0 = vld [vmem:[#allocation2 + $0xc0] sm:$0xe] }
 0x221   : > { %v3183_v26 = vshll.u32 %v2923_v2, 16  ;;  %v2050_v27 = vrot.slane %v2048_v4, 4  ;;  %v2053_v33 = vrot.slane %v2051_v61, 5  ;;  %v3189_v58 = vshll.u32 %v2924_v50, 16  ;;  %v2383_v30 = vld [vmem:[#allocation2 + $0xc4] sm:$0x1] }
 0x222   : > { %v2059_v43 = vrot.slane %v2057_v31, 5  ;;  %3469 = vrot.lane.b32.xlu0 %v6081_v21, %s6755_s21  ;;  %v2041_v11 = vrot.slane %v2040_v55, 4  ;;  %v3182_v42 = vrot.slane %v3180_v12, 4  ;;  %v3194_v1 = vshrl.u32 %v2925_v18, 16  ;;  %v2384_v6 = vld [vmem:[#allocation2 + $0xc8] sm:$0xe] }
 0x223   : > { %v3185_v28 = vrot.slane %v3183_v26, 5  ;;  %v2054_v9 = vor.u32 %v2053_v33, %v2050_v27  ;;  %v7857_v23 = vrot.slane %v3189_v58, 5  ;;  %v3197_v7 = vshll.u32 %v2925_v18, 16  ;;  %v2385_v25 = vld [vmem:[#allocation2 + $0xcc] sm:$0x1]  ;;  %v7870_v58 = vpop.permute.xlu0 %3830  ;;  %3869 = vst.msk [vmem:[#allocation3] sm:$0xff] %vm3868_vm3, %v7650_v37 }
 0x224   : > { %v3203_v63 = vshll.u32 %v2926_v62, 16  ;;  %v6616_v2 = vld [vmem:[#allocation2 + $0xc8] ss:$8 sps:$4 sm:$0xff]   ;;  %v2046_v16 = vsel %vm7130_vm13, %v2041_v11, %v2045_v57  ;;  %v3196_v49 = vrot.slane %v3194_v1, 4  ;;  %v6028_v50 = vrot.slane %v2382_v0, 9  ;;  %4047 = vst.msk [vmem:[#allocation3] sm:$0xff] %vm4046_vm6, %v7618_v3 }
 0x225   : > { %v3186_v19 = vor.u32 %v3185_v28, %v3182_v42  ;;  %v2055_v51 = vrot.slane %v2054_v9, 4  ;;  %v3199_v4 = vrot.slane %v3197_v7, 5  ;;  %v2555_v31 = vrot.slane %v2383_v30, 5  ;;  %v4095_v21 = vld [vmem:[#allocation2 + $0xb0] sm:$0xf]  ;;  %v7872_v30 = vpop.permute.xlu1 %3457  ;;  %4672 = vst.msk [vmem:[#allocation3] sm:$0xff] %vm4671_vm8, %v7792_v32 }
 0x226   : > { %v3205_v61 = vrot.slane %v3203_v63, 5  ;;  %v4096_v55 = vld [vmem:[#allocation2 + $0xb4] sm:$0x1]  ;;  %2846 = vrot.lane.b32.xlu0 %v6616_v2, %s6749_s18  ;;  %v6029_v26 = vrot.slane %v2384_v6, 9  ;;  %v2559_v18 = vrot.slane %v2385_v25, 5  ;;  %v4352_v34 = vshrl.u32 %v4095_v21, 16 }
 0x227   : > { %v3187_v12 = vrot.slane %v3186_v19, 4  ;;  %v2060_v62 = vsel %vm7130_vm13, %v2055_v51, %v2059_v43  ;;  %v3200_v27 = vor.u32 %v3199_v4, %v3196_v49  ;;  %v2556_v57 = vsel %vm7121_vm12, %v6028_v50, %v2555_v31  ;;  %v4097_v0 = vld [vmem:[#allocation2 + $0xb8] sm:$0xf]  ;;  %v4098_v33 = vld [vmem:[#allocation2 + $0xbc] sm:$0x1] }
 0x228   : > { %v6001_v11 = vcombine.low %v2046_v16, %v2060_v62  ;;  %v2560_v42 = vsel %vm7121_vm12, %v6029_v26, %v2559_v18  ;;  %v3560_v44 = vld [vmem:[#allocation2 + $0xd8] sm:$0xe]  ;;  %v3561_v46 = vld [vmem:[#allocation2 + $0xdc] sm:$0x1]  ;;  %v3562_v6 = vld [vmem:[#allocation2 + $0xe0] sm:$0xe] }
 0x229   : > { %v3192_v43 = vsel %vm7130_vm13, %v3187_v12, %v7857_v23  ;;  %v3201_v28 = vrot.slane %v3200_v27, 4  ;;  %v6050_v1 = vcombine.low %v2556_v57, %v2560_v42  ;;  %v3563_v9 = vld [vmem:[#allocation2 + $0xe4] sm:$0x1]  ;;  %v3556_v23 = vld [vmem:[#allocation2 + $0xc8] sm:$0xe]  ;;  %v4355_v54 = vshll.u32 %v4095_v21, 16  ;;  %v7898_v12 = vpop.permute.xlu0 %2840  ;;  %v7900_v8 = vpop.permute.xlu1 %2834 }
 0x22a   : > { %2295 = vrot.lane.b32.xlu1 %v6001_v11, %s6753_s29  ;;  %v4361_v7 = vshll.u32 %v4096_v55, 16  ;;  %v4366_v63 = vshrl.u32 %v4097_v0, 16  ;;  %v3557_v25 = vld [vmem:[#allocation2 + $0xcc] sm:$0x1]  ;;  %v4369_v37 = vshll.u32 %v4097_v0, 16  ;;  %v4375_v2 = vshll.u32 %v4098_v33, 16 }
 0x22b   : > { %v3206_v22 = vsel %vm7130_vm13, %v3201_v28, %v3205_v61  ;;  %v6110_v16 = vrot.slane %v3560_v44, 9  ;;  %v3558_v19 = vld [vmem:[#allocation2 + $0xd0] sm:$0xe]  ;;  %v4354_v49 = vrot.slane %v4352_v34, 4  ;;  %v4357_v50 = vrot.slane %v4355_v54, 5 }
 0x22c   : > { %v6080_v56 = vcombine.low %v3192_v43, %v3206_v22  ;;  %v4363_v51 = vrot.slane %v4361_v7, 5  ;;  %v3559_v4 = vld [vmem:[#allocation2 + $0xd4] sm:$0x1]  ;;  %v4368_v31 = vrot.slane %v4366_v63, 4  ;;  %v4371_v3 = vrot.slane %v4369_v37, 5 }
 0x22d   : > { %v4377_v21 = vrot.slane %v4375_v2, 5  ;;  %v3734_v55 = vrot.slane %v3561_v46, 5  ;;  %v4099_v61 = vld [vmem:[#allocation2 + $0xc0] sm:$0xf]  ;;  %v4358_v26 = vor.u32 %v4357_v50, %v4354_v49  ;;  %v6111_v32 = vrot.slane %v3562_v6, 9 }
 0x22e   : > { %3467 = vrot.lane.b32.xlu0 %v6080_v56, %s6755_s21  ;;  %2669 = vrot.lane.b32.xlu1 %v6050_v1, %s6752_s23  ;;  %v3738_v18 = vrot.slane %v3563_v9, 5  ;;  %v6108_v62 = vrot.slane %v3556_v23, 9  ;;  %v4372_v27 = vor.u32 %v4371_v3, %v4368_v31  ;;  %v3726_v0 = vrot.slane %v3557_v25, 5  ;;  %v4100_v11 = vld [vmem:[#allocation2 + $0xc4] sm:$0x1] }
 0x22f   : > { %v3735_v57 = vsel %vm7121_vm12, %v6110_v16, %v3734_v55  ;;  %v6109_v33 = vrot.slane %v3558_v19, 9  ;;  %v4101_v43 = vld [vmem:[#allocation2 + $0xc8] sm:$0xf]  ;;  %v4359_v42 = vrot.slane %v4358_v26, 4  ;;  %v3730_v46 = vrot.slane %v3559_v4, 5  ;;  %v5026_v19 = vld [vmem:[#allocation3 + $0x10] sm:$0xff] }
 0x230   : > { %v3739_v44 = vsel %vm7121_vm12, %v6111_v32, %v3738_v18  ;;  %v4102_v28 = vld [vmem:[#allocation2 + $0xcc] sm:$0x1]  ;;  %v4380_v34 = vshrl.u32 %v4099_v61, 16  ;;  %v4373_v1 = vrot.slane %v4372_v27, 4  ;;  %v3727_v6 = vsel %vm7121_vm12, %v6108_v62, %v3726_v0  ;;  %v846_v23 = vld [vmem:[#allocation2 + $0x130] sm:$0x1]  ;;  %5224 = vmatmul.mubr.bf16.vlgmr.msra.gmra.mrb[0].mxu1 %v5026_v19 }
 0x231   : > { %v6131_v54 = vcombine.low %v3735_v57, %v3739_v44  ;;  %v4383_v9 = vshll.u32 %v4099_v61, 16  ;;  %v968_v7 = vld [vmem:[#allocation2 + $0x134] sm:$0x1]  ;;  %v4364_v63 = vsel %vm7130_vm13, %v4359_v42, %v4363_v51  ;;  %v3731_v25 = vsel %vm7121_vm12, %v6109_v33, %v3730_v46  ;;  %v840_v2 = vld [vmem:[#allocation2 + $0x120] sm:$0x1]  ;;  %v7917_v51 = vpop.permute.xlu0 %4010  ;;  %v7919_v61 = vpop.permute.xlu1 %4627 }
 0x232   : > { %v4382_v22 = vrot.slane %v4380_v34, 4  ;;  %v4389_v37 = vshll.u32 %v4100_v11, 16  ;;  %v962_v16 = vld [vmem:[#allocation2 + $0x124] sm:$0x1]  ;;  %v4378_v49 = vsel %vm7130_vm13, %v4373_v1, %v4377_v21  ;;  %v6130_v50 = vcombine.low %v3727_v6, %v3731_v25  ;;  %v2386_v3 = vld [vmem:[#allocation2 + $0xd0] sm:$0xe] }
 0x233   : > { %v5024_v56 = vld [vmem:[#allocation3] sm:$0xff]  ;;  %3842 = vrot.lane.b32.xlu1 %v6131_v54, %s6751_s22  ;;  %v4385_v4 = vrot.slane %v4383_v9, 5  ;;  %v4394_v31 = vshrl.u32 %v4101_v43, 16  ;;  %v2387_v55 = vld [vmem:[#allocation2 + $0xd4] sm:$0x1]  ;;  %v6160_v26 = vcombine.low %v4364_v63, %v4378_v49  ;;  %v4397_v18 = vshll.u32 %v4101_v43, 16 }
 0x234   : > { %v4391_v32 = vrot.slane %v4389_v37, 5  ;;  %v4403_v62 = vshll.u32 %v4102_v28, 16  ;;  %5216 = vmatmul.mubr.bf16.vlgmr.msra.gmra.mrb[32].mxu0 %v5024_v56  ;;  %v693_v21 = vmax.f32 %v7828_v14, 0.0  ;;  %v847_v0 = vsel %vm6959_vm4, 0, %v846_v23  ;;  %v2388_v33 = vld [vmem:[#allocation2 + $0xd8] sm:$0xe] }
 0x235   : > { %v4386_v27 = vor.u32 %v4385_v4, %v4382_v22  ;;  %v4396_v57 = vrot.slane %v4394_v31, 4  ;;  %4639 = vrot.lane.b32.xlu0 %v6160_v26, %s6754_s19  ;;  %v4399_v11 = vrot.slane %v4397_v18, 5  ;;  %848 = vst [vmem:[#allocation2 + $0x130] sm:$0x1] %v847_v0  ;;  %v969_v44 = vsel %vm6967_vm5, 0, %v968_v7  ;;  %v7938_v49 = vpop.permute.xlu1 %3828 }
 0x236   : > { %v4405_v42 = vrot.slane %v4403_v62, 5  ;;  %v691_v43 = vmax.f32 %v7836_v47, 0.0  ;;  %v2389_v46 = vld [vmem:[#allocation2 + $0xdc] sm:$0x1]  ;;  %v1754_v28 = vld [vmem:[#allocation2 + $0xc0] sm:$0xf]  ;;  %v6299_v1 = vpack.c.bf16 %v693_v21, %v693_v21 }
 0x237   : > { %v4387_v34 = vrot.slane %v4386_v27, 4  ;;  %970 = vst [vmem:[#allocation2 + $0x134] sm:$0x1] %v969_v44  ;;  %v841_v14 = vsel %vm6959_vm4, 0, %v840_v2  ;;  %v963_v54 = vsel %vm6967_vm5, 0, %v962_v16  ;;  %v4400_v23 = vor.u32 %v4399_v11, %v4396_v57  ;;  %v7936_v2 = vpop.permute.xlu0 %3459 }
 0x238   : > { %v1755_v6 = vld [vmem:[#allocation2 + $0xc4] sm:$0x1]  ;;  %v7932_v9 = vld [vmem:[#allocation2 + $0xc8] sm:$0xf]  ;;  %842 = vst [vmem:[#allocation2 + $0x120] sm:$0x1] %v841_v14  ;;  %v6297_v7 = vpack.c.bf16 %v691_v43, %v691_v43 }
 0x239   : > { %964 = vst [vmem:[#allocation2 + $0x124] sm:$0x1] %v963_v54  ;;  %v6030_v63 = vrot.slane %v2386_v3, 9  ;;  %v2563_v47 = vrot.slane %v2387_v55, 5  ;;  %v6624_v25 = vld [vmem:[#allocation2 + $0x30] ss:$8 sps:$4 sm:$0xff]   ;;  %v4392_v22 = vsel %vm7130_vm13, %v4387_v34, %v4391_v32  ;;  %3840 = vrot.lane.b32.xlu0 %v6130_v50, %s6751_s22 }
 0x23a   : > { %v1303_v37 = vshrl.u32 %v6299_v1, 16  ;;  %v1306_v19 = vshll.u32 %v6299_v1, 16  ;;  %v6031_v56 = vrot.slane %v2388_v33, 9  ;;  %v4401_v16 = vrot.slane %v4400_v23, 4  ;;  %1701 = vst.msk [vmem:[#allocation3 + $0x30] sm:$0xff] %vm1697_vm14, %v6624_v25 }
 0x23b   : > { %v1287_v4 = vshrl.u32 %v6297_v7, 16  ;;  %v1290_v31 = vshll.u32 %v6297_v7, 16  ;;  %v2564_v3 = vsel %vm7121_vm12, %v6030_v63, %v2563_v47  ;;  %v2567_v26 = vrot.slane %v2389_v46, 5  ;;  %2329 = vst.msk [vmem:[#allocation3 + $0x30] sm:$0xff] %vm2325_vm15, %v7839_v59  ;;  %v1757_v50 = vld [vmem:[#allocation2 + $0xcc] sm:$0x1] }
 0x23c   : > { %v1305_v55 = vrot.slane %v1303_v37, 7  ;;  %v2062_v32 = vshrl.u32 %v1754_v28, 16  ;;  %v2065_v18 = vshll.u32 %v1754_v28, 16  ;;  %v4406_v62 = vsel %vm7130_vm13, %v4401_v16, %v4405_v42  ;;  %v4696_v0 = vld [vmem:[#allocation2 + $0x30] sm:$0xe]  ;;  %2701 = vst.msk [vmem:[#allocation3 + $0x30] sm:$0xff] %vm2697_vm0, %v7841_v41 }
 0x23d   : > { %v1289_v27 = vrot.slane %v1287_v4, 7  ;;  %v2071_v57 = vshll.u32 %v1755_v6, 16  ;;  %v2076_v21 = vshrl.u32 %v7932_v9, 16  ;;  %v4697_v33 = vld [vmem:[#allocation2 + $0x34] sm:$0x1]  ;;  %v6161_v11 = vcombine.low %v4392_v22, %v4406_v62  ;;  %2878 = vst.msk [vmem:[#allocation3 + $0x30] sm:$0xff] %vm2874_vm1, %v7634_v53 }
 0x23e   : > { %v1308_v44 = vor.u32 %v1306_v19, %v1305_v55  ;;  %v1309_v43 = vrot.slane %v1305_v55, 4  ;;  %v1563_v46 = vld [vmem:[#allocation2 + $0x130] sm:$0xf]  ;;  %v2568_v59 = vsel %vm7121_vm12, %v6031_v56, %v2567_v26  ;;  %v4698_v34 = vld [vmem:[#allocation2 + $0x38] sm:$0xe]  ;;  %v2064_v7 = vrot.slane %v2062_v32, 4  ;;  %v7966_v56 = vpop.permute.xlu0 %2287 }
 0x23f   : > { %v6622_v28 = vld [vmem:[#allocation2 + $0x108] ss:$8 sps:$4 sm:$0xff]   ;;  %v4699_v42 = vld [vmem:[#allocation2 + $0x3c] sm:$0x1]  ;;  %v941_v1 = vld [vmem:[#allocation2 + $0xec] sm:$0x1]  ;;  %v1292_v54 = vor.u32 %v1290_v31, %v1289_v27  ;;  %v6051_v23 = vcombine.low %v2564_v3, %v2568_v59  ;;  %4641 = vrot.lane.b32.xlu1 %v6161_v11, %s6754_s19 }
 0x240   : > { %v1566_v14 = vld [vmem:[#allocation2 + $0x134] sm:$0x1]  ;;  %v1293_v6 = vrot.slane %v1289_v27, 4  ;;  %v4107_v41 = vld [vmem:[#allocation2 + $0xe0] sm:$0xf]  ;;  %3503 = vst.msk [vmem:[#allocation3 + $0x30] sm:$0xff] %vm3499_vm2, %v7872_v30  ;;  %v1564_v63 = vsel %vm6987_vm7, %v1308_v44, %v1563_v46  ;;  %v7968_v30 = vpop.permute.xlu1 %2659 }
 0x241   : > { %v1567_v47 = vsel %vm6959_vm4, %v1309_v43, %v1566_v14  ;;  %v1551_v25 = vld [vmem:[#allocation2 + $0x120] sm:$0xf]  ;;  %v1554_v22 = vld [vmem:[#allocation2 + $0x124] sm:$0x1]  ;;  %v2067_v53 = vrot.slane %v2065_v18, 5  ;;  %v7962_v37 = vrot.slane %v2071_v57, 5  ;;  %2671 = vrot.lane.b32.xlu0 %v6051_v23, %s6752_s23 }
 0x242   : > { %v4108_v19 = vld [vmem:[#allocation2 + $0xe4] sm:$0x1]  ;;  %3872 = vst.msk [vmem:[#allocation3 + $0x30] sm:$0xff] %vm3868_vm3, %v7699_v10  ;;  %1565 = vst [vmem:[#allocation2 + $0x130] sm:$0xf] %v1564_v63  ;;  %v1552_v16 = vsel %vm6987_vm7, %v1292_v54, %v1551_v25  ;;  %v1555_v4 = vsel %vm6959_vm4, %v1293_v6, %v1554_v22  ;;  %v2078_v31 = vrot.slane %v2076_v21, 4  ;;  %v7995_v14 = vpop.permute.xlu0 %2661 }
 0x243   : > { %1568 = vst [vmem:[#allocation2 + $0x134] sm:$0x1] %v1567_v47  ;;  %v2079_v3 = vshll.u32 %v7932_v9, 16  ;;  %4050 = vst.msk [vmem:[#allocation3 + $0x30] sm:$0xff] %vm4046_vm6, %v7679_v5  ;;  %v2068_v10 = vor.u32 %v2067_v53, %v2064_v7  ;;  %v2085_v55 = vshll.u32 %v1757_v50, 16  ;;  %v6172_v26 = vrot.slane %v4696_v0, 9  ;;  %2852 = vrot.lane.b32.xlu1 %v6622_v28, %s6749_s18 }
 0x244   : > { %1553 = vst [vmem:[#allocation2 + $0x120] sm:$0xf] %v1552_v16  ;;  %1556 = vst [vmem:[#allocation2 + $0x124] sm:$0x1] %v1555_v4  ;;  %v4834_v32 = vrot.slane %v4697_v33, 5  ;;  %v6173_v62 = vrot.slane %v4698_v34, 9  ;;  %v7997_v54 = vpop.permute.xlu1 %4008 }
 0x245   : > { %v6626_v18 = vld [vmem:[#allocation2 + $0x20] ss:$8 sps:$4 sm:$0xff]   ;;  %4675 = vst.msk [vmem:[#allocation3 + $0x30] sm:$0xff] %vm4671_vm8, %v7766_v60  ;;  %v2081_v38 = vrot.slane %v2079_v3, 5  ;;  %v4838_v27 = vrot.slane %v4699_v42, 5  ;;  %v942_v57 = vsel %vm6967_vm5, 0, %v941_v1 }
 0x246   : > { %v4109_v9 = vld [vmem:[#allocation2 + $0xe8] sm:$0xf]  ;;  %v2069_v5 = vrot.slane %v2068_v10, 4  ;;  %v2087_v21 = vrot.slane %v2085_v55, 5  ;;  %v4835_v50 = vsel %vm7121_vm12, %v6172_v26, %v4834_v32  ;;  %943 = vst [vmem:[#allocation2 + $0xec] sm:$0x1] %v942_v57 }
 0x247   : > { %v4436_v0 = vshrl.u32 %v4107_v41, 16  ;;  %1700 = vst.msk [vmem:[#allocation3 + $0x20] sm:$0xff] %vm1697_vm14, %v6626_v18  ;;  %v2082_v33 = vor.u32 %v2081_v38, %v2078_v31  ;;  %v4839_v60 = vsel %vm7121_vm12, %v6173_v62, %v4838_v27  ;;  %v4439_v11 = vshll.u32 %v4107_v41, 16  ;;  %v2935_v43 = vld [vmem:[#allocation2 + $0xd8] sm:$0xf] }
 0x248   : > { %v4445_v44 = vshll.u32 %v4108_v19, 16  ;;  %v2936_v46 = vld [vmem:[#allocation2 + $0xdc] sm:$0x1]  ;;  %2328 = vst.msk [vmem:[#allocation3 + $0x20] sm:$0xff] %vm2325_vm15, %v7854_v40  ;;  %v2074_v59 = vsel %vm7130_vm13, %v2069_v5, %v7962_v37  ;;  %v6202_v28 = vcombine.low %v4835_v50, %v4839_v60  ;;  %v4450_v42 = vshrl.u32 %v4109_v9, 16  ;;  %v8015_v5 = vpop.permute.xlu1 %2285 }
 0x249   : > { %v4438_v34 = vrot.slane %v4436_v0, 4  ;;  %v2937_v1 = vld [vmem:[#allocation2 + $0xe0] sm:$0xf]  ;;  %2700 = vst.msk [vmem:[#allocation3 + $0x20] sm:$0xff] %vm2697_vm0, %v7677_v13  ;;  %v2083_v6 = vrot.slane %v2082_v33, 4  ;;  %v4441_v23 = vrot.slane %v4439_v11, 5 }
 0x24a   : > { %v4447_v7 = vrot.slane %v4445_v44, 5  ;;  %v4453_v41 = vshll.u32 %v4109_v9, 16  ;;  %2877 = vst.msk [vmem:[#allocation3 + $0x20] sm:$0xff] %vm2874_vm1, %v7744_v15  ;;  %v4452_v40 = vrot.slane %v4450_v42, 4  ;;  %v3264_v63 = vshrl.u32 %v2935_v43, 16  ;;  %v8013_v9 = vpop.permute.xlu0 %3834 }
 0x24b   : > { %5010 = vst.msk [vmem:[#allocation3 + $0x28] sm:$0xff] %vm1697_vm14, %v6202_v28  ;;  %v3267_v47 = vshll.u32 %v2935_v43, 16  ;;  %v3273_v25 = vshll.u32 %v2936_v46, 16  ;;  %v2088_v13 = vsel %vm7130_vm13, %v2083_v6, %v2087_v21  ;;  %v4442_v22 = vor.u32 %v4441_v23, %v4438_v34  ;;  %v2938_v37 = vld [vmem:[#allocation2 + $0xe4] sm:$0x1] }
 0x24c   : > { %3502 = vst.msk [vmem:[#allocation3 + $0x20] sm:$0xff] %vm3499_vm2, %v7816_v48  ;;  %v4455_v53 = vrot.slane %v4453_v41, 5  ;;  %v3278_v19 = vshrl.u32 %v2937_v1, 16  ;;  %v2931_v16 = vld [vmem:[#allocation2 + $0xc8] sm:$0xf]  ;;  %v6002_v15 = vcombine.low %v2074_v59, %v2088_v13  ;;  %v3266_v4 = vrot.slane %v3264_v63, 4 }
 0x24d   : > { %3871 = vst.msk [vmem:[#allocation3 + $0x20] sm:$0xff] %vm3868_vm3, %v7818_v17  ;;  %v3269_v31 = vrot.slane %v3267_v47, 5  ;;  %v3275_v3 = vrot.slane %v3273_v25, 5  ;;  %v2932_v10 = vld [vmem:[#allocation2 + $0xcc] sm:$0x1]  ;;  %v4443_v55 = vrot.slane %v4442_v22, 4 }
 0x24e   : > { %4049 = vst.msk [vmem:[#allocation3 + $0x20] sm:$0xff] %vm4046_vm6, %v7648_v35  ;;  %v4110_v48 = vld [vmem:[#allocation2 + $0xec] sm:$0x1]  ;;  %v4456_v26 = vor.u32 %v4455_v53, %v4452_v40  ;;  %v3280_v32 = vrot.slane %v3278_v19, 4  ;;  %v3281_v18 = vshll.u32 %v2937_v1, 16  ;;  %2297 = vrot.lane.b32.xlu0 %v6002_v15, %s6753_s29  ;;  %v3287_v62 = vshll.u32 %v2938_v37, 16  ;;  %v8024_v15 = vpop.permute.xlu0 %4633 }
 0x24f   : > { %4674 = vst.msk [vmem:[#allocation3 + $0x20] sm:$0xff] %vm4671_vm8, %v7919_v61  ;;  %v4459_v38 = vshll.u32 %v4110_v48, 16  ;;  %v3270_v17 = vor.u32 %v3269_v31, %v3266_v4  ;;  %v2933_v27 = vld [vmem:[#allocation2 + $0xd0] sm:$0xf]  ;;  %v3236_v57 = vshrl.u32 %v2931_v16, 16  ;;  %v4448_v35 = vsel %vm7130_vm13, %v4443_v55, %v4447_v7  ;;  %v8026_v4 = vpop.permute.xlu1 %4012 }
 0x250   : > { %v4457_v21 = vrot.slane %v4456_v26, 4  ;;  %v3283_v50 = vrot.slane %v3281_v18, 5  ;;  %v2934_v0 = vld [vmem:[#allocation2 + $0xd4] sm:$0x1]  ;;  %v3239_v33 = vshll.u32 %v2931_v16, 16  ;;  %v3289_v11 = vrot.slane %v3287_v62, 5 }
 0x251   : > { %v4461_v60 = vrot.slane %v4459_v38, 5  ;;  %v3271_v61 = vrot.slane %v3270_v17, 4  ;;  %v3238_v44 = vrot.slane %v3236_v57, 4  ;;  %v3245_v28 = vshll.u32 %v2932_v10, 16  ;;  %v4103_v42 = vld [vmem:[#allocation2 + $0xd0] sm:$0xf] }
 0x252   : > { %v5029_v43 = vld [vmem:[#allocation3 + $0x28] sm:$0xff]  ;;  %v3284_v46 = vor.u32 %v3283_v50, %v3280_v32  ;;  %v3241_v59 = vrot.slane %v3239_v33, 5  ;;  %v3250_v34 = vshrl.u32 %v2933_v27, 16  ;;  %v3253_v23 = vshll.u32 %v2933_v27, 16  ;;  %v4104_v41 = vld [vmem:[#allocation2 + $0xd4] sm:$0x1] }
 0x253   : > { %6228 = vmatprep.mubr.msk.bf16.mxu1 %vm1697_vm14, %v5029_v43  ;;  %v4462_v1 = vsel %vm7130_vm13, %v4457_v21, %v4461_v60  ;;  %v3276_v6 = vsel %vm7130_vm13, %v3271_v61, %v3275_v3  ;;  %v3259_v7 = vshll.u32 %v2934_v0, 16  ;;  %v3247_v25 = vrot.slane %v3245_v28, 5  ;;  %v4105_v13 = vld [vmem:[#allocation2 + $0xd8] sm:$0xf]  ;;  %v4106_v19 = vld [vmem:[#allocation2 + $0xdc] sm:$0x1] }
 0x254   : > { %v6163_v40 = vcombine.low %v4448_v35, %v4462_v1  ;;  %v3285_v63 = vrot.slane %v3284_v46, 4  ;;  %v3242_v47 = vor.u32 %v3241_v59, %v3238_v44  ;;  %v3252_v22 = vrot.slane %v3250_v34, 4  ;;  %v6623_v3 = vld [vmem:[#allocation2 + $0x100] ss:$8 sps:$4 sm:$0xff]   ;;  %v1758_v26 = vld [vmem:[#allocation2 + $0xd0] sm:$0xf] }
 0x255   : > { %v3255_v53 = vrot.slane %v3253_v23, 5  ;;  %v3261_v37 = vrot.slane %v3259_v7, 5  ;;  %v4408_v16 = vshrl.u32 %v4103_v42, 16  ;;  %v4411_v48 = vshll.u32 %v4103_v42, 16  ;;  %v1759_v27 = vld [vmem:[#allocation2 + $0xd4] sm:$0x1] }
 0x256   : > { %4645 = vrot.lane.b32.xlu1 %v6163_v40, %s6754_s19  ;;  %v3290_v31 = vsel %vm7130_vm13, %v3285_v63, %v3289_v11  ;;  %v3243_v10 = vrot.slane %v3242_v47, 4  ;;  %v4417_v55 = vshll.u32 %v4104_v41, 16  ;;  %v5028_v32 = vld [vmem:[#allocation3 + $0x20] sm:$0xff]  ;;  %v4422_v62 = vshrl.u32 %v4105_v13, 16  ;;  %v1760_v57 = vld [vmem:[#allocation2 + $0xd8] sm:$0xf] }
 0x257   : > { %v6083_v18 = vcombine.low %v3276_v6, %v3290_v31  ;;  %v3256_v38 = vor.u32 %v3255_v53, %v3252_v22  ;;  %v4410_v17 = vrot.slane %v4408_v16, 4  ;;  %5232 = vmatmul.mubr.bf16.gmra.mrb[4].mxu1 %v5028_v32  ;;  %v4413_v21 = vrot.slane %v4411_v48, 5  ;;  %v1761_v33 = vld [vmem:[#allocation2 + $0xdc] sm:$0x1]  ;;  %v6625_v60 = vld [vmem:[#allocation2 + $0xf8] ss:$8 sps:$4 sm:$0xff]  }
 0x258   : > { %v3248_v35 = vsel %vm7130_vm13, %v3243_v10, %v3247_v25  ;;  %v4419_v50 = vrot.slane %v4417_v55, 5  ;;  %v4425_v0 = vshll.u32 %v4105_v13, 16  ;;  %v4424_v11 = vrot.slane %v4422_v62, 4  ;;  %v3564_v46 = vld [vmem:[#allocation2 + $0xf8] sm:$0xe]  ;;  %v8037_v25 = vpop.permute.xlu0 %4637  ;;  %v8039_v13 = vpop.permute.xlu1 %3461 }
 0x259   : > { %3473 = vrot.lane.b32.xlu0 %v6083_v18, %s6755_s21  ;;  %v3257_v61 = vrot.slane %v3256_v38, 4  ;;  %v4431_v44 = vshll.u32 %v4106_v19, 16  ;;  %v2090_v43 = vshrl.u32 %v1758_v26, 16  ;;  %v4414_v59 = vor.u32 %v4413_v21, %v4410_v17  ;;  %v3565_v1 = vld [vmem:[#allocation2 + $0xfc] sm:$0x1] }
 0x25a   : > { %4022 = vrot.lane.b32.xlu1 %v6623_v3, %s6750_s20  ;;  %v4427_v28 = vrot.slane %v4425_v0, 5  ;;  %v2093_v34 = vshll.u32 %v1758_v26, 16  ;;  %v2099_v42 = vshll.u32 %v1759_v27, 16  ;;  %v3566_v6 = vld [vmem:[#allocation2 + $0x100] sm:$0xe]  ;;  %v2104_v40 = vshrl.u32 %v1760_v57, 16 }
 0x25b   : > { %v3262_v23 = vsel %vm7130_vm13, %v3257_v61, %v3261_v37  ;;  %v4433_v7 = vrot.slane %v4431_v44, 5  ;;  %v2092_v41 = vrot.slane %v2090_v43, 4  ;;  %v3567_v63 = vld [vmem:[#allocation2 + $0x104] sm:$0x1]  ;;  %v944_v47 = vld [vmem:[#allocation2 + $0xf4] sm:$0x1] }
 0x25c   : > { %v6082_v22 = vcombine.low %v3248_v35, %v3262_v23  ;;  %v4415_v53 = vrot.slane %v4414_v59, 4  ;;  %v4428_v19 = vor.u32 %v4427_v28, %v4424_v11  ;;  %v2095_v16 = vrot.slane %v2093_v34, 5  ;;  %v8042_v37 = vld [vmem:[#allocation2 + $0xf0] sm:$0xe]  ;;  %v2392_v55 = vld [vmem:[#allocation2 + $0xf8] sm:$0xe]  ;;  %v8053_v23 = vpop.permute.xlu0 %2842 }
 0x25d   : > { %2850 = vrot.lane.b32.xlu0 %v6625_v60, %s6749_s18  ;;  %v2101_v31 = vrot.slane %v2099_v42, 5  ;;  %v2106_v3 = vrot.slane %v2104_v40, 4  ;;  %v2107_v10 = vshll.u32 %v1760_v57, 16  ;;  %v2113_v48 = vshll.u32 %v1761_v33, 16  ;;  %v2393_v17 = vld [vmem:[#allocation2 + $0xfc] sm:$0x1] }
 0x25e   : > { %3471 = vrot.lane.b32.xlu1 %v6082_v22, %s6755_s21  ;;  %v4420_v26 = vsel %vm7130_vm13, %v4415_v53, %v4419_v50  ;;  %v4429_v32 = vrot.slane %v4428_v19, 4  ;;  %v2096_v18 = vor.u32 %v2095_v16, %v2092_v41  ;;  %v6112_v38 = vrot.slane %v3564_v46, 9  ;;  %v2394_v62 = vld [vmem:[#allocation2 + $0x100] sm:$0xe]  ;;  %v2395_v27 = vld [vmem:[#allocation2 + $0x104] sm:$0x1]  ;;  %v8055_v41 = vpop.permute.xlu1 %2838 }
 0x25f   : > { %v2109_v35 = vrot.slane %v2107_v10, 5  ;;  %v3742_v21 = vrot.slane %v3565_v1, 5  ;;  %v6113_v0 = vrot.slane %v3566_v6, 9  ;;  %v2396_v60 = vld [vmem:[#allocation2 + $0x108] sm:$0xe]  ;;  %v3746_v44 = vrot.slane %v3567_v63, 5 }
 0x260   : > { %v2397_v57 = vld [vmem:[#allocation2 + $0x10c] sm:$0x1]  ;;  %v3568_v33 = vld [vmem:[#allocation2 + $0x108] sm:$0xe]  ;;  %v4434_v61 = vsel %vm7130_vm13, %v4429_v32, %v4433_v7  ;;  %v2097_v11 = vrot.slane %v2096_v18, 4  ;;  %v945_v50 = vsel %vm6967_vm5, 0, %v944_v47 }
 0x261   : > { %v3569_v43 = vld [vmem:[#allocation2 + $0x10c] sm:$0x1]  ;;  %v3570_v59 = vld [vmem:[#allocation2 + $0x110] sm:$0xe]  ;;  %v6162_v46 = vcombine.low %v4420_v26, %v4434_v61  ;;  %v2110_v28 = vor.u32 %v2109_v35, %v2106_v3  ;;  %v2115_v34 = vrot.slane %v2113_v48, 5  ;;  %v3743_v42 = vsel %vm7121_vm12, %v6112_v38, %v3742_v21 }
 0x262   : > { %946 = vst [vmem:[#allocation2 + $0xf4] sm:$0x1] %v945_v50  ;;  %v3571_v1 = vld [vmem:[#allocation2 + $0x114] sm:$0x1]  ;;  %v822_v6 = vld [vmem:[#allocation2 + $0xf0] sm:$0x1]  ;;  %v2102_v7 = vsel %vm7130_vm13, %v2097_v11, %v2101_v31  ;;  %v3747_v40 = vsel %vm7121_vm12, %v6113_v0, %v3746_v44  ;;  %v8081_v50 = vpop.permute.xlu0 %4014 }
 0x263   : > { %v6032_v63 = vrot.slane %v8042_v37, 9  ;;  %v6033_v47 = vrot.slane %v2392_v55, 9  ;;  %v1764_v22 = vld [vmem:[#allocation2 + $0xf8] sm:$0xf]  ;;  %4643 = vrot.lane.b32.xlu0 %v6162_v46, %s6754_s19  ;;  %v2111_v53 = vrot.slane %v2110_v28, 4  ;;  %v2575_v19 = vrot.slane %v2393_v17, 5 }
 0x264   : > { %v6034_v16 = vrot.slane %v2394_v62, 9  ;;  %v2579_v3 = vrot.slane %v2395_v27, 5  ;;  %v6132_v10 = vcombine.low %v3743_v42, %v3747_v40  ;;  %v6035_v48 = vrot.slane %v2396_v60, 9  ;;  %v6629_v18 = vld [vmem:[#allocation2 + $0x60] ss:$8 sps:$4 sm:$0xff]  }
 0x265   : > { %v2583_v26 = vrot.slane %v2397_v57, 5  ;;  %v6114_v32 = vrot.slane %v3568_v33, 9  ;;  %v2116_v31 = vsel %vm7130_vm13, %v2111_v53, %v2115_v34  ;;  %v3750_v37 = vrot.slane %v3569_v43, 5  ;;  %v1765_v35 = vld [vmem:[#allocation2 + $0xfc] sm:$0x1]  ;;  %1703 = vst.msk [vmem:[#allocation3 + $0x50] sm:$0xff] %vm1697_vm14, %v6629_v18  ;;  %v8083_v43 = vpop.permute.xlu1 %4631 }
 0x266   : > { %v2580_v38 = vsel %vm7121_vm12, %v6034_v16, %v2579_v3  ;;  %v6115_v55 = vrot.slane %v3570_v59, 9  ;;  %v2939_v21 = vld [vmem:[#allocation2 + $0xf8] sm:$0xf]  ;;  %v6003_v0 = vcombine.low %v2102_v7, %v2116_v31  ;;  %v3754_v62 = vrot.slane %v3571_v1, 5  ;;  %v2940_v11 = vld [vmem:[#allocation2 + $0xfc] sm:$0x1] }
 0x267   : > { %v2584_v17 = vsel %vm7121_vm12, %v6035_v48, %v2583_v26  ;;  %v823_v27 = vsel %vm6959_vm4, 0, %v822_v6  ;;  %3844 = vrot.lane.b32.xlu0 %v6132_v10, %s6751_s22  ;;  %v2576_v60 = vsel %vm7121_vm12, %v6033_v47, %v2575_v19  ;;  %v8077_v57 = vsel %vm7121_vm12, %v6114_v32, %v3750_v37  ;;  %v2941_v44 = vld [vmem:[#allocation2 + $0x100] sm:$0xf]  ;;  %2331 = vst.msk [vmem:[#allocation3 + $0x50] sm:$0xff] %vm2325_vm15, %v7966_v56  ;;  %v2942_v47 = vld [vmem:[#allocation2 + $0x104] sm:$0x1] }
 0x268   : > { %824 = vst [vmem:[#allocation2 + $0xf0] sm:$0x1] %v823_v27  ;;  %v2132_v33 = vshrl.u32 %v1764_v22, 16  ;;  %v2135_v61 = vshll.u32 %v1764_v22, 16  ;;  %2299 = vrot.lane.b32.xlu1 %v6003_v0, %s6753_s29  ;;  %v6053_v46 = vcombine.low %v2580_v38, %v2584_v17  ;;  %v3755_v28 = vsel %vm7121_vm12, %v6115_v55, %v3754_v62  ;;  %2703 = vst.msk [vmem:[#allocation3 + $0x50] sm:$0xff] %vm2697_vm0, %v7968_v30  ;;  %v8108_v0 = vpop.permute.xlu0 %3463 }
 0x269   : > { %v2391_v59 = vld [vmem:[#allocation2 + $0xf4] sm:$0x1]  ;;  %v2141_v42 = vshll.u32 %v1765_v35, 16  ;;  %v3292_v1 = vshrl.u32 %v2939_v21, 16  ;;  %v6133_v56 = vcombine.low %v8077_v57, %v3755_v28  ;;  %2880 = vst.msk [vmem:[#allocation3 + $0x50] sm:$0xff] %vm2874_vm1, %v7742_v52  ;;  %v3295_v16 = vshll.u32 %v2939_v21, 16 }
 0x26a   : > { %v1763_v34 = vld [vmem:[#allocation2 + $0xf4] sm:$0x1]  ;;  %v2571_v6 = vrot.slane %v2391_v59, 5  ;;  %v2134_v40 = vrot.slane %v2132_v33, 4  ;;  %v2137_v22 = vrot.slane %v2135_v61, 5  ;;  %3505 = vst.msk [vmem:[#allocation3 + $0x50] sm:$0xff] %vm3499_vm2, %v8039_v13 }
 0x26b   : > { %v2127_v7 = vshll.u32 %v1763_v34, 16  ;;  %v8093_v53 = vrot.slane %v2141_v42, 5  ;;  %v3294_v19 = vrot.slane %v3292_v1, 4  ;;  %v2943_v3 = vld [vmem:[#allocation2 + $0x108] sm:$0xf]  ;;  %2675 = vrot.lane.b32.xlu0 %v6053_v46, %s6752_s23  ;;  %v3301_v48 = vshll.u32 %v2940_v11, 16 }
 0x26c   : > { %v2572_v30 = vsel %vm7121_vm12, %v6032_v63, %v2571_v6  ;;  %v3306_v26 = vshrl.u32 %v2941_v44, 16  ;;  %3874 = vst.msk [vmem:[#allocation3 + $0x50] sm:$0xff] %vm3868_vm3, %v7870_v58  ;;  %v6627_v32 = vld [vmem:[#allocation2 + $0x110] ss:$8 sps:$4 sm:$0xff]   ;;  %v2138_v18 = vor.u32 %v2137_v22, %v2134_v40  ;;  %v3297_v31 = vrot.slane %v3295_v16, 5  ;;  %v8110_v58 = vpop.permute.xlu1 %3832 }
 0x26d   : > { %v8100_v10 = vrot.slane %v2127_v7, 5  ;;  %v6052_v52 = vcombine.low %v2572_v30, %v2576_v60  ;;  %v3309_v38 = vshll.u32 %v2941_v44, 16  ;;  %v2944_v37 = vld [vmem:[#allocation2 + $0x10c] sm:$0x1]  ;;  %4052 = vst.msk [vmem:[#allocation3 + $0x50] sm:$0xff] %vm4046_vm6, %v7997_v54  ;;  %v3303_v13 = vrot.slane %v3301_v48, 5 }
 0x26e   : > { %v3308_v63 = vrot.slane %v3306_v26, 4  ;;  %v3315_v55 = vshll.u32 %v2942_v47, 16  ;;  %v2945_v35 = vld [vmem:[#allocation2 + $0x110] sm:$0xf]  ;;  %v3320_v21 = vshrl.u32 %v2943_v3, 16  ;;  %4677 = vst.msk [vmem:[#allocation3 + $0x50] sm:$0xff] %vm4671_vm8, %v8024_v15  ;;  %v3298_v27 = vor.u32 %v3297_v31, %v3294_v19 }
 0x26f   : > { %2673 = vrot.lane.b32.xlu1 %v6052_v52, %s6752_s23  ;;  %v1762_v17 = vld [vmem:[#allocation2 + $0xf0] sm:$0xf]  ;;  %v2139_v62 = vrot.slane %v2138_v18, 4  ;;  %v3311_v60 = vrot.slane %v3309_v38, 5  ;;  %v3323_v57 = vshll.u32 %v2943_v3, 16  ;;  %4024 = vrot.lane.b32.xlu0 %v6627_v32, %s6750_s20  ;;  %v3329_v1 = vshll.u32 %v2944_v37, 16  ;;  %v8120_v18 = vpop.permute.xlu0 %2291 }
 0x270   : > { %v2118_v54 = vshrl.u32 %v1762_v17, 16  ;;  %v2121_v33 = vshll.u32 %v1762_v17, 16  ;;  %v3317_v61 = vrot.slane %v3315_v55, 5  ;;  %v3322_v11 = vrot.slane %v3320_v21, 4  ;;  %v2946_v46 = vld [vmem:[#allocation2 + $0x114] sm:$0x1]  ;;  %v8122_v31 = vpop.permute.xlu1 %2663 }
 0x271   : > { %v2144_v15 = vsel %vm7130_vm13, %v2139_v62, %v8093_v53  ;;  %v3299_v44 = vrot.slane %v3298_v27, 4  ;;  %v3312_v59 = vor.u32 %v3311_v60, %v3308_v63  ;;  %v3325_v28 = vrot.slane %v3323_v57, 5  ;;  %v1766_v7 = vld [vmem:[#allocation2 + $0x100] sm:$0xf]  ;;  %v1767_v3 = vld [vmem:[#allocation2 + $0x104] sm:$0x1] }
 0x272   : > { %v2120_v34 = vrot.slane %v2118_v54, 4  ;;  %v2123_v42 = vrot.slane %v2121_v33, 5  ;;  %v3334_v6 = vshrl.u32 %v2945_v35, 16  ;;  %v6628_v40 = vld [vmem:[#allocation2 + $0x120] ss:$8 sps:$4 sm:$0xff]   ;;  %v3337_v16 = vshll.u32 %v2945_v35, 16 }
 0x273   : > { %3846 = vrot.lane.b32.xlu1 %v6133_v56, %s6751_s22  ;;  %v3304_v47 = vsel %vm7130_vm13, %v3299_v44, %v3303_v13  ;;  %v3313_v22 = vrot.slane %v3312_v59, 4  ;;  %v3326_v19 = vor.u32 %v3325_v28, %v3322_v11  ;;  %v1768_v53 = vld [vmem:[#allocation2 + $0x108] sm:$0xf]  ;;  %v3331_v48 = vrot.slane %v3329_v1, 5  ;;  %v1769_v32 = vld [vmem:[#allocation2 + $0x10c] sm:$0x1] }
 0x274   : > { %v2124_v30 = vor.u32 %v2123_v42, %v2120_v34  ;;  %v3336_v26 = vrot.slane %v3334_v6, 4  ;;  %v3343_v52 = vshll.u32 %v2946_v46, 16  ;;  %v3339_v37 = vrot.slane %v3337_v16, 5  ;;  %v4700_v63 = vld [vmem:[#allocation2 + $0x40] sm:$0xe] }
 0x275   : > { %v3318_v56 = vsel %vm7130_vm13, %v3313_v22, %v3317_v61  ;;  %v3327_v38 = vrot.slane %v3326_v19, 4  ;;  %v2146_v13 = vshrl.u32 %v1766_v7, 16  ;;  %v2149_v17 = vshll.u32 %v1766_v7, 16  ;;  %v4701_v62 = vld [vmem:[#allocation2 + $0x44] sm:$0x1] }
 0x276   : > { %v2125_v55 = vrot.slane %v2124_v30, 4  ;;  %v6084_v35 = vcombine.low %v3304_v47, %v3318_v56  ;;  %v3345_v21 = vrot.slane %v3343_v52, 5  ;;  %v4702_v27 = vld [vmem:[#allocation2 + $0x48] sm:$0xe]  ;;  %v3340_v57 = vor.u32 %v3339_v37, %v3336_v26  ;;  %v4703_v11 = vld [vmem:[#allocation2 + $0x4c] sm:$0x1]  ;;  %v8137_v30 = vpop.permute.xlu1 %2289 }
 0x277   : > { %4026 = vrot.lane.b32.xlu1 %v6628_v40, %s6750_s20  ;;  %v3332_v60 = vsel %vm7130_vm13, %v3327_v38, %v3331_v48  ;;  %v2148_v54 = vrot.slane %v2146_v13, 4  ;;  %v2155_v33 = vshll.u32 %v1767_v3, 16  ;;  %v6631_v61 = vld [vmem:[#allocation2 + $0x50] ss:$8 sps:$4 sm:$0xff]   ;;  %v2151_v59 = vrot.slane %v2149_v17, 5 }
 0x278   : > { %v2130_v44 = vsel %vm7130_vm13, %v2125_v55, %v8100_v10  ;;  %v2160_v46 = vshrl.u32 %v1768_v53, 16  ;;  %v2163_v28 = vshll.u32 %v1768_v53, 16  ;;  %v2398_v34 = vld [vmem:[#allocation2 + $0x110] sm:$0xe]  ;;  %v3341_v1 = vrot.slane %v3340_v57, 4  ;;  %1702 = vst.msk [vmem:[#allocation3 + $0x40] sm:$0xff] %vm1697_vm14, %v6631_v61  ;;  %v8135_v10 = vpop.permute.xlu0 %2665 }
 0x279   : > { %v6004_v42 = vcombine.low %v2130_v44, %v2144_v15  ;;  %v2157_v6 = vrot.slane %v2155_v33, 5  ;;  %v2169_v7 = vshll.u32 %v1769_v32, 16  ;;  %v2399_v40 = vld [vmem:[#allocation2 + $0x114] sm:$0x1]  ;;  %v2152_v47 = vor.u32 %v2151_v59, %v2148_v54  ;;  %v2400_v3 = vld [vmem:[#allocation2 + $0x118] sm:$0xe] }
 0x27a   : > { %v2162_v22 = vrot.slane %v2160_v46, 4  ;;  %v2165_v19 = vrot.slane %v2163_v28, 5  ;;  %v6174_v16 = vrot.slane %v4700_v63, 9  ;;  %2330 = vst.msk [vmem:[#allocation3 + $0x40] sm:$0xff] %vm2325_vm15, %v8015_v5  ;;  %v3346_v15 = vsel %vm7130_vm13, %v3341_v1, %v3345_v21  ;;  %v2401_v52 = vld [vmem:[#allocation2 + $0x11c] sm:$0x1] }
 0x27b   : > { %2301 = vrot.lane.b32.xlu0 %v6004_v42, %s6753_s29  ;;  %3475 = vrot.lane.b32.xlu1 %v6084_v35, %s6755_s21  ;;  %v2171_v53 = vrot.slane %v2169_v7, 5  ;;  %v4842_v48 = vrot.slane %v4701_v62, 5  ;;  %v6175_v26 = vrot.slane %v4702_v27, 9  ;;  %2702 = vst.msk [vmem:[#allocation3 + $0x40] sm:$0xff] %vm2697_vm0, %v7852_v45  ;;  %v6085_v32 = vcombine.low %v3332_v60, %v3346_v15  ;;  %v4111_v37 = vld [vmem:[#allocation2 + $0x100] sm:$0xf]  ;;  %v8170_v42 = vpop.permute.xlu1 %2844 }
 0x27c   : > { %v2153_v5 = vrot.slane %v2152_v47, 4  ;;  %v2166_v56 = vor.u32 %v2165_v19, %v2162_v22  ;;  %v4846_v38 = vrot.slane %v4703_v11, 5  ;;  %2879 = vst.msk [vmem:[#allocation3 + $0x40] sm:$0xff] %vm2874_vm1, %v7900_v8  ;;  %v4112_v13 = vld [vmem:[#allocation2 + $0x104] sm:$0x1]  ;;  %v6036_v55 = vrot.slane %v2398_v34, 9  ;;  %v8168_v34 = vpop.permute.xlu0 %3836 }
 0x27d   : > { %v4843_v63 = vsel %vm7121_vm12, %v6174_v16, %v4842_v48  ;;  %v2587_v35 = vrot.slane %v2399_v40, 5  ;;  %v6037_v21 = vrot.slane %v2400_v3, 9  ;;  %3504 = vst.msk [vmem:[#allocation3 + $0x40] sm:$0xff] %vm3499_vm2, %v7936_v2  ;;  %v4113_v17 = vld [vmem:[#allocation2 + $0x108] sm:$0xf]  ;;  %v2591_v8 = vrot.slane %v2401_v52, 5 }
 0x27e   : > { %v2158_v45 = vsel %vm7130_vm13, %v2153_v5, %v2157_v6  ;;  %v2167_v62 = vrot.slane %v2166_v56, 4  ;;  %v4847_v27 = vsel %vm7121_vm12, %v6175_v26, %v4846_v38  ;;  %3873 = vst.msk [vmem:[#allocation3 + $0x40] sm:$0xff] %vm3868_vm3, %v7938_v49  ;;  %v6630_v57 = vld [vmem:[#allocation2 + $0x118] ss:$8 sps:$4 sm:$0xff]   ;;  %v4114_v2 = vld [vmem:[#allocation2 + $0x10c] sm:$0x1] }
 0x27f   : > { %3477 = vrot.lane.b32.xlu0 %v6085_v32, %s6755_s21  ;;  %v6203_v60 = vcombine.low %v4843_v63, %v4847_v27  ;;  %v2588_v54 = vsel %vm7121_vm12, %v6036_v55, %v2587_v35  ;;  %v4464_v33 = vshrl.u32 %v4111_v37, 16  ;;  %v4467_v11 = vshll.u32 %v4111_v37, 16  ;;  %4051 = vst.msk [vmem:[#allocation3 + $0x40] sm:$0xff] %vm4046_vm6, %v7790_v39  ;;  %v4115_v46 = vld [vmem:[#allocation2 + $0x110] sm:$0xf] }
 0x280   : > { %v2172_v61 = vsel %vm7130_vm13, %v2167_v62, %v2171_v53  ;;  %v2592_v44 = vsel %vm7121_vm12, %v6037_v21, %v2591_v8  ;;  %v4473_v49 = vshll.u32 %v4112_v13, 16  ;;  %v4478_v59 = vshrl.u32 %v4113_v17, 16  ;;  %v4116_v28 = vld [vmem:[#allocation2 + $0x114] sm:$0x1]  ;;  %4676 = vst.msk [vmem:[#allocation3 + $0x40] sm:$0xff] %vm4671_vm8, %v8083_v43 }
 0x281   : > { %v6005_v1 = vcombine.low %v2158_v45, %v2172_v61  ;;  %5011 = vst.msk [vmem:[#allocation3 + $0x38] sm:$0xff] %vm1697_vm14, %v6203_v60  ;;  %v6054_v39 = vcombine.low %v2588_v54, %v2592_v44  ;;  %v4466_v6 = vrot.slane %v4464_v33, 4  ;;  %v4469_v7 = vrot.slane %v4467_v11, 5  ;;  %v4117_v40 = vld [vmem:[#allocation2 + $0x118] sm:$0xf]  ;;  %v8175_v60 = vpop.permute.xlu0 %2667 }
 0x282   : > { %v4118_v47 = vld [vmem:[#allocation2 + $0x11c] sm:$0x1]  ;;  %v4475_v22 = vrot.slane %v4473_v49, 5  ;;  %v4480_v19 = vrot.slane %v4478_v59, 4  ;;  %v4481_v16 = vshll.u32 %v4113_v17, 16  ;;  %v4487_v3 = vshll.u32 %v4114_v2, 16 }
 0x283   : > { %v4704_v15 = vld [vmem:[#allocation2 + $0x60] sm:$0xe]  ;;  %v4705_v53 = vld [vmem:[#allocation2 + $0x64] sm:$0x1]  ;;  %2303 = vrot.lane.b32.xlu1 %v6005_v1, %s6753_s29  ;;  %2854 = vrot.lane.b32.xlu0 %v6630_v57, %s6749_s18  ;;  %v4470_v43 = vor.u32 %v4469_v7, %v4466_v6  ;;  %v4492_v48 = vshrl.u32 %v4115_v46, 16  ;;  %v4495_v26 = vshll.u32 %v4115_v46, 16  ;;  %v8177_v57 = vpop.permute.xlu1 %3465 }
 0x284   : > { %v4501_v52 = vshll.u32 %v4116_v28, 16  ;;  %v4483_v32 = vrot.slane %v4481_v16, 5  ;;  %v4489_v5 = vrot.slane %v4487_v3, 5  ;;  %v4506_v56 = vshrl.u32 %v4117_v40, 16  ;;  %v4706_v37 = vld [vmem:[#allocation2 + $0x68] sm:$0xe] }
 0x285   : > { %v4509_v38 = vshll.u32 %v4117_v40, 16  ;;  %v4471_v13 = vrot.slane %v4470_v43, 4  ;;  %v4494_v63 = vrot.slane %v4492_v48, 4  ;;  %v4497_v55 = vrot.slane %v4495_v26, 5  ;;  %v4707_v21 = vld [vmem:[#allocation2 + $0x6c] sm:$0x1] }
 0x286   : > { %v4503_v35 = vrot.slane %v4501_v52, 5  ;;  %v4484_v17 = vor.u32 %v4483_v32, %v4480_v19  ;;  %v4508_v45 = vrot.slane %v4506_v56, 4  ;;  %v4515_v27 = vshll.u32 %v4118_v47, 16  ;;  %v3572_v8 = vld [vmem:[#allocation2 + $0x118] sm:$0xe]  ;;  %v5030_v7 = vld [vmem:[#allocation3 + $0x30] sm:$0xff] }
 0x287   : > { %v4511_v62 = vrot.slane %v4509_v38, 5  ;;  %2677 = vrot.lane.b32.xlu1 %v6054_v39, %s6752_s23  ;;  %v4476_v54 = vsel %vm7130_vm13, %v4471_v13, %v4475_v22  ;;  %v4498_v2 = vor.u32 %v4497_v55, %v4494_v63  ;;  %v6176_v33 = vrot.slane %v4704_v15, 9  ;;  %v3573_v61 = vld [vmem:[#allocation2 + $0x11c] sm:$0x1]  ;;  %v3574_v44 = vld [vmem:[#allocation2 + $0x120] sm:$0xe] }
 0x288   : > { %v4850_v11 = vrot.slane %v4705_v53, 5  ;;  %v5031_v49 = vld [vmem:[#allocation3 + $0x38] sm:$0xff]  ;;  %v4485_v59 = vrot.slane %v4484_v17, 4  ;;  %v4517_v28 = vrot.slane %v4515_v27, 5  ;;  %v6177_v1 = vrot.slane %v4706_v37, 9  ;;  %v8197_v17 = vpop.permute.xlu1 %4635 }
 0x289   : > { %v4512_v46 = vor.u32 %v4511_v62, %v4508_v45  ;;  %v3575_v6 = vld [vmem:[#allocation2 + $0x124] sm:$0x1]  ;;  %6229 = vmatprep.mubr.msk.bf16.mxu1 %vm1697_vm14, %v5031_v49  ;;  %v4499_v40 = vrot.slane %v4498_v2, 4  ;;  %v4854_v47 = vrot.slane %v4707_v21, 5  ;;  %v6116_v22 = vrot.slane %v3572_v8, 9  ;;  %v8195_v21 = vpop.permute.xlu0 %4016 }
 0x28a   : > { %v4851_v39 = vsel %vm7121_vm12, %v6176_v33, %v4850_v11  ;;  %v1770_v19 = vld [vmem:[#allocation2 + $0x110] sm:$0xf]  ;;  %v4490_v16 = vsel %vm7130_vm13, %v4485_v59, %v4489_v5  ;;  %5240 = vmatmul.mubr.bf16.gmra.mrb[8].mxu1 %v5030_v7  ;;  %v3758_v15 = vrot.slane %v3573_v61, 5  ;;  %v6117_v53 = vrot.slane %v3574_v44, 9  ;;  %v1771_v43 = vld [vmem:[#allocation2 + $0x114] sm:$0x1] }
 0x28b   : > { %v4513_v3 = vrot.slane %v4512_v46, 4  ;;  %v6164_v48 = vcombine.low %v4476_v54, %v4490_v16  ;;  %v4504_v26 = vsel %vm7130_vm13, %v4499_v40, %v4503_v35  ;;  %v4855_v52 = vsel %vm7121_vm12, %v6177_v1, %v4854_v47  ;;  %v1772_v56 = vld [vmem:[#allocation2 + $0x118] sm:$0xf]  ;;  %v1773_v13 = vld [vmem:[#allocation2 + $0x11c] sm:$0x1] }
 0x28c   : > { %v3762_v32 = vrot.slane %v3575_v6, 5  ;;  %v6204_v37 = vcombine.low %v4851_v39, %v4855_v52  ;;  %v3759_v5 = vsel %vm7121_vm12, %v6116_v22, %v3758_v15  ;;  %v2174_v63 = vshrl.u32 %v1770_v19, 16  ;;  %v2947_v55 = vld [vmem:[#allocation2 + $0x118] sm:$0xf]  ;;  %v2948_v8 = vld [vmem:[#allocation2 + $0x11c] sm:$0x1] }
 0x28d   : > { %v4518_v38 = vsel %vm7130_vm13, %v4513_v3, %v4517_v28  ;;  %4647 = vrot.lane.b32.xlu0 %v6164_v48, %s6754_s19  ;;  %v2177_v62 = vshll.u32 %v1770_v19, 16  ;;  %v2183_v27 = vshll.u32 %v1771_v43, 16  ;;  %v2949_v54 = vld [vmem:[#allocation2 + $0x120] sm:$0xf]  ;;  %v2188_v11 = vshrl.u32 %v1772_v56, 16 }
 0x28e   : > { %v6165_v35 = vcombine.low %v4504_v26, %v4518_v38  ;;  %v3763_v45 = vsel %vm7121_vm12, %v6117_v53, %v3762_v32  ;;  %5012 = vst.msk [vmem:[#allocation3 + $0x48] sm:$0xff] %vm1697_vm14, %v6204_v37  ;;  %v2176_v33 = vrot.slane %v2174_v63, 4  ;;  %v2191_v61 = vshll.u32 %v1772_v56, 16  ;;  %v2950_v44 = vld [vmem:[#allocation2 + $0x124] sm:$0x1]  ;;  %v8205_v56 = vpop.permute.xlu0 %2293  ;;  %v8207_v38 = vpop.permute.xlu1 %3838 }
 0x28f   : > { %v6134_v2 = vcombine.low %v3759_v5, %v3763_v45  ;;  %v6632_v49 = vld [vmem:[#allocation2 + $0x128] ss:$8 sps:$4 sm:$0xff]   ;;  %v2179_v59 = vrot.slane %v2177_v62, 5  ;;  %v2185_v46 = vrot.slane %v2183_v27, 5  ;;  %v2197_v28 = vshll.u32 %v1773_v13, 16 }
 0x290   : > { %4649 = vrot.lane.b32.xlu1 %v6165_v35, %s6754_s19  ;;  %v3348_v1 = vshrl.u32 %v2947_v55, 16  ;;  %v2402_v6 = vld [vmem:[#allocation2 + $0x120] sm:$0xe]  ;;  %v2190_v7 = vrot.slane %v2188_v11, 4  ;;  %v2193_v40 = vrot.slane %v2191_v61, 5  ;;  %v3351_v39 = vshll.u32 %v2947_v55, 16 }
 0x291   : > { %v3357_v47 = vshll.u32 %v2948_v8, 16  ;;  %v2403_v22 = vld [vmem:[#allocation2 + $0x124] sm:$0x1]  ;;  %3848 = vrot.lane.b32.xlu0 %v6134_v2, %s6751_s22  ;;  %v2180_v19 = vor.u32 %v2179_v59, %v2176_v33  ;;  %v2199_v16 = vrot.slane %v2197_v28, 5  ;;  %v3362_v15 = vshrl.u32 %v2949_v54, 16 }
 0x292   : > { %v3350_v3 = vrot.slane %v3348_v1, 4  ;;  %v2404_v53 = vld [vmem:[#allocation2 + $0x128] sm:$0xe]  ;;  %v2194_v43 = vor.u32 %v2193_v40, %v2190_v7  ;;  %v3353_v48 = vrot.slane %v3351_v39, 5  ;;  %v3365_v52 = vshll.u32 %v2949_v54, 16  ;;  %v5032_v8 = vld [vmem:[#allocation3 + $0x40] sm:$0xff] }
 0x293   : > { %v3359_v26 = vrot.slane %v3357_v47, 5  ;;  %v2405_v32 = vld [vmem:[#allocation2 + $0x12c] sm:$0x1]  ;;  %v2181_v37 = vrot.slane %v2180_v19, 4  ;;  %v3364_v5 = vrot.slane %v3362_v15, 4  ;;  %v3371_v13 = vshll.u32 %v2950_v44, 16 }
 0x294   : > { %2856 = vrot.lane.b32.xlu1 %v6632_v49, %s6749_s18  ;;  %v6038_v63 = vrot.slane %v2402_v6, 9  ;;  %v2195_v55 = vrot.slane %v2194_v43, 4  ;;  %v3354_v35 = vor.u32 %v3353_v48, %v3350_v3  ;;  %v3367_v45 = vrot.slane %v3365_v52, 5  ;;  %v1774_v27 = vld [vmem:[#allocation2 + $0x120] sm:$0xf]  ;;  %v8221_v48 = vpop.permute.xlu0 %4020  ;;  %v8223_v52 = vpop.permute.xlu1 %2848 }
 0x295   : > { %v2595_v62 = vrot.slane %v2403_v22, 5  ;;  %v5033_v2 = vld [vmem:[#allocation3 + $0x48] sm:$0xff]  ;;  %v2186_v54 = vsel %vm7130_vm13, %v2181_v37, %v2185_v46  ;;  %v3373_v33 = vrot.slane %v3371_v13, 5  ;;  %v6039_v11 = vrot.slane %v2404_v53, 9  ;;  %v1775_v59 = vld [vmem:[#allocation2 + $0x124] sm:$0x1] }
 0x296   : > { %v2599_v61 = vrot.slane %v2405_v32, 5  ;;  %6230 = vmatprep.mubr.msk.bf16.mxu1 %vm1697_vm14, %v5033_v2  ;;  %v2200_v44 = vsel %vm7130_vm13, %v2195_v55, %v2199_v16  ;;  %v3355_v49 = vrot.slane %v3354_v35, 4  ;;  %v3368_v28 = vor.u32 %v3367_v45, %v3364_v5  ;;  %v1776_v6 = vld [vmem:[#allocation2 + $0x128] sm:$0xf]  ;;  %v1777_v46 = vld [vmem:[#allocation2 + $0x12c] sm:$0x1] }
 0x297   : > { %v2596_v1 = vsel %vm7121_vm12, %v6038_v63, %v2595_v62  ;;  %v6006_v7 = vcombine.low %v2186_v54, %v2200_v44  ;;  %v2202_v39 = vshrl.u32 %v1774_v27, 16  ;;  %v2205_v47 = vshll.u32 %v1774_v27, 16  ;;  %v4119_v22 = vld [vmem:[#allocation2 + $0x120] sm:$0xf]  ;;  %5248 = vmatmul.mubr.bf16.gmra.mrb[12].mxu1 %v5032_v8  ;;  %v4120_v53 = vld [vmem:[#allocation2 + $0x124] sm:$0x1] }
 0x298   : > { %v2600_v40 = vsel %vm7121_vm12, %v6039_v11, %v2599_v61  ;;  %v3360_v19 = vsel %vm7130_vm13, %v3355_v49, %v3359_v26  ;;  %v3369_v3 = vrot.slane %v3368_v28, 4  ;;  %v2211_v15 = vshll.u32 %v1775_v59, 16  ;;  %v4121_v43 = vld [vmem:[#allocation2 + $0x128] sm:$0xf]  ;;  %v4122_v63 = vld [vmem:[#allocation2 + $0x12c] sm:$0x1] }
 0x299   : > { %v6055_v16 = vcombine.low %v2596_v1, %v2600_v40  ;;  %2305 = vrot.lane.b32.xlu0 %v6006_v7, %s6753_s29  ;;  %v2204_v32 = vrot.slane %v2202_v39, 4  ;;  %v2207_v37 = vrot.slane %v2205_v47, 5  ;;  %v2216_v5 = vshrl.u32 %v1776_v6, 16  ;;  %v3576_v62 = vld [vmem:[#allocation2 + $0x128] sm:$0xe] }
 0x29a   : > { %v2219_v13 = vshll.u32 %v1776_v6, 16  ;;  %v3374_v55 = vsel %vm7130_vm13, %v3369_v3, %v3373_v33  ;;  %v2213_v26 = vrot.slane %v2211_v15, 5  ;;  %v2225_v35 = vshll.u32 %v1777_v46, 16  ;;  %v3577_v11 = vld [vmem:[#allocation2 + $0x12c] sm:$0x1] }
 0x29b   : > { %v4520_v45 = vshrl.u32 %v4119_v22, 16  ;;  %v6086_v27 = vcombine.low %v3360_v19, %v3374_v55  ;;  %v2208_v8 = vor.u32 %v2207_v37, %v2204_v32  ;;  %v2218_v2 = vrot.slane %v2216_v5, 4  ;;  %v3578_v61 = vld [vmem:[#allocation2 + $0x130] sm:$0xe]  ;;  %v3579_v1 = vld [vmem:[#allocation2 + $0x134] sm:$0x1]  ;;  %v8230_v32 = vpop.permute.xlu0 %3469  ;;  %v8232_v37 = vpop.permute.xlu1 %4018 }
 0x29c   : > { %v2221_v54 = vrot.slane %v2219_v13, 5  ;;  %v2227_v59 = vrot.slane %v2225_v35, 5  ;;  %v4523_v49 = vshll.u32 %v4119_v22, 16  ;;  %v4529_v28 = vshll.u32 %v4120_v53, 16  ;;  %v2951_v6 = vld [vmem:[#allocation2 + $0x128] sm:$0xf] }
 0x29d   : > { %v4522_v44 = vrot.slane %v4520_v45, 4  ;;  %3479 = vrot.lane.b32.xlu1 %v6086_v27, %s6755_s21  ;;  %2679 = vrot.lane.b32.xlu0 %v6055_v16, %s6752_s23  ;;  %v2209_v33 = vrot.slane %v2208_v8, 4  ;;  %v4534_v40 = vshrl.u32 %v4121_v43, 16  ;;  %v4537_v46 = vshll.u32 %v4121_v43, 16  ;;  %v2952_v15 = vld [vmem:[#allocation2 + $0x12c] sm:$0x1] }
 0x29e   : > { %v2222_v7 = vor.u32 %v2221_v54, %v2218_v2  ;;  %v4525_v39 = vrot.slane %v4523_v49, 5  ;;  %v4531_v47 = vrot.slane %v4529_v28, 5  ;;  %v4543_v19 = vshll.u32 %v4122_v63, 16  ;;  %v2953_v16 = vld [vmem:[#allocation2 + $0x130] sm:$0xf] }
 0x29f   : > { %v6118_v3 = vrot.slane %v3576_v62, 9  ;;  %v2214_v22 = vsel %vm7130_vm13, %v2209_v33, %v2213_v26  ;;  %v4536_v5 = vrot.slane %v4534_v40, 4  ;;  %v4539_v13 = vrot.slane %v4537_v46, 5  ;;  %v6633_v55 = vld [vmem:[#allocation2 + $0x80] ss:$8 sps:$4 sm:$0xff]  }
 0x2a0   : > { %v2223_v53 = vrot.slane %v2222_v7, 4  ;;  %v4526_v35 = vor.u32 %v4525_v39, %v4522_v44  ;;  %v4545_v45 = vrot.slane %v4543_v19, 5  ;;  %v3766_v43 = vrot.slane %v3577_v11, 5  ;;  %v2954_v2 = vld [vmem:[#allocation2 + $0x134] sm:$0x1]  ;;  %1705 = vst.msk [vmem:[#allocation3 + $0x70] sm:$0xff] %vm1697_vm14, %v6633_v55 }
 0x2a1   : > { %v6119_v27 = vrot.slane %v3578_v61, 9  ;;  %v4540_v62 = vor.u32 %v4539_v13, %v4536_v5  ;;  %v3770_v8 = vrot.slane %v3579_v1, 5  ;;  %v3376_v54 = vshrl.u32 %v2951_v6, 16  ;;  %v849_v49 = vld [vmem:[#allocation2 + $0x138] sm:$0x1]  ;;  %2333 = vst.msk [vmem:[#allocation3 + $0x70] sm:$0xff] %vm2325_vm15, %v8120_v18  ;;  %v8252_v5 = vpop.permute.xlu0 %2846 }
 0x2a2   : > { %v2228_v63 = vsel %vm7130_vm13, %v2223_v53, %v2227_v59  ;;  %v4527_v28 = vrot.slane %v4526_v35, 4  ;;  %v3767_v33 = vsel %vm7121_vm12, %v6118_v3, %v3766_v43  ;;  %v3379_v7 = vshll.u32 %v2951_v6, 16  ;;  %v971_v44 = vld [vmem:[#allocation2 + $0x13c] sm:$0x1]  ;;  %v4123_v40 = vld [vmem:[#allocation2 + $0x130] sm:$0xf] }
 0x2a3   : > { %v6007_v26 = vcombine.low %v2214_v22, %v2228_v63  ;;  %v4541_v11 = vrot.slane %v4540_v62, 4  ;;  %v3771_v61 = vsel %vm7121_vm12, %v6119_v27, %v3770_v8  ;;  %v3378_v59 = vrot.slane %v3376_v54, 4  ;;  %2705 = vst.msk [vmem:[#allocation3 + $0x70] sm:$0xff] %vm2697_vm0, %v8122_v31  ;;  %v4708_v46 = vld [vmem:[#allocation2 + $0x70] sm:$0xe] }
 0x2a4   : > { %v3385_v1 = vshll.u32 %v2952_v15, 16  ;;  %v4532_v6 = vsel %vm7130_vm13, %v4527_v28, %v4531_v47  ;;  %v6135_v39 = vcombine.low %v3767_v33, %v3771_v61  ;;  %v3381_v19 = vrot.slane %v3379_v7, 5  ;;  %2882 = vst.msk [vmem:[#allocation3 + $0x70] sm:$0xff] %vm2874_vm1, %v7898_v12  ;;  %v4709_v18 = vld [vmem:[#allocation2 + $0x74] sm:$0x1]  ;;  %v8254_v15 = vpop.permute.xlu1 %2295 }
 0x2a5   : > { %2307 = vrot.lane.b32.xlu1 %v6007_v26, %s6753_s29  ;;  %v3390_v3 = vshrl.u32 %v2953_v16, 16  ;;  %v4710_v22 = vld [vmem:[#allocation2 + $0x78] sm:$0xe]  ;;  %v4546_v31 = vsel %vm7130_vm13, %v4541_v11, %v4545_v45  ;;  %v3393_v55 = vshll.u32 %v2953_v16, 16  ;;  %v3399_v47 = vshll.u32 %v2954_v2, 16  ;;  %3507 = vst.msk [vmem:[#allocation3 + $0x70] sm:$0xff] %vm3499_vm2, %v8177_v57 }
 0x2a6   : > { %v6635_v53 = vld [vmem:[#allocation2 + $0x70] ss:$8 sps:$4 sm:$0xff]   ;;  %v8258_v13 = vrot.slane %v3385_v1, 5  ;;  %v8260_v35 = vld [vmem:[#allocation2 + $0x134] sm:$0x1]  ;;  %v6166_v12 = vcombine.low %v4532_v6, %v4546_v31  ;;  %v3382_v27 = vor.u32 %v3381_v19, %v3378_v59  ;;  %v850_v62 = vsel %vm6959_vm4, 0, %v849_v49 }
 0x2a7   : > { %v4711_v43 = vld [vmem:[#allocation2 + $0x7c] sm:$0x1]  ;;  %v3392_v63 = vrot.slane %v3390_v3, 4  ;;  %1704 = vst.msk [vmem:[#allocation3 + $0x60] sm:$0xff] %vm1697_vm14, %v6635_v53  ;;  %v4712_v8 = vld [vmem:[#allocation2 + $0x80] sm:$0xe] }
 0x2a8   : > { %v4713_v45 = vld [vmem:[#allocation2 + $0x84] sm:$0x1]  ;;  %3876 = vst.msk [vmem:[#allocation3 + $0x70] sm:$0xff] %vm3868_vm3, %v8013_v9  ;;  %v3395_v16 = vrot.slane %v3393_v55, 5  ;;  %851 = vst [vmem:[#allocation2 + $0x138] sm:$0x1] %v850_v62  ;;  %4651 = vrot.lane.b32.xlu0 %v6166_v12, %s6754_s19  ;;  %v8289_v61 = vpop.permute.xlu1 %2669 }
 0x2a9   : > { %v972_v2 = vsel %vm6967_vm5, 0, %v971_v44  ;;  %v4548_v54 = vshrl.u32 %v4123_v40, 16  ;;  %2332 = vst.msk [vmem:[#allocation3 + $0x60] sm:$0xff] %vm2325_vm15, %v8137_v30  ;;  %v4714_v57 = vld [vmem:[#allocation2 + $0x88] sm:$0xe]  ;;  %3850 = vrot.lane.b32.xlu1 %v6135_v39, %s6751_s22  ;;  %v3383_v20 = vrot.slane %v3382_v27, 4 }
 0x2aa   : > { %v4715_v26 = vld [vmem:[#allocation2 + $0x8c] sm:$0x1]  ;;  %4054 = vst.msk [vmem:[#allocation3 + $0x70] sm:$0xff] %vm4046_vm6, %v8026_v4  ;;  %v3401_v9 = vrot.slane %v3399_v47, 5  ;;  %973 = vst [vmem:[#allocation2 + $0x13c] sm:$0x1] %v972_v2  ;;  %v3396_v24 = vor.u32 %v3395_v16, %v3392_v63 }
 0x2ab   : > { %v4551_v49 = vshll.u32 %v4123_v40, 16  ;;  %v6178_v28 = vrot.slane %v4708_v46, 9  ;;  %2704 = vst.msk [vmem:[#allocation3 + $0x60] sm:$0xff] %vm2697_vm0, %v7995_v14  ;;  %v4550_v30 = vrot.slane %v4548_v54, 4  ;;  %v4858_v33 = vrot.slane %v4709_v18, 5  ;;  %s6756_s22 = smov [#allocation7]  }
 0x2ac   : > { %4679 = vst.msk [vmem:[#allocation3 + $0x70] sm:$0xff] %vm4671_vm8, %v8037_v25  ;;  %v6179_v7 = vrot.slane %v4710_v22, 9  ;;  %v3388_v4 = vsel %vm7130_vm13, %v3383_v20, %v8258_v13  ;;  %v4557_v40 = vshll.u32 %v8260_v35, 16  ;;  %v4862_v11 = vrot.slane %v4711_v43, 5  ;;  %v6636_v14 = vld [vmem:[#allocation2 + $0xa0] ss:$8 sps:$4 sm:$0xff]   ;;  %v3468_v25 = vpop.permute.xlu0 %3467  ;;  %v8321_v54 = vpop.permute.xlu1 %3842 }
 0x2ad   : > { %2881 = vst.msk [vmem:[#allocation3 + $0x60] sm:$0xff] %vm2874_vm1, %v8055_v41  ;;  %v4553_v44 = vrot.slane %v4551_v49, 5  ;;  %v3397_v59 = vrot.slane %v3396_v24, 4  ;;  %v4859_v1 = vsel %vm7121_vm12, %v6178_v28, %v4858_v33  ;;  %v6180_v41 = vrot.slane %v4712_v8, 9  ;;  %v4716_v6 = vld [vmem:[#allocation2 + $0x90] sm:$0xe] }
 0x2ae   : > { %3506 = vst.msk [vmem:[#allocation3 + $0x60] sm:$0xff] %vm3499_vm2, %v8108_v0  ;;  %v4866_v46 = vrot.slane %v4713_v45, 5  ;;  %v4863_v19 = vsel %vm7121_vm12, %v6179_v7, %v4862_v11  ;;  %v6181_v0 = vrot.slane %v4714_v57, 9  ;;  %v4870_v3 = vrot.slane %v4715_v26, 5  ;;  %v4717_v18 = vld [vmem:[#allocation2 + $0x94] sm:$0x1] }
 0x2af   : > { %3875 = vst.msk [vmem:[#allocation3 + $0x60] sm:$0xff] %vm3868_vm3, %v8110_v58  ;;  %v4554_v39 = vor.u32 %v4553_v44, %v4550_v30  ;;  %v4718_v22 = vld [vmem:[#allocation2 + $0x98] sm:$0xe]  ;;  %v3402_v53 = vsel %vm7130_vm13, %v3397_v59, %v3401_v9  ;;  %v6205_v58 = vcombine.low %v4859_v1, %v4863_v19  ;;  %v6182_v13 = vrot.slane %v4716_v6, 9  ;;  %v4721_v28 = vld [vmem:[#allocation2 + $0xb4] sm:$0x1] }
 0x2b0   : > { %4053 = vst.msk [vmem:[#allocation3 + $0x60] sm:$0xff] %vm4046_vm6, %v7917_v51  ;;  %v4867_v31 = vsel %vm7121_vm12, %v6180_v41, %v4866_v46  ;;  %v4719_v51 = vld [vmem:[#allocation2 + $0x9c] sm:$0x1]  ;;  %v6087_v55 = vcombine.low %v3388_v4, %v3402_v53  ;;  %v4125_v47 = vld [vmem:[#allocation2 + $0x138] sm:$0xf]  ;;  %v8308_v35 = vrot.slane %v4557_v40, 5  ;;  %v4871_v43 = vsel %vm7121_vm12, %v6181_v0, %v4870_v3 }
 0x2b1   : > { %1706 = vst.msk [vmem:[#allocation3 + $0x80] sm:$0xff] %vm1697_vm14, %v6636_v14  ;;  %v4874_v12 = vrot.slane %v4717_v18, 5  ;;  %v4126_v27 = vld [vmem:[#allocation2 + $0x13c] sm:$0x1]  ;;  %v8314_v63 = vrot.slane %v4554_v39, 4  ;;  %v4565_v62 = vshll.u32 %v4125_v47, 16  ;;  %v4642_v3 = vpop.permute.xlu1 %4641 }
 0x2b2   : > { %4678 = vst.msk [vmem:[#allocation3 + $0x60] sm:$0xff] %vm4671_vm8, %v8197_v17  ;;  %v4562_v17 = vshrl.u32 %v4125_v47, 16  ;;  %3481 = vrot.lane.b32.xlu0 %v6087_v55, %s6755_s21  ;;  %v4571_v8 = vshll.u32 %v4126_v27, 16  ;;  %v6634_v45 = vld [vmem:[#allocation2 + $0x130] ss:$8 sps:$4 sm:$0xff]   ;;  %v6183_v16 = vrot.slane %v4718_v22, 9 }
 0x2b3   : > { %2334 = vst.msk [vmem:[#allocation3 + $0x80] sm:$0xff] %vm2325_vm15, %v8205_v56  ;;  %v6206_v56 = vcombine.low %v4867_v31, %v4871_v43  ;;  %v6637_v2 = vld [vmem:[#allocation2 + $0xb0] ss:$8 sps:$4 sm:$0xff]   ;;  %v4567_v26 = vrot.slane %v4565_v62, 5  ;;  %v4875_v20 = vsel %vm7121_vm12, %v6182_v13, %v4874_v12  ;;  %v4878_v9 = vrot.slane %v4719_v51, 5  ;;  %v6644_v39 = vld [vmem:[%s8705_s5] sm:$0xff]  }
 0x2b4   : > { %2706 = vst.msk [vmem:[#allocation3 + $0x80] sm:$0xff] %vm2697_vm0, %v8135_v10  ;;  %v4640_v10 = vpop.permute.xlu0 %4639  ;;  %v4564_v57 = vrot.slane %v4562_v17, 4  ;;  %v4573_v49 = vrot.slane %v4571_v8, 5  ;;  %v4722_v24 = vld [vmem:[#allocation2 + $0xb8] sm:$0xe]  ;;  %v4882_v44 = vrot.slane %v4721_v28, 5  ;;  %v4560_v11 = vsel %vm7130_vm13, %v8314_v63, %v8308_v35  ;;  %6458 = vmatprep.subr.bf16.mxu0 %v6644_v39 }
 0x2b5   : > { %5013 = vst.msk [vmem:[#allocation3 + $0x58] sm:$0xff] %vm1697_vm14, %v6205_v58  ;;  %5014 = vst.msk [vmem:[#allocation3 + $0x68] sm:$0xff] %vm1697_vm14, %v6206_v56  ;;  %v4879_v7 = vsel %vm7121_vm12, %v6183_v16, %v4878_v9  ;;  %v4723_v4 = vld [vmem:[#allocation2 + $0xbc] sm:$0x1]  ;;  %v6185_v40 = vrot.slane %v4722_v24, 9  ;;  %v5034_v0 = vld [vmem:[#allocation3 + $0x50] sm:$0xff]  ;;  %6459 = vmatpush3.bf16.msra.mxu0 %v6644_v39 }
 0x2b6   : > { %2883 = vst.msk [vmem:[#allocation3 + $0x80] sm:$0xff] %vm2874_vm1, %v8053_v23  ;;  %v4720_v23 = vld [vmem:[#allocation2 + $0xb0] sm:$0xe]  ;;  %v4568_v33 = vor.u32 %v4567_v26, %v4564_v57  ;;  %4028 = vrot.lane.b32.xlu0 %v6634_v45, %s6750_s20  ;;  %v4886_v14 = vrot.slane %v4723_v4, 5  ;;  %v4727_v41 = vld [vmem:[#allocation2 + $0xcc] sm:$0x1] }
 0x2b7   : > { %3508 = vst.msk [vmem:[#allocation3 + $0x80] sm:$0xff] %vm3499_vm2, %v3468_v25  ;;  %v6184_v30 = vrot.slane %v4720_v23, 9  ;;  %v4725_v25 = vld [vmem:[#allocation2 + $0xc4] sm:$0x1]  ;;  %v4894_v22 = vrot.slane %v4727_v41, 5  ;;  %vm5776_vm4 = vcmask 519168  }
 0x2b8   : > { %3877 = vst.msk [vmem:[#allocation3 + $0x80] sm:$0xff] %vm3868_vm3, %v8168_v34  ;;  %v4724_v34 = vld [vmem:[#allocation2 + $0xc0] sm:$0xe]  ;;  %v4569_v59 = vrot.slane %v4568_v33, 4  ;;  %v4890_v6 = vrot.slane %v4725_v25, 5  ;;  %s6681_s20 = sshll.u32 %s6756_s22, 4  ;;  %s6682_s20 = int_to_ptr.vmem [resolvable:$false] %s6681_s20 }
 0x2b9   : > { %1707 = vst.msk [vmem:[#allocation3 + $0x90] sm:$0xff] %vm1697_vm14, %v6637_v2  ;;  %v4883_v1 = vsel %vm7121_vm12, %v6184_v30, %v4882_v44  ;;  %v6186_v46 = vrot.slane %v4724_v34, 9  ;;  %v6638_v31 = vld [vmem:[#allocation2 + $0xc0] ss:$8 sps:$4 sm:$0xff]   ;;  %v4728_v51 = vld [vmem:[#allocation2 + $0xd0] sm:$0xe] }
 0x2ba   : > { %4055 = vst.msk [vmem:[#allocation3 + $0x80] sm:$0xff] %vm4046_vm6, %v8081_v50  ;;  %v6207_v50 = vcombine.low %v4875_v20, %v4879_v7  ;;  %v4574_v53 = vsel %vm7130_vm13, %v4569_v59, %v4573_v49  ;;  %v4729_v47 = vld [vmem:[#allocation2 + $0xd4] sm:$0x1]  ;;  %v4730_v35 = vld [vmem:[#allocation2 + $0xd8] sm:$0xe]  ;;  %v6188_v43 = vrot.slane %v4728_v51, 9 }
 0x2bb   : > { %2335 = vst.msk [vmem:[#allocation3 + $0x90] sm:$0xff] %vm2325_vm15, %v8254_v15  ;;  %v4726_v15 = vld [vmem:[#allocation2 + $0xc8] sm:$0xe]  ;;  %v6167_v13 = vcombine.low %v4560_v11, %v4574_v53  ;;  %v4731_v12 = vld [vmem:[#allocation2 + $0xdc] sm:$0x1]  ;;  %v4898_v27 = vrot.slane %v4729_v47, 5 }
 0x2bc   : > { %4680 = vst.msk [vmem:[#allocation3 + $0x80] sm:$0xff] %vm4671_vm8, %v4640_v10  ;;  %v5035_v19 = vld [vmem:[#allocation3 + $0x58] sm:$0xff]  ;;  %v6187_v18 = vrot.slane %v4726_v15, 9  ;;  %v5037_v55 = vld [vmem:[#allocation3 + $0x68] sm:$0xff]  ;;  %v6189_v63 = vrot.slane %v4730_v35, 9  ;;  %v5036_v9 = vld [vmem:[#allocation3 + $0x60] sm:$0xff] }
 0x2bd   : > { %2707 = vst.msk [vmem:[#allocation3 + $0x90] sm:$0xff] %vm2697_vm0, %v8175_v60  ;;  %v8355_v60 = vpop.permute.xlu0 %3840  ;;  %6231 = vmatprep.mubr.msk.bf16.mxu1 %vm1697_vm14, %v5035_v19  ;;  %4653 = vrot.lane.b32.xlu1 %v6167_v13, %s6754_s19  ;;  %v6639_v17 = vld [vmem:[#allocation2 + $0xd0] ss:$8 sps:$4 sm:$0xff]   ;;  %v4899_v62 = vsel %vm7121_vm12, %v6188_v43, %v4898_v27  ;;  %v4732_v56 = vld [vmem:[#allocation2 + $0xe0] sm:$0xe]  ;;  %s6683_s23 = scalar_lea.vmem %s6682_s20, 4096 }
 0x2be   : > { %2884 = vst.msk [vmem:[#allocation3 + $0x90] sm:$0xff] %vm2874_vm1, %v8170_v42  ;;  %v4887_v42 = vsel %vm7121_vm12, %v6185_v40, %v4886_v14  ;;  %5256 = vmatmul.mubr.bf16.gmra.mrb[16].mxu1 %v5034_v0  ;;  %v4895_v36 = vsel %vm7121_vm12, %v6187_v18, %v4894_v22  ;;  %v4733_v8 = vld [vmem:[#allocation2 + $0xe4] sm:$0x1]  ;;  %v4734_v45 = vld [vmem:[#allocation2 + $0xe8] sm:$0xe]  ;;  %v6190_v57 = vrot.slane %v4732_v56, 9 }
 0x2bf   : > { %5015 = vst.msk [vmem:[#allocation3 + $0x78] sm:$0xff] %vm1697_vm14, %v6207_v50  ;;  %v6208_v58 = vcombine.low %v4883_v1, %v4887_v42  ;;  %6232 = vmatprep.mubr.msk.bf16.mxu1 %vm1697_vm14, %v5037_v55  ;;  %1708 = vst.msk [vmem:[#allocation3 + $0xa0] sm:$0xff] %vm1697_vm14, %v6638_v31  ;;  %v4735_v10 = vld [vmem:[#allocation2 + $0xec] sm:$0x1]  ;;  %v4906_v26 = vrot.slane %v4733_v8, 5  ;;  %v6191_v20 = vrot.slane %v4734_v45, 9 }
 0x2c0   : > { %3509 = vst.msk [vmem:[#allocation3 + $0x90] sm:$0xff] %vm3499_vm2, %v8230_v32  ;;  %v4891_v32 = vsel %vm7121_vm12, %v6186_v46, %v4890_v6  ;;  %v4910_v49 = vrot.slane %v4735_v10, 5  ;;  %v6640_v24 = vld [vmem:[#allocation2 + $0xf0] ss:$8 sps:$4 sm:$0xff]   ;;  %v4736_v30 = vld [vmem:[#allocation2 + $0x100] sm:$0xe]  ;;  %v8393_v6 = vpop.permute.xlu1 %2852 }
 0x2c1   : > { %3878 = vst.msk [vmem:[#allocation3 + $0x90] sm:$0xff] %vm3868_vm3, %v8207_v38  ;;  %v6209_v38 = vcombine.low %v4891_v32, %v4895_v36  ;;  %v8376_v16 = vpop.permute.xlu0 %2671  ;;  %v4907_v28 = vsel %vm7121_vm12, %v6190_v57, %v4906_v26  ;;  %v4737_v33 = vld [vmem:[#allocation2 + $0x104] sm:$0x1]  ;;  %v4738_v4 = vld [vmem:[#allocation2 + $0x108] sm:$0xe]  ;;  %v6192_v40 = vrot.slane %v4736_v30, 9 }
 0x2c2   : > { %4056 = vst.msk [vmem:[#allocation3 + $0x90] sm:$0xff] %vm4046_vm6, %v8195_v21  ;;  %v4902_v21 = vrot.slane %v4731_v12, 5  ;;  %v4911_v7 = vsel %vm7121_vm12, %v6191_v20, %v4910_v49  ;;  %v4739_v44 = vld [vmem:[#allocation2 + $0x10c] sm:$0x1]  ;;  %v4914_v34 = vrot.slane %v4737_v33, 5  ;;  %v6193_v14 = vrot.slane %v4738_v4, 9 }
 0x2c3   : > { %5016 = vst.msk [vmem:[#allocation3 + $0x88] sm:$0xff] %vm1697_vm14, %v6208_v58  ;;  %5017 = vst.msk [vmem:[#allocation3 + $0x98] sm:$0xff] %vm1697_vm14, %v6209_v38  ;;  %v6211_v50 = vcombine.low %v4907_v28, %v4911_v7  ;;  %v4918_v25 = vrot.slane %v4739_v44, 5  ;;  %v6641_v59 = vld [vmem:[#allocation2 + $0x100] ss:$8 sps:$4 sm:$0xff]   ;;  %v5038_v32 = vld [vmem:[#allocation3 + $0x70] sm:$0xff] }
 0x2c4   : > { %4681 = vst.msk [vmem:[#allocation3 + $0x90] sm:$0xff] %vm4671_vm8, %v4642_v3  ;;  %v4903_v2 = vsel %vm7121_vm12, %v6189_v63, %v4902_v21  ;;  %v4915_v15 = vsel %vm7121_vm12, %v6192_v40, %v4914_v34  ;;  %v6642_v46 = vld [vmem:[#allocation2 + $0x110] ss:$8 sps:$4 sm:$0xff]   ;;  %v4741_v0 = vld [vmem:[#allocation2 + $0x114] sm:$0x1]  ;;  %v5040_v49 = vld [vmem:[#allocation3 + $0x80] sm:$0xff] }
 0x2c5   : > { %1709 = vst.msk [vmem:[#allocation3 + $0xb0] sm:$0xff] %vm1697_vm14, %v6639_v17  ;;  %v6210_v23 = vcombine.low %v4899_v62, %v4903_v2  ;;  %1710 = vst.msk [vmem:[#allocation3 + $0xc0] sm:$0xff] %vm1697_vm14, %v6640_v24  ;;  %v2298_v1 = vpop.permute.xlu0 %2297  ;;  %v4919_v41 = vsel %vm7121_vm12, %v6193_v14, %v4918_v25  ;;  %v4740_v19 = vld [vmem:[#allocation2 + $0x110] sm:$0xe]  ;;  %v4742_v42 = vld [vmem:[#allocation2 + $0x118] sm:$0xe] }
 0x2c6   : > { %5264 = vmatmul.mubr.bf16.gmra.mrb[20].mxu1 %v5036_v9  ;;  %v5039_v11 = vld [vmem:[#allocation3 + $0x78] sm:$0xff]  ;;  %5019 = vst.msk [vmem:[#allocation3 + $0xb8] sm:$0xff] %vm1697_vm14, %v6211_v50  ;;  %v6212_v39 = vcombine.low %v4915_v15, %v4919_v41  ;;  %1711 = vst.msk [vmem:[#allocation3 + $0xd0] sm:$0xff] %vm1697_vm14, %v6641_v59  ;;  %v6194_v18 = vrot.slane %v4740_v19, 9  ;;  %v4922_v22 = vrot.slane %v4741_v0, 5  ;;  %v6195_v53 = vrot.slane %v4742_v42, 9 }
 0x2c7   : > { %5018 = vst.msk [vmem:[#allocation3 + $0xa8] sm:$0xff] %vm1697_vm14, %v6210_v23  ;;  %6233 = vmatprep.mubr.msk.bf16.mxu1 %vm1697_vm14, %v5039_v11  ;;  %1712 = vst.msk [vmem:[#allocation3 + $0xe0] sm:$0xff] %vm1697_vm14, %v6642_v46  ;;  %v4743_v3 = vld [vmem:[#allocation2 + $0x11c] sm:$0x1]  ;;  %v6643_v51 = vld [vmem:[#allocation2 + $0x120] ss:$8 sps:$4 sm:$0xff]  }
 0x2c8   : > { %2336 = vst.msk [vmem:[#allocation3 + $0xa0] sm:$0xff] %vm2325_vm15, %v2298_v1  ;;  %v4926_v58 = vrot.slane %v4743_v3, 5  ;;  %v4923_v31 = vsel %vm7121_vm12, %v6194_v18, %v4922_v22  ;;  %v4744_v13 = vld [vmem:[#allocation2 + $0x120] sm:$0xe]  ;;  %v4745_v55 = vld [vmem:[#allocation2 + $0x124] sm:$0x1]  ;;  %v4646_v63 = vpop.permute.xlu1 %4645 }
 0x2c9   : > { %2708 = vst.msk [vmem:[#allocation3 + $0xa0] sm:$0xff] %vm2697_vm0, %v8289_v61  ;;  %v4746_v36 = vld [vmem:[#allocation2 + $0x128] sm:$0xe]  ;;  %v4747_v47 = vld [vmem:[#allocation2 + $0x12c] sm:$0x1]  ;;  %v4930_v38 = vrot.slane %v4745_v55, 5 }
 0x2ca   : > { %2885 = vst.msk [vmem:[#allocation3 + $0xa0] sm:$0xff] %vm2874_vm1, %v8252_v5  ;;  %v4927_v61 = vsel %vm7121_vm12, %v6195_v53, %v4926_v58  ;;  %v5041_v35 = vld [vmem:[#allocation3 + $0x88] sm:$0xff]  ;;  %v6196_v5 = vrot.slane %v4744_v13, 9  ;;  %v6197_v12 = vrot.slane %v4746_v36, 9  ;;  %v4748_v27 = vld [vmem:[#allocation2 + $0x130] sm:$0xe] }
 0x2cb   : > { %5020 = vst.msk [vmem:[#allocation3 + $0xc8] sm:$0xff] %vm1697_vm14, %v6212_v39  ;;  %v6213_v43 = vcombine.low %v4923_v31, %v4927_v61  ;;  %1713 = vst.msk [vmem:[#allocation3 + $0xf0] sm:$0xff] %vm1697_vm14, %v6643_v51  ;;  %v4934_v21 = vrot.slane %v4747_v47, 5  ;;  %v4749_v17 = vld [vmem:[#allocation2 + $0x134] sm:$0x1]  ;;  %v6198_v45 = vrot.slane %v4748_v27, 9  ;;  %v3474_v20 = vpop.permute.xlu0 %3473 }
 0x2cc   : > { %v4750_v62 = vld [vmem:[#allocation2 + $0x138] sm:$0xe]  ;;  %v4931_v56 = vsel %vm7121_vm12, %v6196_v5, %v4930_v38  ;;  %v4751_v8 = vld [vmem:[#allocation2 + $0x13c] sm:$0x1]  ;;  %v4938_v2 = vrot.slane %v4749_v17, 5  ;;  %v4023_v28 = vpop.permute.xlu1 %4022  ;;  %v5042_v44 = vld [vmem:[#allocation3 + $0x90] sm:$0xff] }
 0x2cd   : > { %5021 = vst.msk [vmem:[#allocation3 + $0xd8] sm:$0xff] %vm1697_vm14, %v6213_v43  ;;  %v6199_v10 = vrot.slane %v4750_v62, 9  ;;  %v4935_v57 = vsel %vm7121_vm12, %v6197_v12, %v4934_v21  ;;  %v4942_v26 = vrot.slane %v4751_v8, 5  ;;  %v5043_v33 = vld [vmem:[#allocation3 + $0x98] sm:$0xff] }
 0x2ce   : > { %5272 = vmatmul.mubr.bf16.gmra.mrb[24].mxu1 %v5038_v32  ;;  %v6214_v9 = vcombine.low %v4931_v56, %v4935_v57  ;;  %v4939_v23 = vsel %vm7121_vm12, %v6198_v45, %v4938_v2  ;;  %v5045_v40 = vld [vmem:[#allocation3 + $0xa8] sm:$0xff] }
 0x2cf   : > { %6234 = vmatprep.mubr.msk.bf16.mxu1 %vm1697_vm14, %v5041_v35  ;;  %v4943_v24 = vsel %vm7121_vm12, %v6199_v10, %v4942_v26  ;;  %v2851_v7 = vpop.permute.xlu0 %2850 }
 0x2d0   : > { %5022 = vst.msk [vmem:[#allocation3 + $0xe8] sm:$0xff] %vm1697_vm14, %v6214_v9  ;;  %v6215_v30 = vcombine.low %v4939_v23, %v4943_v24  ;;  %v3472_v4 = vpop.permute.xlu1 %3471 }
 0x2d1   : > { %3510 = vst.msk [vmem:[#allocation3 + $0xa0] sm:$0xff] %vm3499_vm2, %v3472_v4 }
 0x2d2   : > { %5023 = vst.msk [vmem:[#allocation3 + $0xf8] sm:$0xff] %vm1697_vm14, %v6215_v30  ;;  %v5049_v59 = vld [vmem:[#allocation3 + $0xc8] sm:$0xff] }
 0x2d3   : > { %3879 = vst.msk [vmem:[#allocation3 + $0xa0] sm:$0xff] %vm3868_vm3, %v8355_v60 }
 0x2d4   : > { %4057 = vst.msk [vmem:[#allocation3 + $0xa0] sm:$0xff] %vm4046_vm6, %v8232_v37  ;;  %v5047_v37 = vld [vmem:[#allocation3 + $0xb8] sm:$0xff] }
 0x2d5   : > { %v4644_v29 = vpop.permute.xlu0 %4643  ;;  %v5051_v18 = vld [vmem:[#allocation3 + $0xd8] sm:$0xff] }
 0x2d6   : > { %5280 = vmatmul.mubr.bf16.gmra.mrb[28].mxu1 %v5040_v49  ;;  %4682 = vst.msk [vmem:[#allocation3 + $0xa0] sm:$0xff] %vm4671_vm8, %v4644_v29 }
 0x2d7   : > { %6235 = vmatprep.mubr.msk.bf16.mxu1 %vm1697_vm14, %v5043_v33  ;;  %v5053_v12 = vld [vmem:[#allocation3 + $0xe8] sm:$0xff] }
 0x2d9   : > { %v3845_v11 = vpop.permute.xlu0 %3844  ;;  %v5055_v9 = vld [vmem:[#allocation3 + $0xf8] sm:$0xff] }
 0x2da   : > { %v2300_v34 = vpop.permute.xlu1 %2299 }
 0x2db   : > { %2337 = vst.msk [vmem:[#allocation3 + $0xb0] sm:$0xff] %vm2325_vm15, %v2300_v34 }
 0x2dc   : > { %2709 = vst.msk [vmem:[#allocation3 + $0xb0] sm:$0xff] %vm2697_vm0, %v8376_v16 }
 0x2dd   : > { %2886 = vst.msk [vmem:[#allocation3 + $0xb0] sm:$0xff] %vm2874_vm1, %v8223_v52  ;;  %v5044_v60 = vld [vmem:[#allocation3 + $0xa0] sm:$0xff]  ;;  %v2676_v14 = vpop.permute.xlu0 %2675 }
 0x2de   : > { %5288 = vmatmul.mubr.bf16.gmra.mrb[32].mxu1 %v5042_v44  ;;  %3511 = vst.msk [vmem:[#allocation3 + $0xb0] sm:$0xff] %vm3499_vm2, %v3474_v20 }
 0x2df   : > { %6236 = vmatprep.mubr.msk.bf16.mxu1 %vm1697_vm14, %v5045_v40  ;;  %3880 = vst.msk [vmem:[#allocation3 + $0xb0] sm:$0xff] %vm3868_vm3, %v8321_v54 }
 0x2e0   : > { %4058 = vst.msk [vmem:[#allocation3 + $0xb0] sm:$0xff] %vm4046_vm6, %v8221_v48 }
 0x2e1   : > { %v2674_v50 = vpop.permute.xlu1 %2673  ;;  %4683 = vst.msk [vmem:[#allocation3 + $0xb0] sm:$0xff] %vm4671_vm8, %v4646_v63  ;;  %v4025_v25 = vpop.permute.xlu0 %4024 }
 0x2e5   : > { %v3847_v16 = vpop.permute.xlu1 %3846 }
 0x2e6   : > { %5296 = vmatmul.mubr.bf16.gmra.mrb[36].mxu1 %v5044_v60 }
 0x2e7   : > { %6237 = vmatprep.mubr.msk.bf16.mxu1 %vm1697_vm14, %v5047_v37 }
 0x2e8   : > { %v5046_v15 = vld [vmem:[#allocation3 + $0xb0] sm:$0xff] }
 0x2e9   : > { %v4027_v52 = vpop.permute.xlu1 %4026 }
 0x2ed   : > { %v2302_v54 = vpop.permute.xlu0 %2301  ;;  %v3476_v48 = vpop.permute.xlu1 %3475 }
 0x2ee   : > { %5304 = vmatmul.mubr.bf16.gmra.mrb[40].mxu1 %v5046_v15  ;;  %2338 = vst.msk [vmem:[#allocation3 + $0xc0] sm:$0xff] %vm2325_vm15, %v2302_v54 }
 0x2ef   : > { %6238 = vmatprep.mubr.msk.bf16.mxu1 %vm1697_vm14, %v5049_v59  ;;  %2710 = vst.msk [vmem:[#allocation3 + $0xc0] sm:$0xff] %vm2697_vm0, %v2674_v50 }
 0x2f0   : > { %2887 = vst.msk [vmem:[#allocation3 + $0xc0] sm:$0xff] %vm2874_vm1, %v2851_v7 }
 0x2f1   : > { %3512 = vst.msk [vmem:[#allocation3 + $0xc0] sm:$0xff] %vm3499_vm2, %v3476_v48  ;;  %v3478_v1 = vpop.permute.xlu0 %3477 }
 0x2f2   : > { %3881 = vst.msk [vmem:[#allocation3 + $0xc0] sm:$0xff] %vm3868_vm3, %v3845_v11 }
 0x2f3   : > { %4059 = vst.msk [vmem:[#allocation3 + $0xc0] sm:$0xff] %vm4046_vm6, %v4023_v28 }
 0x2f5   : > { %v2304_v41 = vpop.permute.xlu1 %2303  ;;  %v2855_v46 = vpop.permute.xlu0 %2854 }
 0x2f6   : > { %2339 = vst.msk [vmem:[#allocation3 + $0xd0] sm:$0xff] %vm2325_vm15, %v2304_v41 }
 0x2f7   : > { %2711 = vst.msk [vmem:[#allocation3 + $0xd0] sm:$0xff] %vm2697_vm0, %v2676_v14 }
 0x2f8   : > { %2888 = vst.msk [vmem:[#allocation3 + $0xd0] sm:$0xff] %vm2874_vm1, %v8393_v6  ;;  %v8460_v6 = vld [vmem:[%s8704_s4] ss:$0 sm:$0xff] }
 0x2f9   : > { %3513 = vst.msk [vmem:[#allocation3 + $0xd0] sm:$0xff] %vm3499_vm2, %v3478_v1  ;;  %v2678_v39 = vpop.permute.xlu1 %2677 }
 0x2fa   : > { %3882 = vst.msk [vmem:[#allocation3 + $0xd0] sm:$0xff] %vm3868_vm3, %v3847_v16 }
 0x2fb   : > { %4060 = vst.msk [vmem:[#allocation3 + $0xd0] sm:$0xff] %vm4046_vm6, %v4025_v25 }
 0x2ff   : > { %v4648_v19 = vpop.permute.xlu0 %4647 }
 0x300   : > { %4684 = vst.msk [vmem:[#allocation3 + $0xc0] sm:$0xff] %vm4671_vm8, %v4648_v19 }
 0x302   : > { %v4650_v0 = vpop.permute.xlu1 %4649 }
 0x303   : > { %4685 = vst.msk [vmem:[#allocation3 + $0xd0] sm:$0xff] %vm4671_vm8, %v4650_v0  ;;  %v3849_v42 = vpop.permute.xlu0 %3848  ;;  %v5225_v58 = vpop.f32.mrb[0].mxu1 }
 0x304   : > { %v5226_v32 = vadd.f32 %v8460_v6, %v5225_v58  ;;  %v5227_v31 = vpop.f32.mrb[1].mxu1 }
 0x305   : > { %v5228_v13 = vpop.f32.mrb[2].mxu1 }
 0x306   : > { %v2857_v22 = vpop.permute.xlu1 %2856  ;;  %v5229_v36 = vadd.f32 %v8460_v6, %v5228_v13  ;;  %v5230_v47 = vpop.f32.mrb[3].mxu1  ;;  %v5346_v27 = vmax.f32 %v5226_v32, 0.0 }
 0x307   : > { %v5048_v3 = vld [vmem:[#allocation3 + $0xc0] sm:$0xff]  ;;  %v5217_v51 = vpop.f32.mrb[32].mxu0 }
 0x308   : > { %5312 = vmatmul.mubr.bf16.gmra.mrb[44].mxu1 %v5048_v3  ;;  %v5218_v61 = vadd.f32 %v8460_v6, %v5217_v51  ;;  %v5219_v55 = vpop.f32.mrb[33].mxu0  ;;  %v5347_v63 = vmax.f32 %v5229_v36, 0.0 }
 0x309   : > { %6239 = vmatprep.mubr.msk.bf16.mxu1 %vm1697_vm14, %v5051_v18  ;;  %v5220_v35 = vpop.f32.mrb[34].mxu0 }
 0x30a   : > { %v5050_v5 = vld [vmem:[#allocation3 + $0xd0] sm:$0xff]  ;;  %v5221_v38 = vadd.f32 %v8460_v6, %v5220_v35  ;;  %v5222_v21 = vpop.f32.mrb[35].mxu0  ;;  %v5344_v17 = vmax.f32 %v5218_v61, 0.0  ;;  %v5377_v56 = vpack.c.bf16 %v5347_v63, %v5346_v27 }
 0x30b   : > { %v2306_v53 = vpop.permute.xlu0 %2305 }
 0x30c   : > { %2340 = vst.msk [vmem:[#allocation3 + $0xe0] sm:$0xff] %vm2325_vm15, %v2306_v53  ;;  %v5345_v62 = vmax.f32 %v5221_v38, 0.0 }
 0x30d   : > { %2712 = vst.msk [vmem:[#allocation3 + $0xe0] sm:$0xff] %vm2697_vm0, %v2678_v39 }
 0x30e   : > { %2889 = vst.msk [vmem:[#allocation3 + $0xe0] sm:$0xff] %vm2874_vm1, %v2855_v46  ;;  %v5376_v8 = vpack.c.bf16 %v5345_v62, %v5344_v17 }
 0x30f   : > { %v3480_v43 = vpop.permute.xlu1 %3479  ;;  %v2680_v45 = vpop.permute.xlu0 %2679 }
 0x310   : > { %3514 = vst.msk [vmem:[#allocation3 + $0xe0] sm:$0xff] %vm3499_vm2, %v3480_v43  ;;  %5320 = vmatmul.mubr.bf16.gmra.mrb[48].mxu1 %v5050_v5  ;;  %6460 = vmatprep.mubr.msk.bf16.mxu0 %vm1697_vm14, %v5376_v8 }
 0x311   : > { %3883 = vst.msk [vmem:[#allocation3 + $0xe0] sm:$0xff] %vm3868_vm3, %v3849_v42  ;;  %6240 = vmatprep.mubr.msk.bf16.mxu1 %vm1697_vm14, %v5053_v12  ;;  %6461 = vmatmul.mubr.msk.bf16.vlgmr.msra.gmra.mrb[36].mxu0 %vm1697_vm14, %v5377_v56 }
 0x312   : > { %4061 = vst.msk [vmem:[#allocation3 + $0xe0] sm:$0xff] %vm4046_vm6, %v4027_v52 }
 0x317   : > { %v2308_v2 = vpop.permute.xlu1 %2307 }
 0x318   : > { %2341 = vst.msk [vmem:[#allocation3 + $0xf0] sm:$0xff] %vm2325_vm15, %v2308_v2 }
 0x319   : > { %2713 = vst.msk [vmem:[#allocation3 + $0xf0] sm:$0xff] %vm2697_vm0, %v2680_v45 }
 0x31a   : > { %2890 = vst.msk [vmem:[#allocation3 + $0xf0] sm:$0xff] %vm2874_vm1, %v2857_v22  ;;  %v4652_v10 = vpop.permute.xlu0 %4651 }
 0x31b   : > { %4686 = vst.msk [vmem:[#allocation3 + $0xe0] sm:$0xff] %vm4671_vm8, %v4652_v10  ;;  %v3851_v20 = vpop.permute.xlu1 %3850 }
 0x322   : > { %v5052_v26 = vld [vmem:[#allocation3 + $0xe0] sm:$0xff] }
 0x323   : > { %5328 = vmatmul.mubr.bf16.gmra.mrb[52].mxu1 %v5052_v26 }
 0x324   : > { %v3482_v57 = vpop.permute.xlu0 %3481  ;;  %6241 = vmatprep.mubr.msk.bf16.mxu1 %vm1697_vm14, %v5055_v9 }
 0x325   : > { %3515 = vst.msk [vmem:[#allocation3 + $0xf0] sm:$0xff] %vm3499_vm2, %v3482_v57 }
 0x326   : > { %3884 = vst.msk [vmem:[#allocation3 + $0xf0] sm:$0xff] %vm3868_vm3, %v3851_v20 }
 0x328   : > { %v4029_v23 = vpop.permute.xlu0 %4028 }
 0x329   : > { %4062 = vst.msk [vmem:[#allocation3 + $0xf0] sm:$0xff] %vm4046_vm6, %v4029_v23 }
 0x32a   : > { %v5233_v49 = vpop.f32.mrb[4].mxu1 }
 0x32b   : > { %v5234_v24 = vadd.f32 %v8460_v6, %v5233_v49  ;;  %v5235_v30 = vpop.f32.mrb[5].mxu1 }
 0x32c   : > { %v5236_v33 = vpop.f32.mrb[6].mxu1 }
 0x32d   : > { %v5237_v7 = vadd.f32 %v8460_v6, %v5236_v33  ;;  %v5238_v4 = vpop.f32.mrb[7].mxu1  ;;  %v5348_v29 = vmax.f32 %v5234_v24, 0.0 }
 0x32f   : > { %v4654_v28 = vpop.permute.xlu1 %4653  ;;  %v5349_v44 = vmax.f32 %v5237_v7, 0.0 }
 0x330   : > { %4687 = vst.msk [vmem:[#allocation3 + $0xf0] sm:$0xff] %vm4671_vm8, %v4654_v28 }
 0x331   : > { %v5378_v40 = vpack.c.bf16 %v5349_v44, %v5348_v29 }
 0x333   : > { %6464 = vmatprep.mubr.msk.bf16.mxu0 %vm1697_vm14, %v5378_v40 }
 0x337   : > { %v5054_v34 = vld [vmem:[#allocation3 + $0xf0] sm:$0xff] }
 0x338   : > { %5336 = vmatmul.mubr.bf16.gmra.mrb[56].mxu1 %v5054_v34 }
 0x35d   : > { %v5241_v11 = vpop.f32.mrb[8].mxu1 }
 0x35e   : > { %v5242_v60 = vadd.f32 %v8460_v6, %v5241_v11  ;;  %v5243_v37 = vpop.f32.mrb[9].mxu1 }
 0x35f   : > { %v5244_v50 = vpop.f32.mrb[10].mxu1 }
 0x360   : > { %v5245_v14 = vadd.f32 %v8460_v6, %v5244_v50  ;;  %v5246_v16 = vpop.f32.mrb[11].mxu1  ;;  %v5350_v25 = vmax.f32 %v5242_v60, 0.0 }
 0x362   : > { %v5351_v52 = vmax.f32 %v5245_v14, 0.0 }
 0x364   : > { %v5379_v15 = vpack.c.bf16 %v5351_v52, %v5350_v25 }
 0x366   : > { %6465 = vmatmul.mubr.msk.bf16.gmra.mrb[40].mxu0 %vm1697_vm14, %v5379_v15 }
 0x36a   : > { %v5249_v59 = vpop.f32.mrb[12].mxu1 }
 0x36b   : > { %v5250_v54 = vadd.f32 %v8460_v6, %v5249_v59  ;;  %v5251_v48 = vpop.f32.mrb[13].mxu1 }
 0x36c   : > { %v5252_v1 = vpop.f32.mrb[14].mxu1 }
 0x36d   : > { %v5253_v41 = vadd.f32 %v8460_v6, %v5252_v1  ;;  %v5254_v46 = vpop.f32.mrb[15].mxu1  ;;  %v5352_v39 = vmax.f32 %v5250_v54, 0.0 }
 0x36f   : > { %v5353_v19 = vmax.f32 %v5253_v41, 0.0 }
 0x371   : > { %v5380_v0 = vpack.c.bf16 %v5353_v19, %v5352_v39 }
 0x373   : > { %6468 = vmatprep.mubr.msk.bf16.mxu0 %vm1697_vm14, %v5380_v0 }
 0x391   : > { %v5257_v42 = vpop.f32.mrb[16].mxu1 }
 0x392   : > { %v5258_v3 = vadd.f32 %v8460_v6, %v5257_v42  ;;  %v5259_v18 = vpop.f32.mrb[17].mxu1 }
 0x393   : > { %v5260_v22 = vpop.f32.mrb[18].mxu1 }
 0x394   : > { %v5261_v53 = vadd.f32 %v8460_v6, %v5260_v22  ;;  %v5262_v58 = vpop.f32.mrb[19].mxu1  ;;  %v5354_v32 = vmax.f32 %v5258_v3, 0.0 }
 0x396   : > { %v5355_v31 = vmax.f32 %v5261_v53, 0.0 }
 0x398   : > { %v5381_v51 = vpack.c.bf16 %v5355_v31, %v5354_v32 }
 0x399   : > { %v5265_v13 = vpop.f32.mrb[20].mxu1 }
 0x39a   : > { %6469 = vmatmul.mubr.msk.bf16.gmra.mrb[44].mxu0 %vm1697_vm14, %v5381_v51  ;;  %v5266_v61 = vadd.f32 %v8460_v6, %v5265_v13  ;;  %v5267_v55 = vpop.f32.mrb[21].mxu1 }
 0x39b   : > { %v5268_v36 = vpop.f32.mrb[22].mxu1 }
 0x39c   : > { %v5269_v47 = vadd.f32 %v8460_v6, %v5268_v36  ;;  %v5270_v35 = vpop.f32.mrb[23].mxu1  ;;  %v5356_v43 = vmax.f32 %v5266_v61, 0.0 }
 0x39e   : > { %v5357_v5 = vmax.f32 %v5269_v47, 0.0  ;;  %v6366_v47 = vld [vmem:[%s6908_s15 + $0x8] sm:$0xff]  }
 0x3a0   : > { %v5382_v38 = vpack.c.bf16 %v5357_v5, %v5356_v43  ;;  %v6303_v5 = vld [vmem:[%s6908_s15] sm:$0xff]  }
 0x3a1   : > { %v5273_v12 = vpop.f32.mrb[24].mxu1 }
 0x3a2   : > { %v5274_v27 = vadd.f32 %v8460_v6, %v5273_v12  ;;  %v5275_v63 = vpop.f32.mrb[25].mxu1  ;;  %6472 = vmatprep.mubr.msk.bf16.mxu0 %vm1697_vm14, %v5382_v38  ;;  %v8524_v38 = vld [vmem:[%s8706_s6] ss:$0 sm:$0xff] }
 0x3a3   : > { %v5276_v21 = vpop.f32.mrb[26].mxu1  ;;  %v6308_v63 = vunpack.c.l.bf16 %v6366_v47 }
 0x3a4   : > { %v5277_v17 = vadd.f32 %v8460_v6, %v5276_v21  ;;  %v5278_v62 = vpop.f32.mrb[27].mxu1  ;;  %v5358_v56 = vmax.f32 %v5274_v27, 0.0 }
 0x3a6   : > { %v5359_v8 = vmax.f32 %v5277_v17, 0.0  ;;  %v6304_v17 = vunpack.c.l.bf16 %v6303_v5 }
 0x3a8   : > { %v5383_v45 = vpack.c.bf16 %v5359_v8, %v5358_v56 }
 0x3a9   : > { %v5281_v2 = vpop.f32.mrb[28].mxu1 }
 0x3aa   : > { %6473 = vmatmul.mubr.msk.bf16.gmra.mrb[48].mxu0 %vm1697_vm14, %v5383_v45  ;;  %v5282_v10 = vadd.f32 %v8460_v6, %v5281_v2  ;;  %v5283_v57 = vpop.f32.mrb[29].mxu1  ;;  %v6309_v45 = vunpack.c.h.bf16 %v6366_v47 }
 0x3ab   : > { %v5284_v26 = vpop.f32.mrb[30].mxu1  ;;  %v6305_v57 = vunpack.c.h.bf16 %v6303_v5 }
 0x3ac   : > { %v5285_v20 = vadd.f32 %v8460_v6, %v5284_v26  ;;  %v5286_v9 = vpop.f32.mrb[31].mxu1  ;;  %v5360_v23 = vmax.f32 %v5282_v10, 0.0 }
 0x3ae   : > { %v5361_v49 = vmax.f32 %v5285_v20, 0.0 }
 0x3b0   : > { %v5384_v28 = vpack.c.bf16 %v5361_v49, %v5360_v23 }
 0x3b1   : > { %v5289_v24 = vpop.f32.mrb[32].mxu1 }
 0x3b2   : > { %v5290_v30 = vadd.f32 %v8460_v6, %v5289_v24  ;;  %v5291_v33 = vpop.f32.mrb[33].mxu1  ;;  %6476 = vmatprep.mubr.msk.bf16.mxu0 %vm1697_vm14, %v5384_v28 }
 0x3b3   : > { %v5292_v7 = vpop.f32.mrb[34].mxu1 }
 0x3b4   : > { %v5293_v4 = vadd.f32 %v8460_v6, %v5292_v7  ;;  %v5294_v29 = vpop.f32.mrb[35].mxu1  ;;  %v5362_v44 = vmax.f32 %v5290_v30, 0.0 }
 0x3b6   : > { %v5363_v40 = vmax.f32 %v5293_v4, 0.0 }
 0x3b8   : > { %v5385_v34 = vpack.c.bf16 %v5363_v40, %v5362_v44 }
 0x3b9   : > { %v5297_v11 = vpop.f32.mrb[36].mxu1 }
 0x3ba   : > { %6477 = vmatmul.mubr.msk.bf16.gmra.mrb[52].mxu0 %vm1697_vm14, %v5385_v34  ;;  %v5298_v60 = vadd.f32 %v8460_v6, %v5297_v11  ;;  %v5299_v37 = vpop.f32.mrb[37].mxu1 }
 0x3bb   : > { %v5300_v50 = vpop.f32.mrb[38].mxu1 }
 0x3bc   : > { %v5301_v14 = vadd.f32 %v8460_v6, %v5300_v50  ;;  %v5302_v16 = vpop.f32.mrb[39].mxu1  ;;  %v5364_v25 = vmax.f32 %v5298_v60, 0.0 }
 0x3be   : > { %v5365_v52 = vmax.f32 %v5301_v14, 0.0 }
 0x3c0   : > { %v5386_v15 = vpack.c.bf16 %v5365_v52, %v5364_v25 }
 0x3c1   : > { %v5305_v59 = vpop.f32.mrb[40].mxu1 }
 0x3c2   : > { %6480 = vmatprep.mubr.msk.bf16.mxu0 %vm1697_vm14, %v5386_v15  ;;  %v5306_v54 = vadd.f32 %v8460_v6, %v5305_v59  ;;  %v5307_v48 = vpop.f32.mrb[41].mxu1 }
 0x3c3   : > { %v5308_v1 = vpop.f32.mrb[42].mxu1 }
 0x3c4   : > { %v5309_v41 = vadd.f32 %v8460_v6, %v5308_v1  ;;  %v5310_v46 = vpop.f32.mrb[43].mxu1  ;;  %v5366_v39 = vmax.f32 %v5306_v54, 0.0 }
 0x3c6   : > { %v5367_v19 = vmax.f32 %v5309_v41, 0.0 }
 0x3c8   : > { %v5387_v0 = vpack.c.bf16 %v5367_v19, %v5366_v39 }
 0x3ca   : > { %6481 = vmatmul.mubr.msk.bf16.gmra.mrb[56].mxu0 %vm1697_vm14, %v5387_v0 }
 0x3db   : > { %v5313_v42 = vpop.f32.mrb[44].mxu1 }
 0x3dc   : > { %v5314_v3 = vadd.f32 %v8460_v6, %v5313_v42  ;;  %v5315_v18 = vpop.f32.mrb[45].mxu1  ;;  %v6368_v42 = vld [vmem:[%s6908_s15 + $0x18] sm:$0xff]  }
 0x3dd   : > { %v5316_v22 = vpop.f32.mrb[46].mxu1  ;;  %v6316_v18 = vunpack.c.l.bf16 %v6368_v42 }
 0x3de   : > { %v5317_v53 = vadd.f32 %v8460_v6, %v5316_v22  ;;  %v5318_v58 = vpop.f32.mrb[47].mxu1  ;;  %v5368_v32 = vmax.f32 %v5314_v3, 0.0  ;;  %v6367_v3 = vld [vmem:[%s6908_s15 + $0x10] sm:$0xff]  }
 0x3e0   : > { %v5369_v31 = vmax.f32 %v5317_v53, 0.0  ;;  %v6312_v53 = vunpack.c.l.bf16 %v6367_v3 }
 0x3e2   : > { %v5388_v51 = vpack.c.bf16 %v5369_v31, %v5368_v32  ;;  %v6317_v31 = vunpack.c.h.bf16 %v6368_v42 }
 0x3e3   : > { %v5321_v13 = vpop.f32.mrb[48].mxu1 }
 0x3e4   : > { %v5322_v61 = vadd.f32 %v8460_v6, %v5321_v13  ;;  %v5323_v55 = vpop.f32.mrb[49].mxu1  ;;  %6484 = vmatprep.mubr.msk.bf16.mxu0 %vm1697_vm14, %v5388_v51  ;;  %v6462_v21 = vpop.f32.mrb[36].mxu0 }
 0x3e5   : > { %v5324_v36 = vpop.f32.mrb[50].mxu1  ;;  %v5562_v56 = vadd.f32 %v6462_v21, %v8524_v38  ;;  %v5553_v8 = vpop.f32.mrb[37].mxu0 }
 0x3e6   : > { %v5325_v35 = vadd.f32 %v8460_v6, %v5324_v36  ;;  %v5326_v43 = vpop.f32.mrb[51].mxu1  ;;  %v5370_v12 = vmax.f32 %v5322_v61, 0.0  ;;  %v5554_v2 = vadd.f32 %v8524_v38, %v5553_v8  ;;  %v6463_v10 = vpop.f32.mrb[38].mxu0 }
 0x3e7   : > { %v5682_v26 = vadd.f32 %v6308_v63, %v5562_v56  ;;  %v5565_v20 = vadd.f32 %v6463_v10, %v8524_v38  ;;  %v5556_v9 = vpop.f32.mrb[39].mxu0 }
 0x3e8   : > { %v5371_v27 = vmax.f32 %v5325_v35, 0.0  ;;  %v5680_v23 = vadd.f32 %v6304_v17, %v5554_v2  ;;  %v5557_v49 = vadd.f32 %v8524_v38, %v5556_v9  ;;  %v6369_v2 = vld [vmem:[%s6908_s15 + $0x20] sm:$0xff]  }
 0x3e9   : > { %v5714_v28 = vmax.f32 %v5682_v26, 0.0  ;;  %v5683_v24 = vadd.f32 %v6309_v45, %v5565_v20  ;;  %v6370_v45 = vld [vmem:[%s6908_s15 + $0x28] sm:$0xff]   ;;  %v6320_v26 = vunpack.c.l.bf16 %v6369_v2 }
 0x3ea   : > { %v5389_v62 = vpack.c.bf16 %v5371_v27, %v5370_v12  ;;  %v5712_v30 = vmax.f32 %v5680_v23, 0.0  ;;  %v5681_v33 = vadd.f32 %v6305_v57, %v5557_v49  ;;  %v6324_v10 = vunpack.c.l.bf16 %v6370_v45 }
 0x3eb   : > { %v5746_v7 = vpack.c.bf16 %v5714_v28, %v5714_v28  ;;  %v5715_v4 = vmax.f32 %v5683_v24, 0.0  ;;  %v6325_v23 = vunpack.c.h.bf16 %v6370_v45  ;;  %v6321_v24 = vunpack.c.h.bf16 %v6369_v2 }
 0x3ec   : > { %6485 = vmatmul.mubr.msk.bf16.gmra.mrb[60].mxu0 %vm1697_vm14, %v5389_v62  ;;  %v5744_v29 = vpack.c.bf16 %v5712_v30, %v5712_v30  ;;  %v5713_v44 = vmax.f32 %v5681_v33, 0.0 }
 0x3ed   : > { %5779 = vst.msk [vmem:[%s8533_s8 + $0x8] sm:$0xf] %vm5776_vm4, %v5746_v7  ;;  %v5747_v40 = vpack.c.bf16 %v5715_v4, %v5715_v4 }
 0x3ee   : > { %5777 = vst.msk [vmem:[%s8533_s8] sm:$0xf] %vm5776_vm4, %v5744_v29  ;;  %v5745_v34 = vpack.c.bf16 %v5713_v44, %v5713_v44 }
 0x3ef   : > { %5780 = vst.msk [vmem:[%s8533_s8 + $0xc] sm:$0xf] %vm5776_vm4, %v5747_v40 }
 0x3f0   : > { %5778 = vst.msk [vmem:[%s8533_s8 + $0x4] sm:$0xf] %vm5776_vm4, %v5745_v34 }
 0x3f6   : > { %v5329_v11 = vpop.f32.mrb[52].mxu1 }
 0x3f7   : > { %v5330_v60 = vadd.f32 %v8460_v6, %v5329_v11  ;;  %v5331_v37 = vpop.f32.mrb[53].mxu1 }
 0x3f8   : > { %v5332_v50 = vpop.f32.mrb[54].mxu1 }
 0x3f9   : > { %v5333_v14 = vadd.f32 %v8460_v6, %v5332_v50  ;;  %v5334_v16 = vpop.f32.mrb[55].mxu1  ;;  %v5372_v25 = vmax.f32 %v5330_v60, 0.0 }
 0x3fb   : > { %v5373_v52 = vmax.f32 %v5333_v14, 0.0 }
 0x3fd   : > { %v5390_v15 = vpack.c.bf16 %v5373_v52, %v5372_v25  ;;  %v6372_v52 = vld [vmem:[%s6908_s15 + $0x38] sm:$0xff]  }
 0x3ff   : > { %6488 = vmatprep.mubr.msk.bf16.mxu0 %vm1697_vm14, %v5390_v15  ;;  %v6371_v15 = vld [vmem:[%s6908_s15 + $0x30] sm:$0xff]  }
 0x40b   : > { %v5337_v59 = vpop.f32.mrb[56].mxu1 }
 0x40c   : > { %v5338_v54 = vadd.f32 %v8460_v6, %v5337_v59  ;;  %v5339_v48 = vpop.f32.mrb[57].mxu1  ;;  %v6332_v59 = vunpack.c.l.bf16 %v6372_v52 }
 0x40d   : > { %v5340_v1 = vpop.f32.mrb[58].mxu1  ;;  %v6328_v48 = vunpack.c.l.bf16 %v6371_v15 }
 0x40e   : > { %v5341_v41 = vadd.f32 %v8460_v6, %v5340_v1  ;;  %v5342_v46 = vpop.f32.mrb[59].mxu1  ;;  %v5374_v39 = vmax.f32 %v5338_v54, 0.0  ;;  %v6313_v6 = vunpack.c.h.bf16 %v6367_v3 }
 0x40f   : > { %v6333_v46 = vunpack.c.h.bf16 %v6372_v52 }
 0x410   : > { %v5375_v19 = vmax.f32 %v5341_v41, 0.0 }
 0x412   : > { %v5391_v0 = vpack.c.bf16 %v5375_v19, %v5374_v39 }
 0x414   : > { %6489 = vmatmul.mubr.msk.bf16.gmra.mrb[64].mxu0 %vm1697_vm14, %v5391_v0  ;;  %v6329_v0 = vunpack.c.h.bf16 %v6371_v15 }
 0x439   : > { %v6466_v22 = vpop.f32.mrb[40].mxu0 }
 0x43a   : > { %v5578_v58 = vadd.f32 %v6466_v22, %v8524_v38  ;;  %v5569_v32 = vpop.f32.mrb[41].mxu0 }
 0x43b   : > { %v5570_v51 = vadd.f32 %v8524_v38, %v5569_v32  ;;  %v6467_v13 = vpop.f32.mrb[42].mxu0 }
 0x43c   : > { %v5686_v61 = vadd.f32 %v6316_v18, %v5578_v58  ;;  %v5581_v55 = vadd.f32 %v6467_v13, %v8524_v38  ;;  %v5572_v36 = vpop.f32.mrb[43].mxu0 }
 0x43d   : > { %v5684_v47 = vadd.f32 %v6312_v53, %v5570_v51  ;;  %v5573_v35 = vadd.f32 %v8524_v38, %v5572_v36 }
 0x43e   : > { %v5718_v43 = vmax.f32 %v5686_v61, 0.0  ;;  %v5687_v5 = vadd.f32 %v6317_v31, %v5581_v55 }
 0x43f   : > { %v5716_v12 = vmax.f32 %v5684_v47, 0.0  ;;  %v5685_v27 = vadd.f32 %v6313_v6, %v5573_v35  ;;  %v6374_v35 = vld [vmem:[%s6908_s15 + $0x48] sm:$0xff]  }
 0x440   : > { %v5750_v63 = vpack.c.bf16 %v5718_v43, %v5718_v43  ;;  %v5719_v21 = vmax.f32 %v5687_v5, 0.0  ;;  %v6373_v43 = vld [vmem:[%s6908_s15 + $0x40] sm:$0xff]   ;;  %v6340_v5 = vunpack.c.l.bf16 %v6374_v35 }
 0x441   : > { %v5748_v17 = vpack.c.bf16 %v5716_v12, %v5716_v12  ;;  %v5717_v62 = vmax.f32 %v5685_v27, 0.0  ;;  %v6336_v27 = vunpack.c.l.bf16 %v6373_v43 }
 0x442   : > { %5783 = vst.msk [vmem:[%s8533_s8 + $0x18] sm:$0xf] %vm5776_vm4, %v5750_v63  ;;  %v5751_v56 = vpack.c.bf16 %v5719_v21, %v5719_v21 }
 0x443   : > { %5781 = vst.msk [vmem:[%s8533_s8 + $0x10] sm:$0xf] %vm5776_vm4, %v5748_v17  ;;  %v5749_v8 = vpack.c.bf16 %v5717_v62, %v5717_v62  ;;  %v6341_v17 = vunpack.c.h.bf16 %v6374_v35 }
 0x444   : > { %5784 = vst.msk [vmem:[%s8533_s8 + $0x1c] sm:$0xf] %vm5776_vm4, %v5751_v56 }
 0x445   : > { %5782 = vst.msk [vmem:[%s8533_s8 + $0x14] sm:$0xf] %vm5776_vm4, %v5749_v8  ;;  %v6337_v8 = vunpack.c.h.bf16 %v6373_v43 }
 0x46d   : > { %v6470_v57 = vpop.f32.mrb[44].mxu0 }
 0x46e   : > { %v5594_v20 = vadd.f32 %v6470_v57, %v8524_v38  ;;  %v5585_v9 = vpop.f32.mrb[45].mxu0 }
 0x46f   : > { %v5586_v49 = vadd.f32 %v8524_v38, %v5585_v9  ;;  %v6471_v28 = vpop.f32.mrb[46].mxu0 }
 0x470   : > { %v5690_v30 = vadd.f32 %v6324_v10, %v5594_v20  ;;  %v5597_v33 = vadd.f32 %v6471_v28, %v8524_v38  ;;  %v5588_v7 = vpop.f32.mrb[47].mxu0 }
 0x471   : > { %v5688_v4 = vadd.f32 %v6320_v26, %v5586_v49  ;;  %v5589_v29 = vadd.f32 %v8524_v38, %v5588_v7 }
 0x472   : > { %v5722_v44 = vmax.f32 %v5690_v30, 0.0  ;;  %v5691_v40 = vadd.f32 %v6325_v23, %v5597_v33 }
 0x473   : > { %v5720_v34 = vmax.f32 %v5688_v4, 0.0  ;;  %v5689_v11 = vadd.f32 %v6321_v24, %v5589_v29  ;;  %v6376_v29 = vld [vmem:[%s6908_s15 + $0x58] sm:$0xff]  }
 0x474   : > { %v5754_v60 = vpack.c.bf16 %v5722_v44, %v5722_v44  ;;  %v5723_v37 = vmax.f32 %v5691_v40, 0.0  ;;  %v6375_v44 = vld [vmem:[%s6908_s15 + $0x50] sm:$0xff]   ;;  %v6348_v40 = vunpack.c.l.bf16 %v6376_v29 }
 0x475   : > { %v5752_v50 = vpack.c.bf16 %v5720_v34, %v5720_v34  ;;  %v5721_v14 = vmax.f32 %v5689_v11, 0.0  ;;  %v6344_v11 = vunpack.c.l.bf16 %v6375_v44 }
 0x476   : > { %5787 = vst.msk [vmem:[%s8533_s8 + $0x28] sm:$0xf] %vm5776_vm4, %v5754_v60  ;;  %v5755_v16 = vpack.c.bf16 %v5723_v37, %v5723_v37 }
 0x477   : > { %5785 = vst.msk [vmem:[%s8533_s8 + $0x20] sm:$0xf] %vm5776_vm4, %v5752_v50  ;;  %v5753_v25 = vpack.c.bf16 %v5721_v14, %v5721_v14  ;;  %v6349_v50 = vunpack.c.h.bf16 %v6376_v29 }
 0x478   : > { %5788 = vst.msk [vmem:[%s8533_s8 + $0x2c] sm:$0xf] %vm5776_vm4, %v5755_v16 }
 0x479   : > { %5786 = vst.msk [vmem:[%s8533_s8 + $0x24] sm:$0xf] %vm5776_vm4, %v5753_v25  ;;  %v6345_v25 = vunpack.c.h.bf16 %v6375_v44 }
 0x47d   : > { %v6474_v54 = vpop.f32.mrb[48].mxu0 }
 0x47e   : > { %v5610_v1 = vadd.f32 %v6474_v54, %v8524_v38  ;;  %v5601_v41 = vpop.f32.mrb[49].mxu0 }
 0x47f   : > { %v5602_v39 = vadd.f32 %v8524_v38, %v5601_v41  ;;  %v6475_v19 = vpop.f32.mrb[50].mxu0 }
 0x480   : > { %v5694_v42 = vadd.f32 %v6332_v59, %v5610_v1  ;;  %v5613_v3 = vadd.f32 %v6475_v19, %v8524_v38  ;;  %v5604_v18 = vpop.f32.mrb[51].mxu0 }
 0x481   : > { %v5692_v22 = vadd.f32 %v6328_v48, %v5602_v39  ;;  %v5605_v53 = vadd.f32 %v8524_v38, %v5604_v18 }
 0x482   : > { %v5726_v58 = vmax.f32 %v5694_v42, 0.0  ;;  %v5695_v32 = vadd.f32 %v6333_v46, %v5613_v3 }
 0x483   : > { %v5724_v31 = vmax.f32 %v5692_v22, 0.0  ;;  %v5693_v51 = vadd.f32 %v6329_v0, %v5605_v53  ;;  %v6378_v53 = vld [vmem:[%s6908_s15 + $0x68] sm:$0xff]  }
 0x484   : > { %v5758_v13 = vpack.c.bf16 %v5726_v58, %v5726_v58  ;;  %v5727_v6 = vmax.f32 %v5695_v32, 0.0  ;;  %v6377_v58 = vld [vmem:[%s6908_s15 + $0x60] sm:$0xff]   ;;  %v6356_v32 = vunpack.c.l.bf16 %v6378_v53 }
 0x485   : > { %v5756_v61 = vpack.c.bf16 %v5724_v31, %v5724_v31  ;;  %v5725_v55 = vmax.f32 %v5693_v51, 0.0  ;;  %v6352_v51 = vunpack.c.l.bf16 %v6377_v58 }
 0x486   : > { %5791 = vst.msk [vmem:[%s8533_s8 + $0x38] sm:$0xf] %vm5776_vm4, %v5758_v13  ;;  %v5759_v36 = vpack.c.bf16 %v5727_v6, %v5727_v6 }
 0x487   : > { %5789 = vst.msk [vmem:[%s8533_s8 + $0x30] sm:$0xf] %vm5776_vm4, %v5756_v61  ;;  %v5757_v47 = vpack.c.bf16 %v5725_v55, %v5725_v55  ;;  %v6357_v61 = vunpack.c.h.bf16 %v6378_v53 }
 0x488   : > { %5792 = vst.msk [vmem:[%s8533_s8 + $0x3c] sm:$0xf] %vm5776_vm4, %v5759_v36 }
 0x489   : > { %5790 = vst.msk [vmem:[%s8533_s8 + $0x34] sm:$0xf] %vm5776_vm4, %v5757_v47  ;;  %v6353_v47 = vunpack.c.h.bf16 %v6377_v58 }
 0x48d   : > { %v6478_v12 = vpop.f32.mrb[52].mxu0 }
 0x48e   : > { %v5626_v63 = vadd.f32 %v6478_v12, %v8524_v38  ;;  %v5617_v21 = vpop.f32.mrb[53].mxu0 }
 0x48f   : > { %v5618_v62 = vadd.f32 %v8524_v38, %v5617_v21  ;;  %v6479_v56 = vpop.f32.mrb[54].mxu0 }
 0x490   : > { %v5698_v45 = vadd.f32 %v6340_v5, %v5626_v63  ;;  %v5629_v2 = vadd.f32 %v6479_v56, %v8524_v38  ;;  %v5620_v10 = vpop.f32.mrb[55].mxu0 }
 0x491   : > { %v5696_v57 = vadd.f32 %v6336_v27, %v5618_v62  ;;  %v5621_v26 = vadd.f32 %v8524_v38, %v5620_v10 }
 0x492   : > { %v5730_v20 = vmax.f32 %v5698_v45, 0.0  ;;  %v5699_v9 = vadd.f32 %v6341_v17, %v5629_v2 }
 0x493   : > { %v5728_v23 = vmax.f32 %v5696_v57, 0.0  ;;  %v5697_v49 = vadd.f32 %v6337_v8, %v5621_v26  ;;  %v6380_v26 = vld [vmem:[%s6908_s15 + $0x78] sm:$0xff]  }
 0x494   : > { %v5762_v28 = vpack.c.bf16 %v5730_v20, %v5730_v20  ;;  %v5731_v24 = vmax.f32 %v5699_v9, 0.0  ;;  %v6379_v20 = vld [vmem:[%s6908_s15 + $0x70] sm:$0xff]   ;;  %v6364_v9 = vunpack.c.l.bf16 %v6380_v26  ;;  %s5824_s15 = sshll.u32 %s8533_s8, 4  ;;  %s8650_s15 = int_to_ptr.vmem [resolvable:$true] %s5824_s15 }
 0x495   : > { %v5760_v30 = vpack.c.bf16 %v5728_v23, %v5728_v23  ;;  %v5729_v33 = vmax.f32 %v5697_v49, 0.0  ;;  %v6360_v49 = vunpack.c.l.bf16 %v6379_v20  ;;  %s6677_s18 = scalar_lea.vmem %s8650_s15, 2048  ;;  %p6684_p8 = scmp.lt.s32.totalorder %s8650_s15, %s6682_s20 }
 0x496   : > { %5795 = vst.msk [vmem:[%s8533_s8 + $0x48] sm:$0xf] %vm5776_vm4, %v5762_v28  ;;  %v5763_v7 = vpack.c.bf16 %v5731_v24, %v5731_v24  ;;  %p6678_p6 = scmp.ne.s32.totalorder %s8650_s15, %s6677_s18  ;;  %p6685_p10 = scmp.lt.s32.totalorder %s6683_s23, %s6677_s18 }
 0x497   : > { %5793 = vst.msk [vmem:[%s8533_s8 + $0x40] sm:$0xf] %vm5776_vm4, %v5760_v30  ;;  %v5761_v4 = vpack.c.bf16 %v5729_v33, %v5729_v33  ;;  %v6365_v30 = vunpack.c.h.bf16 %v6380_v26 }
 0x498   : > { %5796 = vst.msk [vmem:[%s8533_s8 + $0x4c] sm:$0xf] %vm5776_vm4, %v5763_v7  ;;  %p6679_p12 = pnand %p6678_p6, %p8724_p11  ;;  %p6686_p0 = por %p6685_p10, %p6684_p8 }
 0x499   : > { %5794 = vst.msk [vmem:[%s8533_s8 + $0x44] sm:$0xf] %vm5776_vm4, %v5761_v4  ;;  %v6361_v4 = vunpack.c.h.bf16 %v6379_v20 }
 0x49a   : > { %p6680_p13 = pneg %p6679_p12 }
 0x49c   : > { %p6687_p2 = pnand %p6686_p0, %p6680_p13 }
 0x49d   : > { %v6482_v34 = vpop.f32.mrb[56].mxu0 }
 0x49e   : > { %v5642_v60 = vadd.f32 %v6482_v34, %v8524_v38  ;;  %v5633_v37 = vpop.f32.mrb[57].mxu0 }
 0x49f   : > { %v5634_v14 = vadd.f32 %v8524_v38, %v5633_v37  ;;  %v6483_v16 = vpop.f32.mrb[58].mxu0 }
 0x4a0   : > { %v5702_v52 = vadd.f32 %v6348_v40, %v5642_v60  ;;  %v5645_v15 = vadd.f32 %v6483_v16, %v8524_v38  ;;  %v5636_v59 = vpop.f32.mrb[59].mxu0 }
 0x4a1   : > { %v5700_v54 = vadd.f32 %v6344_v11, %v5634_v14  ;;  %v5637_v48 = vadd.f32 %v8524_v38, %v5636_v59 }
 0x4a2   : > { %v5734_v1 = vmax.f32 %v5702_v52, 0.0  ;;  %v5703_v41 = vadd.f32 %v6349_v50, %v5645_v15 }
 0x4a3   : > { %v5732_v46 = vmax.f32 %v5700_v54, 0.0  ;;  %v5701_v39 = vadd.f32 %v6345_v25, %v5637_v48 }
 0x4a4   : > { %v5766_v19 = vpack.c.bf16 %v5734_v1, %v5734_v1  ;;  %v5735_v0 = vmax.f32 %v5703_v41, 0.0 }
 0x4a5   : > { %v5764_v42 = vpack.c.bf16 %v5732_v46, %v5732_v46  ;;  %v5733_v3 = vmax.f32 %v5701_v39, 0.0 }
 0x4a6   : > { %5799 = vst.msk [vmem:[%s8533_s8 + $0x58] sm:$0xf] %vm5776_vm4, %v5766_v19  ;;  %v5767_v18 = vpack.c.bf16 %v5735_v0, %v5735_v0 }
 0x4a7   : > { %5797 = vst.msk [vmem:[%s8533_s8 + $0x50] sm:$0xf] %vm5776_vm4, %v5764_v42  ;;  %v5765_v22 = vpack.c.bf16 %v5733_v3, %v5733_v3 }
 0x4a8   : > { %5800 = vst.msk [vmem:[%s8533_s8 + $0x5c] sm:$0xf] %vm5776_vm4, %v5767_v18 }
 0x4a9   : > { %5798 = vst.msk [vmem:[%s8533_s8 + $0x54] sm:$0xf] %vm5776_vm4, %v5765_v22 }
 0x4bf   : > { %v6486_v31 = vpop.f32.mrb[60].mxu0 }
 0x4c0   : > { %v5658_v13 = vadd.f32 %v6486_v31, %v8524_v38  ;;  %v5649_v6 = vpop.f32.mrb[61].mxu0 }
 0x4c1   : > { %v5650_v55 = vadd.f32 %v8524_v38, %v5649_v6  ;;  %v6487_v36 = vpop.f32.mrb[62].mxu0 }
 0x4c2   : > { %v5706_v35 = vadd.f32 %v6356_v32, %v5658_v13  ;;  %v5661_v43 = vadd.f32 %v6487_v36, %v8524_v38  ;;  %v5652_v5 = vpop.f32.mrb[63].mxu0 }
 0x4c3   : > { %v5704_v12 = vadd.f32 %v6352_v51, %v5650_v55  ;;  %v5653_v27 = vadd.f32 %v8524_v38, %v5652_v5 }
 0x4c4   : > { %v5738_v63 = vmax.f32 %v5706_v35, 0.0  ;;  %v5707_v21 = vadd.f32 %v6357_v61, %v5661_v43 }
 0x4c5   : > { %v5736_v17 = vmax.f32 %v5704_v12, 0.0  ;;  %v5705_v62 = vadd.f32 %v6353_v47, %v5653_v27 }
 0x4c6   : > { %v5770_v56 = vpack.c.bf16 %v5738_v63, %v5738_v63  ;;  %v5739_v8 = vmax.f32 %v5707_v21, 0.0 }
 0x4c7   : > { %v5768_v45 = vpack.c.bf16 %v5736_v17, %v5736_v17  ;;  %v5737_v2 = vmax.f32 %v5705_v62, 0.0 }
 0x4c8   : > { %5803 = vst.msk [vmem:[%s8533_s8 + $0x68] sm:$0xf] %vm5776_vm4, %v5770_v56  ;;  %v5771_v10 = vpack.c.bf16 %v5739_v8, %v5739_v8 }
 0x4c9   : > { %5801 = vst.msk [vmem:[%s8533_s8 + $0x60] sm:$0xf] %vm5776_vm4, %v5768_v45  ;;  %v5769_v57 = vpack.c.bf16 %v5737_v2, %v5737_v2 }
 0x4ca   : > { %5804 = vst.msk [vmem:[%s8533_s8 + $0x6c] sm:$0xf] %vm5776_vm4, %v5771_v10 }
 0x4cb   : > { %5802 = vst.msk [vmem:[%s8533_s8 + $0x64] sm:$0xf] %vm5776_vm4, %v5769_v57 }
 0x4e7   : > { %v6490_v23 = vpop.f32.mrb[64].mxu0 }
 0x4e8   : > { %v5674_v28 = vadd.f32 %v6490_v23, %v8524_v38  ;;  %v5665_v24 = vpop.f32.mrb[65].mxu0 }
 0x4e9   : > { %v5666_v33 = vadd.f32 %v8524_v38, %v5665_v24  ;;  %v6491_v7 = vpop.f32.mrb[66].mxu0 }
 0x4ea   : > { %v5710_v29 = vadd.f32 %v6364_v9, %v5674_v28  ;;  %v5677_v44 = vadd.f32 %v6491_v7, %v8524_v38  ;;  %v5668_v40 = vpop.f32.mrb[67].mxu0 }
 0x4eb   : > { %v5708_v34 = vadd.f32 %v6360_v49, %v5666_v33  ;;  %v5669_v11 = vadd.f32 %v8524_v38, %v5668_v40 }
 0x4ec   : > { %v5742_v60 = vmax.f32 %v5710_v29, 0.0  ;;  %v5711_v37 = vadd.f32 %v6365_v30, %v5677_v44 }
 0x4ed   : > { %v5740_v50 = vmax.f32 %v5708_v34, 0.0  ;;  %v5709_v14 = vadd.f32 %v6361_v4, %v5669_v11 }
 0x4ee   : > { %v5774_v16 = vpack.c.bf16 %v5742_v60, %v5742_v60  ;;  %v5743_v25 = vmax.f32 %v5711_v37, 0.0 }
 0x4ef   : > { %v5772_v52 = vpack.c.bf16 %v5740_v50, %v5740_v50  ;;  %v5741_v15 = vmax.f32 %v5709_v14, 0.0 }
 0x4f0   : > { %5807 = vst.msk [vmem:[%s8533_s8 + $0x78] sm:$0xf] %vm5776_vm4, %v5774_v16  ;;  %v5775_v59 = vpack.c.bf16 %v5743_v25, %v5743_v25 }
 0x4f1   : > { %5805 = vst.msk [vmem:[%s8533_s8 + $0x70] sm:$0xf] %vm5776_vm4, %v5772_v52  ;;  %v5773_v38 = vpack.c.bf16 %v5741_v15, %v5741_v15 }
 0x4f2   : > { %5808 = vst.msk [vmem:[%s8533_s8 + $0x7c] sm:$0xf] %vm5776_vm4, %v5775_v59 }
 0x4f3   : > { %5806 = vst.msk [vmem:[%s8533_s8 + $0x74] sm:$0xf] %vm5776_vm4, %v5773_v38 }
 0x4f4   : > { %6690 = shalt.err (!%p6687_p2)
}
 0x4f5   : > { %s6691_s29 = scalar_lea.hbm %s8646_s9, 2048  ;;  %s6695_s17 = scalar_lea.hbm %s8707_s7, 4096 }
 0x4f6   : > { %p6692_p4 = scmp.ne.s32.totalorder %s8646_s9, %s6691_s29  ;;  %p6696_p9 = scmp.lt.u32.totalorder %s8646_s9, %s8707_s7 }
 0x4f7   : > { %p6697_p1 = scmp.lt.u32.totalorder %s6695_s17, %s6691_s29  ;;  %p6699_p6 = scmp.lt.u32.totalorder %s6691_s29, %s8646_s9 }
 0x4f8   : > { %p6693_p5 = pnand %p6692_p4, %p8724_p11 }
 0x4f9   : > { %p6698_p3 = por %p6697_p1, %p6696_p9 }
 0x4fa   : > { %p6694_p7 = pneg %p6693_p5 }
 0x4fb   : > { %p6700_p12 = por %p6699_p6, %p6698_p3 }
 0x4fd   : > { %p6701_p13 = pnand %p6700_p12, %p6694_p7 }
 0x4ff   : > { %6704 = shalt.err (!%p6701_p13)
}
 0x500   : > { %s6757_s18 = smov 4  }
 0x501   : > { %6512 = dma.vmem_to_hbm [thread:$0]  (%p8724_p11), %s8650_s15, 2048, %s8646_s9, %s5810_s28, %s6755_s21, %s6755_s21, %s6757_s18  }
 0x502 PF: > { %s5839_s22 = sand.u32 1, %s6731_s24   ;;  %p8725_p8 = scmp.ne.s32.totalorder %s8712_s14, 0 }
 0x503   : > { %p8726_p10 = scmp.ge.s32.totalorder %s6743_s27, 2  ;;  %s5840_s20 = scalar_lea.sflag [#allocation6], %s5839_s22 }
 0x505   : > { %p6519_p0 = pnand %p8726_p10, %p8725_p8 }
 0x507   : > { %6726 = dma.done.wait (!%p6519_p0), %s5840_s20, 2048  }
 0x508   : > { %6728 = vsyncadd (!%p6519_p0), %s5840_s20, 4294965248  ;;  %p20_p2 = scmp.ge.s32.totalorder %s6823_s30, 4   ;;  %s8727_s24 = smov %s6735_s25 }
 0x509   : > { %s8728_s25 = smov %s6739_s26  ;;  %s8729_s26 = smov %s6835_s10 }
 0x50a   : > { %s8730_s27 = smov %s6823_s30  ;;  %22 = sbr.rel (!%p20_p2) target bundleno = 5 (0x5), region = 96 }
 0x511   :  { %5845 = vsyncpa [#allocation5], 1 }
 0x512   :  { %5847 = vsyncpa [#allocation5 + $0x1], 1 }
 0x513   :  { %5848 = vsyncpa [#allocation6], 1 }
 0x514   :  { %5850 = vsyncpa [#allocation6 + $0x1], 1 }

</bundles_post_ra>
